<compile_context>
chip_gen: v6e
topology: v6e:2x2x1
jax: 0.10.0
libtpu: 0.0.40
codegen_flags: <defaults>
</compile_context>

<pallas_src>
import jax
import jax.numpy as jnp
from jax.experimental import pallas as pl
from jax.experimental.pallas import tpu as pltpu


def mlp_kernel(x_ref, w1_ref, b1_ref, w2_ref, b2_ref, o_ref, acc_ref):
    k = pl.program_id(0)

    # Zero the f32 hidden accumulator on the first K-tile.
    @pl.when(k == 0)
    def _init():
        acc_ref[...] = jnp.zeros_like(acc_ref)

    # hidden1 partial: (B, tk)[bf16] @ (tk, Hp)[bf16] -> f32 MXU accumulate.
    acc_ref[...] += jnp.dot(
        x_ref[...], w1_ref[...], preferred_element_type=jnp.float32
    )

    # On the last K-tile: bias + sigmoid, second layer, sigmoid, store.
    @pl.when(k == pl.num_programs(0) - 1)
    def _finalize():
        h = jax.nn.sigmoid(acc_ref[...] + b1_ref[...])          # f32 VPU/EUP
        # Contract the H axes; w2 kept lane-dense as (n_out, Hp).  Cast h to
        # bf16 only for the MXU operands; accumulate in f32.
        o = jax.lax.dot_general(
            h.astype(w2_ref.dtype), w2_ref[...],
            dimension_numbers=(((1,), (1,)), ((), ())),
            preferred_element_type=jnp.float32,
        )
        o_ref[...] = jax.nn.sigmoid(o + b2_ref[...]).astype(o_ref.dtype)


def _pick_tk(K):
    """Largest lane-aligned K-tile that evenly divides K."""
    for t in (4096, 2048, 1024, 512, 256, 128):
        if K % t == 0:
            return t
    return K  # tiny / irregular K: single step, whole-K tile


def mlp_forward(x, w1_t, b1, w2, b2, *, tk=None):
    """x: (B, K) bf16; w1_t: (K, Hp) bf16; b1: (1, Hp) f32;
    w2: (n_out, Hp) bf16 (NOT transposed); b2: (1, n_out) f32."""
    B, K = x.shape
    Hp = w1_t.shape[1]
    n_out = w2.shape[0]
    if tk is None:
        tk = _pick_tk(K)
    assert K % tk == 0, (K, tk)
    nk = K // tk

    grid_spec = pltpu.PrefetchScalarGridSpec(
        num_scalar_prefetch=0,
        grid=(nk,),
        in_specs=[
            pl.BlockSpec((B, tk), lambda k: (0, k)),       # x: stream K tiles
            pl.BlockSpec((tk, Hp), lambda k: (k, 0)),      # w1: stream K tiles
            pl.BlockSpec((1, Hp), lambda k: (0, 0)),       # b1: resident
            pl.BlockSpec((n_out, Hp), lambda k: (0, 0)),   # w2: resident
            pl.BlockSpec((1, n_out), lambda k: (0, 0)),    # b2: resident
        ],
        out_specs=pl.BlockSpec((B, n_out), lambda k: (0, 0)),  # resident output
        scratch_shapes=[pltpu.VMEM((B, Hp), jnp.float32)],     # hidden1 acc
    )

    # Double-buffered streaming tiles (bf16) + resident small operands (f32-ish).
    vmem_bytes = 2 * (B * tk + tk * Hp) * 2 + (B * Hp + 2 * Hp + n_out * Hp) * 4
    vmem_limit = min(max(2 * vmem_bytes, 4 << 20), 32 << 20)  # safe on v5e/v6e/v7x

    return pl.pallas_call(
        mlp_kernel,
        out_shape=jax.ShapeDtypeStruct((B, n_out), jnp.float32),
        grid_spec=grid_spec,
        compiler_params=pltpu.CompilerParams(
            dimension_semantics=("arbitrary",),   # K axis is a reduction
            vmem_limit_bytes=vmem_limit,
        ),
    )(x, w1_t, b1, w2, b2)


def xavier_uniform(key, fan_in, fan_out):
    # matches torch.nn.init.xavier_uniform_ (gain=1); PyTorch layout (out, in)
    limit = jnp.sqrt(6.0 / (fan_in + fan_out))
    return jax.random.uniform(
        key, (fan_out, fan_in), jnp.float32, minval=-limit, maxval=limit
    )


if __name__ == "__main__":
    # Small shapes consistent with the module (n_inputs x 1000 x n_outputs MLP);
    # N_IN is kept small but big enough to exercise the K-tiled pipeline.
    B, N_IN, HIDDEN, N_OUT = 8, 2048, 1000, 2
    H_PAD = 1024  # lane-aligned hidden dim (multiple of 128)

    key = jax.random.PRNGKey(0)
    kx, kw1, kb1, kw2, kb2 = jax.random.split(key, 5)

    x = jax.random.normal(kx, (B, N_IN), jnp.float32)

    # PyTorch Linear stores weight as (out, in); xavier_uniform_ on that shape.
    w1 = xavier_uniform(kw1, N_IN, HIDDEN)            # (HIDDEN, N_IN)
    w2 = xavier_uniform(kw2, HIDDEN, N_OUT)           # (N_OUT, HIDDEN)
    # Bias init (PyTorch default: U(-1/sqrt(fan_in), 1/sqrt(fan_in))).
    b1 = jax.random.uniform(kb1, (1, HIDDEN), jnp.float32,
                            minval=-1.0 / jnp.sqrt(N_IN), maxval=1.0 / jnp.sqrt(N_IN))
    b2 = jax.random.uniform(kb2, (1, N_OUT), jnp.float32,
                            minval=-1.0 / jnp.sqrt(HIDDEN), maxval=1.0 / jnp.sqrt(HIDDEN))

    # --- host-side layout prep ---------------------------------------------
    # Layer 1: transpose to (n_in, H) so kernel does x @ W; pad H -> H_PAD with
    # zeros (zero w1 cols + zero b1 entries).
    w1_t = jnp.zeros((N_IN, H_PAD), jnp.float32).at[:, :HIDDEN].set(w1.T)
    b1_p = jnp.zeros((1, H_PAD), jnp.float32).at[:, :HIDDEN].set(b1)
    # Layer 2: keep (n_out, H) lane-dense layout; pad H axis with zeros so the
    # sigmoid(0)=0.5 padded columns of h contribute nothing.
    w2_p = jnp.zeros((N_OUT, H_PAD), jnp.float32).at[:, :HIDDEN].set(w2)

    # bf16 storage for the matmul operands (HBM-bandwidth win); biases stay f32.
    x_bf = x.astype(jnp.bfloat16)
    w1_bf = w1_t.astype(jnp.bfloat16)
    w2_bf = w2_p.astype(jnp.bfloat16)

    out = mlp_forward(x_bf, w1_bf, b1_p, w2_bf, b2)
    out = jax.block_until_ready(out)
    assert out.shape == (B, N_OUT)

    # Reference 1: same mixed precision as the kernel (should match tightly).
    h_ref = jax.nn.sigmoid(
        jnp.dot(x_bf, w1_bf, preferred_element_type=jnp.float32) + b1_p)
    y_ref_bf = jax.nn.sigmoid(
        jax.lax.dot_general(h_ref.astype(jnp.bfloat16), w2_bf,
                            dimension_numbers=(((1,), (1,)), ((), ())),
                            preferred_element_type=jnp.float32) + b2)
    assert jnp.allclose(out, y_ref_bf, atol=1e-3, rtol=1e-3)

    # Reference 2: exact f32 PyTorch-module semantics (looser tol for bf16 cast).
    h_f32 = jax.nn.sigmoid(x @ w1.T + b1)
    y_f32 = jax.nn.sigmoid(h_f32 @ w2.T + b2)
    assert jnp.allclose(out, y_f32, atol=2e-2, rtol=2e-2)

    print("KERNEL_OK")
</pallas_src>

<mosaic_0001>
module attributes {stable_mosaic.version = 11 : i64} {
  func.func @mlp_kernel(%arg0: i32, %arg1: memref<8x2048xbf16, #tpu.memory_space<vmem>>, %arg2: memref<2048x1024xbf16, #tpu.memory_space<vmem>>, %arg3: memref<1x1024xf32, #tpu.memory_space<vmem>>, %arg4: memref<2x1024xbf16, #tpu.memory_space<vmem>>, %arg5: memref<1x2xf32, #tpu.memory_space<vmem>>, %arg6: memref<8x2xf32, #tpu.memory_space<vmem>>, %arg7: memref<8x1024xf32, #tpu.memory_space<vmem>>) attributes {dimension_semantics = [#tpu.dimension_semantics<arbitrary>], iteration_bounds = array<i64: 1>, scalar_prefetch = 0 : i64, scratch_operands = 1 : i64, tpu.core_type = #tpu.core_type<tc>, window_params = [{transform_indices = @transform_0, window_bounds = array<i64: 8, 2048>}, {transform_indices = @transform_1, window_bounds = array<i64: 2048, 1024>}, {pipeline_mode = #tpu.pipeline_mode<synchronous>, transform_indices = @transform_2, window_bounds = array<i64: 1, 1024>}, {pipeline_mode = #tpu.pipeline_mode<synchronous>, transform_indices = @transform_3, window_bounds = array<i64: 2, 1024>}, {pipeline_mode = #tpu.pipeline_mode<synchronous>, transform_indices = @transform_4, window_bounds = array<i64: 1, 2>}, {pipeline_mode = #tpu.pipeline_mode<synchronous>, transform_indices = @transform_5, window_bounds = array<i64: 8, 2>}]} {
    %c0_i32 = arith.constant 0 : i32
    %0 = arith.cmpi eq, %arg0, %c0_i32 : i32
    %1 = arith.extui %0 : i1 to i32
    %c0_i32_0 = arith.constant 0 : i32
    %2 = arith.cmpi ne, %1, %c0_i32_0 : i32
    scf.if %2 {
      %cst_10 = arith.constant 0.000000e+00 : f32
      %12 = vector.broadcast %cst_10 : f32 to vector<8x1024xf32>
      %c0_11 = arith.constant 0 : index
      %c0_12 = arith.constant 0 : index
      %13 = vector.load %arg7[%c0_11, %c0_12] : memref<8x1024xf32, #tpu.memory_space<vmem>>, vector<8x1024xf32>
      tpu.vector_store %arg7[%c0_11, %c0_12], %12 {strides = array<i32>} : memref<8x1024xf32, #tpu.memory_space<vmem>>, vector<8x1024xf32>,
    } else {
    }
    %c0 = arith.constant 0 : index
    %c0_1 = arith.constant 0 : index
    %3 = vector.load %arg7[%c0, %c0_1] : memref<8x1024xf32, #tpu.memory_space<vmem>>, vector<8x1024xf32>
    %c0_2 = arith.constant 0 : index
    %c0_3 = arith.constant 0 : index
    %4 = vector.load %arg1[%c0_2, %c0_3] : memref<8x2048xbf16, #tpu.memory_space<vmem>>, vector<8x2048xbf16>
    %c0_4 = arith.constant 0 : index
    %c0_5 = arith.constant 0 : index
    %5 = vector.load %arg2[%c0_4, %c0_5] : memref<2048x1024xbf16, #tpu.memory_space<vmem>>, vector<2048x1024xbf16>
    %cst = arith.constant dense<0.000000e+00> : vector<8x1024xf32>
    %6 = tpu.matmul %4, %5, %cst {dimension_numbers = #tpu.dot_dimension_numbers<[1], [0], [0], [1], [0, 0, 1, 1], [], []>} : vector<8x2048xbf16>, vector<2048x1024xbf16>, vector<8x1024xf32> -> vector<8x1024xf32>
    %7 = arith.addf %3, %6 : vector<8x1024xf32>
    %c0_6 = arith.constant 0 : index
    %c0_7 = arith.constant 0 : index
    %8 = vector.load %arg7[%c0_6, %c0_7] : memref<8x1024xf32, #tpu.memory_space<vmem>>, vector<8x1024xf32>
    tpu.vector_store %arg7[%c0_6, %c0_7], %7 {strides = array<i32>} : memref<8x1024xf32, #tpu.memory_space<vmem>>, vector<8x1024xf32>,
    %c0_i32_8 = arith.constant 0 : i32
    %9 = arith.cmpi eq, %arg0, %c0_i32_8 : i32
    %10 = arith.extui %9 : i1 to i32
    %c0_i32_9 = arith.constant 0 : i32
    %11 = arith.cmpi ne, %10, %c0_i32_9 : i32
    scf.if %11 {
      %c0_10 = arith.constant 0 : index
      %c0_11 = arith.constant 0 : index
      %12 = vector.load %arg7[%c0_10, %c0_11] : memref<8x1024xf32, #tpu.memory_space<vmem>>, vector<8x1024xf32>
      %c0_12 = arith.constant 0 : index
      %c0_13 = arith.constant 0 : index
      %13 = vector.load %arg3[%c0_12, %c0_13] : memref<1x1024xf32, #tpu.memory_space<vmem>>, vector<1x1024xf32>
      %14 = vector.broadcast %13 : vector<1x1024xf32> to vector<8x1024xf32>
      %15 = arith.addf %12, %14 : vector<8x1024xf32>
      %16 = arith.negf %15 : vector<8x1024xf32>
      %17 = math.exp %16 : vector<8x1024xf32>
      %cst_14 = arith.constant 1.000000e+00 : f32
      %18 = vector.broadcast %cst_14 : f32 to vector<8x1024xf32>
      %19 = arith.addf %18, %17 : vector<8x1024xf32>
      %20 = arith.divf %18, %19 : vector<8x1024xf32>
      %21 = arith.truncf %20 : vector<8x1024xf32> to vector<8x1024xbf16>
      %c0_15 = arith.constant 0 : index
      %c0_16 = arith.constant 0 : index
      %22 = vector.load %arg4[%c0_15, %c0_16] : memref<2x1024xbf16, #tpu.memory_space<vmem>>, vector<2x1024xbf16>
      %cst_17 = arith.constant dense<0.000000e+00> : vector<8x2xf32>
      %23 = tpu.matmul %21, %22, %cst_17 {dimension_numbers = #tpu.dot_dimension_numbers<[1], [1], [0], [0], [0, 0, 1, 0], [], []>} : vector<8x1024xbf16>, vector<2x1024xbf16>, vector<8x2xf32> -> vector<8x2xf32>
      %c0_18 = arith.constant 0 : index
      %c0_19 = arith.constant 0 : index
      %24 = vector.load %arg5[%c0_18, %c0_19] : memref<1x2xf32, #tpu.memory_space<vmem>>, vector<1x2xf32>
      %25 = vector.broadcast %24 : vector<1x2xf32> to vector<8x2xf32>
      %26 = arith.addf %23, %25 : vector<8x2xf32>
      %27 = arith.negf %26 : vector<8x2xf32>
      %28 = math.exp %27 : vector<8x2xf32>
      %cst_20 = arith.constant 1.000000e+00 : f32
      %29 = vector.broadcast %cst_20 : f32 to vector<8x2xf32>
      %30 = arith.addf %29, %28 : vector<8x2xf32>
      %31 = arith.divf %29, %30 : vector<8x2xf32>
      %c0_21 = arith.constant 0 : index
      %c0_22 = arith.constant 0 : index
      %32 = vector.load %arg6[%c0_21, %c0_22] : memref<8x2xf32, #tpu.memory_space<vmem>>, vector<8x2xf32>
      tpu.vector_store %arg6[%c0_21, %c0_22], %31 {strides = array<i32>} : memref<8x2xf32, #tpu.memory_space<vmem>>, vector<8x2xf32>,
    } else {
    }
    return
  }
  func.func @transform_0(%arg0: i32) -> (i32, i32) {
    %c0_i32 = arith.constant 0 : i32
    %c0_i32_0 = arith.constant 0 : i32
    return %c0_i32, %arg0 : i32, i32
  }
  func.func @transform_1(%arg0: i32) -> (i32, i32) {
    %c0_i32 = arith.constant 0 : i32
    %c0_i32_0 = arith.constant 0 : i32
    return %arg0, %c0_i32 : i32, i32
  }
  func.func @transform_2(%arg0: i32) -> (i32, i32) {
    %c0_i32 = arith.constant 0 : i32
    %c0_i32_0 = arith.constant 0 : i32
    %c0_i32_1 = arith.constant 0 : i32
    return %c0_i32, %c0_i32_0 : i32, i32
  }
  func.func @transform_3(%arg0: i32) -> (i32, i32) {
    %c0_i32 = arith.constant 0 : i32
    %c0_i32_0 = arith.constant 0 : i32
    %c0_i32_1 = arith.constant 0 : i32
    return %c0_i32, %c0_i32_0 : i32, i32
  }
  func.func @transform_4(%arg0: i32) -> (i32, i32) {
    %c0_i32 = arith.constant 0 : i32
    %c0_i32_0 = arith.constant 0 : i32
    %c0_i32_1 = arith.constant 0 : i32
    return %c0_i32, %c0_i32_0 : i32, i32
  }
  func.func @transform_5(%arg0: i32) -> (i32, i32) {
    %c0_i32 = arith.constant 0 : i32
    %c0_i32_0 = arith.constant 0 : i32
    %c0_i32_1 = arith.constant 0 : i32
    return %c0_i32, %c0_i32_0 : i32, i32
  }
}

</mosaic_0001>

<bundles_post_ra>
// kernel: tpu_custom_call.1
= control target key start
LH: loop header
LB: loop body
LE: loop exit
PB: predicated region body
PF: predicated region fallthrough
CT: control target
= control target key end

     0   :  { %10 = vsyncpa [#allocation4], 0  ;;  %s9519_s0 = inlined_call_operand.hbm [shape: bf16[8,2048], index: 0, kind: input, shape index: {}]   ;;  %s9520_s1 = inlined_call_operand.hbm [shape: bf16[2048,1024], index: 1, kind: input, shape index: {}]   ;;  %s9521_s2 = inlined_call_operand.hbm [shape: f32[1,1024], index: 2, kind: input, shape index: {}]   ;;  %s9522_s3 = inlined_call_operand.hbm [shape: bf16[2,1024], index: 3, kind: input, shape index: {}]   ;;  %s9523_s4 = inlined_call_operand.hbm [shape: f32[1,2], index: 4, kind: input, shape index: {}]   ;;  %s9524_s5 = inlined_call_operand.vmem [shape: f32[8,2], index: 5, kind: output, shape index: {}]  }
   0x1   :  { %11 = vsyncpa [#allocation6], 0 }
   0x2   :  { %12 = vsyncpa [#allocation9], 0  ;;  %s9212_s18 = smov [#allocation5]  }
   0x3   :  { %s28_s19 = sshll.u32 %s9212_s18, 4  ;;  %s29_s19 = int_to_ptr.vmem [resolvable:$true] %s28_s19 }
   0x4   :  { %s9114_s20 = scalar_lea.vmem %s29_s19, 131072  ;;  %p9119_p1 = scmp.lt.s32.totalorder %s29_s19, %s29_s19 }
   0x5   :  { %p9115_p0 = scmp.ne.s32.totalorder %s29_s19, %s9114_s20  ;;  %p9120_p2 = scmp.lt.s32.totalorder %s9114_s20, %s9114_s20 }
   0x7   :  { %p9121_p3 = por %p9120_p2, %p9119_p1 }
   0x9   :  { %p9122_p4 = pnand %p9121_p3, %p9115_p0 }
   0xb   :  { %9125 = shalt.err (!%p9122_p4)
}
   0xc   :  { %s9213_s21 = smov 512   ;;  %s9214_s22 = smov 32  }
   0xd   :  { %34 = dma.hbm_to_vmem [thread:$0]  %s9520_s1, 131072, %s29_s19, [#allocation6], %s9213_s21, %s9213_s21, %s9214_s22  }
   0xe   :  { %s9215_s25 = smov [#allocation8]   ;;  %s9216_s27 = smov [#allocation3]  }
   0xf   :  { %s51_s26 = sshll.u32 %s9215_s25, 4  ;;  %s19_s28 = sshll.u32 %s9216_s27, 4  ;;  %s52_s26 = int_to_ptr.vmem [resolvable:$true] %s51_s26  ;;  %s20_s28 = int_to_ptr.vmem [resolvable:$true] %s19_s28 }
  0x10   :  { %s9134_s29 = scalar_lea.vmem %s52_s26, 128  ;;  %p9139_p6 = scmp.lt.s32.totalorder %s52_s26, %s52_s26 }
  0x11   :  { %p9135_p5 = scmp.ne.s32.totalorder %s52_s26, %s9134_s29  ;;  %p9140_p7 = scmp.lt.s32.totalorder %s9134_s29, %s9134_s29 }
  0x13   :  { %p9141_p8 = por %p9140_p7, %p9139_p6 }
  0x15   :  { %p9142_p9 = pnand %p9141_p8, %p9135_p5 }
  0x17   :  { %9145 = shalt.err (!%p9142_p9)
}
  0x18   :  { %54 = dma.hbm_to_vmem [thread:$0]  %s9522_s3, 128, %s52_s26, [#allocation9]  }
  0x19   :  { %s9154_s7 = scalar_lea.vmem %s20_s28, 1024  ;;  %p9159_p11 = scmp.lt.s32.totalorder %s20_s28, %s20_s28 }
  0x1a   :  { %p9155_p10 = scmp.ne.s32.totalorder %s20_s28, %s9154_s7  ;;  %p9160_p12 = scmp.lt.s32.totalorder %s9154_s7, %s9154_s7 }
  0x1c   :  { %p9161_p13 = por %p9160_p12, %p9159_p11 }
  0x1e   :  { %p9162_p0 = pnand %p9161_p13, %p9155_p10 }
  0x20   :  { %9165 = shalt.err (!%p9162_p0)
}
  0x21   :  { %22 = dma.hbm_to_vmem [thread:$0]  %s9519_s0, 1024, %s20_s28, [#allocation4]  }
  0x22   :  { %s9217_s9 = smov [#allocation7]   ;;  %s9218_s11 = smov [#allocation10]  }
  0x23   :  { %s41_s10 = sshll.u32 %s9217_s9, 4  ;;  %s61_s12 = sshll.u32 %s9218_s11, 4  ;;  %s42_s10 = int_to_ptr.vmem [resolvable:$true] %s41_s10  ;;  %s62_s12 = int_to_ptr.vmem [resolvable:$true] %s61_s12 }
  0x24   :  { %s9174_s13 = scalar_lea.vmem %s42_s10, 128  ;;  %p9179_p2 = scmp.lt.s32.totalorder %s42_s10, %s42_s10 }
  0x25   :  { %p9175_p1 = scmp.ne.s32.totalorder %s42_s10, %s9174_s13  ;;  %p9180_p3 = scmp.lt.s32.totalorder %s9174_s13, %s9174_s13 }
  0x27   :  { %p9181_p4 = por %p9180_p3, %p9179_p2 }
  0x29   :  { %p9182_p5 = pnand %p9181_p4, %p9175_p1 }
  0x2b   :  { %9185 = shalt.err (!%p9182_p5)
}
  0x2c   :  { %44 = dma.hbm_to_vmem [thread:$0]  %s9521_s2, 128, %s42_s10, [#allocation6]  }
  0x2d   :  { %s9194_s15 = scalar_lea.vmem %s62_s12, 16  ;;  %s9198_s0 = scalar_lea.vmem %s62_s12, 32 }
  0x2e   :  { %p9195_p6 = scmp.ne.s32.totalorder %s62_s12, %s9194_s15  ;;  %p9199_p7 = scmp.lt.s32.totalorder %s62_s12, %s62_s12 }
  0x2f   :  { %p9200_p8 = scmp.lt.s32.totalorder %s9198_s0, %s9194_s15 }
  0x31   :  { %p9201_p9 = por %p9200_p8, %p9199_p7 }
  0x33   :  { %p9202_p10 = pnand %p9201_p9, %p9195_p6 }
  0x35   :  { %9205 = shalt.err (!%p9202_p10)
}
  0x36   :  { %64 = dma.hbm_to_vmem [thread:$0]  %s9523_s4, 16, %s62_s12, [#allocation9]  }
  0x37   :  { %9206 = dma.done.wait [#allocation4], 1024  }
  0x38   :  { %9207 = vsyncadd [#allocation4], 4294966272 }
  0x39   :  { %9208 = dma.done.wait [#allocation6], 131200  }
  0x3a   :  { %9209 = vsyncadd [#allocation6], 4294836096 }
  0x3b   :  { %9210 = dma.done.wait [#allocation9], 144  }
  0x3c   :  { %9211 = vsyncadd [#allocation9], 4294967152  ;;  %v165_v0 = vld [vmem:[#allocation5 + $0x1c0] sm:$0xff]  ;;  %v9267_v54 = vld [vmem:[#allocation3 + $0x8] sm:$0xff]  ;;  %vm7986_vm0 = vcmask 15360  }
  0x3d   :  { %v169_v1 = vld [vmem:[#allocation5 + $0x1e0] sm:$0xff]  ;;  %v9275_v59 = vcombine.high %v9267_v54, %v9267_v54 }
  0x3e   :  { %v293_v2 = vld [vmem:[#allocation5 + $0x5c0] sm:$0xff]  ;;  %v8068_v3 = vcombine.high %v165_v0, %v169_v1  ;;  %v8067_v5 = vcombine.low %v165_v0, %v169_v1 }
  0x3f   :  { %v297_v4 = vld [vmem:[#allocation5 + $0x5e0] sm:$0xff]  ;;  %6382 = vmatprep.mubr.bf16.mxu1 %v9275_v59 }
  0x40   :  { %v157_v6 = vld [vmem:[#allocation5 + $0x180] sm:$0xff]  ;;  %v8196_v8 = vcombine.high %v293_v2, %v297_v4  ;;  %v8195_v9 = vcombine.low %v293_v2, %v297_v4  ;;  %6309 = vmatprep.subr.bf16.mxu0 %v8068_v3 }
  0x41   :  { %v161_v7 = vld [vmem:[#allocation5 + $0x1a0] sm:$0xff]  ;;  %6310 = vmatpush1.bf16.msra.mxu0 %v8067_v5 }
  0x42   :  { %v8060_v10 = vcombine.high %v157_v6, %v161_v7  ;;  %v285_v11 = vld [vmem:[#allocation5 + $0x580] sm:$0xff]  ;;  %6350 = vmatprep.subr.bf16.mxu1 %v8196_v8  ;;  %v8059_v18 = vcombine.low %v157_v6, %v161_v7 }
  0x43   :  { %v289_v12 = vld [vmem:[#allocation5 + $0x5a0] sm:$0xff]  ;;  %6351 = vmatpush1.bf16.msra.mxu1 %v8195_v9 }
  0x44   :  { %v149_v13 = vld [vmem:[#allocation5 + $0x140] sm:$0xff]  ;;  %v8188_v14 = vcombine.high %v285_v11, %v289_v12  ;;  %6311 = vmatprep.subr.bf16.mxu0 %v8060_v10  ;;  %v8187_v19 = vcombine.low %v285_v11, %v289_v12 }
  0x45   :  { %v153_v15 = vld [vmem:[#allocation5 + $0x160] sm:$0xff]  ;;  %6312 = vmatpush1.bf16.msra.mxu0 %v8059_v18 }
  0x46   :  { %v277_v16 = vld [vmem:[#allocation5 + $0x540] sm:$0xff]  ;;  %v8052_v20 = vcombine.high %v149_v13, %v153_v15  ;;  %6352 = vmatprep.subr.bf16.mxu1 %v8188_v14  ;;  %v8051_v26 = vcombine.low %v149_v13, %v153_v15 }
  0x47   :  { %v281_v17 = vld [vmem:[#allocation5 + $0x560] sm:$0xff]  ;;  %6353 = vmatpush1.bf16.msra.mxu1 %v8187_v19 }
  0x48   :  { %v8180_v21 = vcombine.high %v277_v16, %v281_v17  ;;  %v141_v22 = vld [vmem:[#allocation5 + $0x100] sm:$0xff]  ;;  %6313 = vmatprep.subr.bf16.mxu0 %v8052_v20  ;;  %v8179_v27 = vcombine.low %v277_v16, %v281_v17 }
  0x49   :  { %v145_v23 = vld [vmem:[#allocation5 + $0x120] sm:$0xff]  ;;  %6314 = vmatpush1.bf16.msra.mxu0 %v8051_v26 }
  0x4a   :  { %v269_v24 = vld [vmem:[#allocation5 + $0x500] sm:$0xff]  ;;  %v8044_v28 = vcombine.high %v141_v22, %v145_v23  ;;  %6354 = vmatprep.subr.bf16.mxu1 %v8180_v21  ;;  %v8043_v34 = vcombine.low %v141_v22, %v145_v23 }
  0x4b   :  { %v273_v25 = vld [vmem:[#allocation5 + $0x520] sm:$0xff]  ;;  %6355 = vmatpush1.bf16.msra.mxu1 %v8179_v27 }
  0x4c   :  { %v8172_v29 = vcombine.high %v269_v24, %v273_v25  ;;  %v133_v30 = vld [vmem:[#allocation5 + $0xc0] sm:$0xff]  ;;  %6315 = vmatprep.subr.bf16.mxu0 %v8044_v28  ;;  %v8171_v35 = vcombine.low %v269_v24, %v273_v25 }
  0x4d   :  { %v137_v31 = vld [vmem:[#allocation5 + $0xe0] sm:$0xff]  ;;  %6316 = vmatpush1.bf16.msra.mxu0 %v8043_v34 }
  0x4e   :  { %v261_v32 = vld [vmem:[#allocation5 + $0x4c0] sm:$0xff]  ;;  %v8036_v36 = vcombine.high %v133_v30, %v137_v31  ;;  %6356 = vmatprep.subr.bf16.mxu1 %v8172_v29  ;;  %v8035_v42 = vcombine.low %v133_v30, %v137_v31 }
  0x4f   :  { %v265_v33 = vld [vmem:[#allocation5 + $0x4e0] sm:$0xff]  ;;  %6357 = vmatpush1.bf16.msra.mxu1 %v8171_v35 }
  0x50   :  { %v8164_v37 = vcombine.high %v261_v32, %v265_v33  ;;  %v125_v38 = vld [vmem:[#allocation5 + $0x80] sm:$0xff]  ;;  %6317 = vmatprep.subr.bf16.mxu0 %v8036_v36  ;;  %v8163_v43 = vcombine.low %v261_v32, %v265_v33 }
  0x51   :  { %v129_v39 = vld [vmem:[#allocation5 + $0xa0] sm:$0xff]  ;;  %6318 = vmatpush1.bf16.msra.mxu0 %v8035_v42 }
  0x52   :  { %v253_v40 = vld [vmem:[#allocation5 + $0x480] sm:$0xff]  ;;  %v8028_v44 = vcombine.high %v125_v38, %v129_v39  ;;  %6358 = vmatprep.subr.bf16.mxu1 %v8164_v37  ;;  %v8027_v50 = vcombine.low %v125_v38, %v129_v39 }
  0x53   :  { %v257_v41 = vld [vmem:[#allocation5 + $0x4a0] sm:$0xff]  ;;  %6359 = vmatpush1.bf16.msra.mxu1 %v8163_v43 }
  0x54   :  { %v8156_v45 = vcombine.high %v253_v40, %v257_v41  ;;  %v117_v46 = vld [vmem:[#allocation5 + $0x40] sm:$0xff]  ;;  %6319 = vmatprep.subr.bf16.mxu0 %v8028_v44  ;;  %v8155_v51 = vcombine.low %v253_v40, %v257_v41 }
  0x55   :  { %v121_v47 = vld [vmem:[#allocation5 + $0x60] sm:$0xff]  ;;  %6320 = vmatpush1.bf16.msra.mxu0 %v8027_v50 }
  0x56   :  { %v245_v48 = vld [vmem:[#allocation5 + $0x440] sm:$0xff]  ;;  %v8020_v52 = vcombine.high %v117_v46, %v121_v47  ;;  %6360 = vmatprep.subr.bf16.mxu1 %v8156_v45  ;;  %v8019_v62 = vcombine.low %v117_v46, %v121_v47 }
  0x57   :  { %v249_v49 = vld [vmem:[#allocation5 + $0x460] sm:$0xff]  ;;  %6361 = vmatpush1.bf16.msra.mxu1 %v8155_v51 }
  0x58   :  { %v9265_v53 = vld [vmem:[#allocation3] sm:$0xff]  ;;  %v8148_v55 = vcombine.high %v245_v48, %v249_v49  ;;  %6321 = vmatprep.subr.bf16.mxu0 %v8020_v52  ;;  %v8147_v63 = vcombine.low %v245_v48, %v249_v49 }
  0x59   :  { %v109_v56 = vld [vmem:[#allocation5] sm:$0xff]  ;;  %v9271_v58 = vcombine.high %v9265_v53, %v9265_v53  ;;  %6322 = vmatpush1.bf16.msra.mxu0 %v8019_v62 }
  0x5a   :  { %v113_v57 = vld [vmem:[#allocation5 + $0x20] sm:$0xff]  ;;  %6362 = vmatprep.subr.bf16.mxu1 %v8148_v55 }
  0x5b   :  { %v237_v60 = vld [vmem:[#allocation5 + $0x400] sm:$0xff]  ;;  %6341 = vmatprep.mubr.bf16.mxu0 %v9271_v58  ;;  %v8012_v0 = vcombine.high %v109_v56, %v113_v57  ;;  %v8011_v6 = vcombine.low %v109_v56, %v113_v57  ;;  %6363 = vmatpush1.bf16.msra.mxu1 %v8147_v63 }
  0x5c   :  { %v241_v61 = vld [vmem:[#allocation5 + $0x420] sm:$0xff] }
  0x5d   :  { %v8140_v1 = vcombine.high %v237_v60, %v241_v61  ;;  %v229_v2 = vld [vmem:[#allocation5 + $0x3c0] sm:$0xff]  ;;  %6323 = vmatprep.subr.bf16.mxu0 %v8012_v0  ;;  %v8139_v7 = vcombine.low %v237_v60, %v241_v61 }
  0x5e   :  { %v233_v3 = vld [vmem:[#allocation5 + $0x3e0] sm:$0xff]  ;;  %6324 = vmatpush1.bf16.msra.mxu0 %v8011_v6 }
  0x5f   :  { %v357_v4 = vld [vmem:[#allocation5 + $0x7c0] sm:$0xff]  ;;  %v8132_v8 = vcombine.high %v229_v2, %v233_v3  ;;  %6364 = vmatprep.subr.bf16.mxu1 %v8140_v1  ;;  %v8131_v14 = vcombine.low %v229_v2, %v233_v3 }
  0x60   :  { %v361_v5 = vld [vmem:[#allocation5 + $0x7e0] sm:$0xff]  ;;  %6365 = vmatpush1.bf16.msra.mxu1 %v8139_v7 }
  0x61   :  { %v8260_v9 = vcombine.high %v357_v4, %v361_v5  ;;  %v221_v10 = vld [vmem:[#allocation5 + $0x380] sm:$0xff]  ;;  %6325 = vmatprep.subr.bf16.mxu0 %v8132_v8  ;;  %v8259_v15 = vcombine.low %v357_v4, %v361_v5 }
  0x62   :  { %v225_v11 = vld [vmem:[#allocation5 + $0x3a0] sm:$0xff]  ;;  %6326 = vmatpush2.bf16.msra.mxu0 %v8131_v14 }
  0x63   :  { %v349_v12 = vld [vmem:[#allocation5 + $0x780] sm:$0xff]  ;;  %v8124_v16 = vcombine.high %v221_v10, %v225_v11  ;;  %6366 = vmatprep.subr.bf16.mxu1 %v8260_v9  ;;  %v8123_v22 = vcombine.low %v221_v10, %v225_v11 }
  0x64   :  { %v353_v13 = vld [vmem:[#allocation5 + $0x7a0] sm:$0xff]  ;;  %6367 = vmatpush2.bf16.msra.mxu1 %v8259_v15 }
  0x65   :  { %v8252_v17 = vcombine.high %v349_v12, %v353_v13  ;;  %v213_v18 = vld [vmem:[#allocation5 + $0x340] sm:$0xff]  ;;  %6327 = vmatprep.subr.bf16.mxu0 %v8124_v16  ;;  %v8251_v23 = vcombine.low %v349_v12, %v353_v13  ;;  %v9281_v16 = vcombine.low %v9265_v53, %v9265_v53 }
  0x66   :  { %v217_v19 = vld [vmem:[#allocation5 + $0x360] sm:$0xff]  ;;  %6328 = vmatpush2.bf16.msra.mxu0 %v8123_v22  ;;  %v9289_v22 = vld [vmem:[#allocation3 + $0x18] sm:$0xff] }
  0x67   :  { %v341_v20 = vld [vmem:[#allocation5 + $0x740] sm:$0xff]  ;;  %v8116_v24 = vcombine.high %v213_v18, %v217_v19  ;;  %6368 = vmatprep.subr.bf16.mxu1 %v8252_v17  ;;  %v8115_v30 = vcombine.low %v213_v18, %v217_v19  ;;  %v9283_v19 = vld [vmem:[#allocation3 + $0x10] sm:$0xff] }
  0x68   :  { %v345_v21 = vld [vmem:[#allocation5 + $0x760] sm:$0xff]  ;;  %6369 = vmatpush2.bf16.msra.mxu1 %v8251_v23 }
  0x69   :  { %v8244_v25 = vcombine.high %v341_v20, %v345_v21  ;;  %v205_v26 = vld [vmem:[#allocation5 + $0x300] sm:$0xff]  ;;  %6329 = vmatprep.subr.bf16.mxu0 %v8116_v24  ;;  %v8243_v31 = vcombine.low %v341_v20, %v345_v21  ;;  %v9287_v20 = vcombine.low %v9267_v54, %v9267_v54 }
  0x6a   :  { %v209_v27 = vld [vmem:[#allocation5 + $0x320] sm:$0xff]  ;;  %6330 = vmatpush2.bf16.msra.mxu0 %v8115_v30 }
  0x6b   :  { %v333_v28 = vld [vmem:[#allocation5 + $0x700] sm:$0xff]  ;;  %v8108_v32 = vcombine.high %v205_v26, %v209_v27  ;;  %6370 = vmatprep.subr.bf16.mxu1 %v8244_v25  ;;  %v8107_v38 = vcombine.low %v205_v26, %v209_v27  ;;  %v9293_v27 = vcombine.high %v9283_v19, %v9283_v19 }
  0x6c   :  { %v337_v29 = vld [vmem:[#allocation5 + $0x720] sm:$0xff]  ;;  %6371 = vmatpush2.bf16.msra.mxu1 %v8243_v31 }
  0x6d   :  { %v8236_v33 = vcombine.high %v333_v28, %v337_v29  ;;  %v197_v34 = vld [vmem:[#allocation5 + $0x2c0] sm:$0xff]  ;;  %6331 = vmatprep.subr.bf16.mxu0 %v8108_v32  ;;  %v8235_v39 = vcombine.low %v333_v28, %v337_v29  ;;  %v9298_v29 = vcombine.high %v9289_v22, %v9289_v22 }
  0x6e   :  { %v201_v35 = vld [vmem:[#allocation5 + $0x2e0] sm:$0xff]  ;;  %6332 = vmatpush2.bf16.msra.mxu0 %v8107_v38 }
  0x6f   :  { %v325_v36 = vld [vmem:[#allocation5 + $0x6c0] sm:$0xff]  ;;  %v8100_v40 = vcombine.high %v197_v34, %v201_v35  ;;  %6372 = vmatprep.subr.bf16.mxu1 %v8236_v33  ;;  %v8099_v46 = vcombine.low %v197_v34, %v201_v35 }
  0x70   :  { %v329_v37 = vld [vmem:[#allocation5 + $0x6e0] sm:$0xff]  ;;  %6373 = vmatpush2.bf16.msra.mxu1 %v8235_v39 }
  0x71   :  { %v8228_v41 = vcombine.high %v325_v36, %v329_v37  ;;  %v189_v42 = vld [vmem:[#allocation5 + $0x280] sm:$0xff]  ;;  %6333 = vmatprep.subr.bf16.mxu0 %v8100_v40  ;;  %v8227_v47 = vcombine.low %v325_v36, %v329_v37 }
  0x72   :  { %v193_v43 = vld [vmem:[#allocation5 + $0x2a0] sm:$0xff]  ;;  %6334 = vmatpush2.bf16.msra.mxu0 %v8099_v46 }
  0x73   :  { %v317_v44 = vld [vmem:[#allocation5 + $0x680] sm:$0xff]  ;;  %v8092_v48 = vcombine.high %v189_v42, %v193_v43  ;;  %6374 = vmatprep.subr.bf16.mxu1 %v8228_v41  ;;  %v8091_v56 = vcombine.low %v189_v42, %v193_v43 }
  0x74   :  { %v321_v45 = vld [vmem:[#allocation5 + $0x6a0] sm:$0xff]  ;;  %6375 = vmatpush2.bf16.msra.mxu1 %v8227_v47 }
  0x75   :  { %v8220_v49 = vcombine.high %v317_v44, %v321_v45  ;;  %v181_v50 = vld [vmem:[#allocation5 + $0x240] sm:$0xff]  ;;  %6335 = vmatprep.subr.bf16.mxu0 %v8092_v48  ;;  %v8219_v57 = vcombine.low %v317_v44, %v321_v45 }
  0x76   :  { %v185_v51 = vld [vmem:[#allocation5 + $0x260] sm:$0xff]  ;;  %6336 = vmatpush2.bf16.msra.mxu0 %v8091_v56 }
  0x77   :  { %v309_v52 = vld [vmem:[#allocation5 + $0x640] sm:$0xff]  ;;  %v8084_v60 = vcombine.high %v181_v50, %v185_v51  ;;  %6376 = vmatprep.subr.bf16.mxu1 %v8220_v49  ;;  %v8083_v2 = vcombine.low %v181_v50, %v185_v51 }
  0x78   :  { %v313_v55 = vld [vmem:[#allocation5 + $0x660] sm:$0xff]  ;;  %6377 = vmatpush2.bf16.msra.mxu1 %v8219_v57 }
  0x79   :  { %v8212_v61 = vcombine.high %v309_v52, %v313_v55  ;;  %v173_v62 = vld [vmem:[#allocation5 + $0x200] sm:$0xff]  ;;  %6337 = vmatprep.subr.bf16.mxu0 %v8084_v60  ;;  %v8211_v3 = vcombine.low %v309_v52, %v313_v55 }
  0x7a   :  { %v177_v63 = vld [vmem:[#allocation5 + $0x220] sm:$0xff]  ;;  %6338 = vmatpush2.bf16.msra.mxu0 %v8083_v2 }
  0x7b   :  { %v301_v0 = vld [vmem:[#allocation5 + $0x600] sm:$0xff]  ;;  %v8076_v4 = vcombine.high %v173_v62, %v177_v63  ;;  %6378 = vmatprep.subr.bf16.mxu1 %v8212_v61  ;;  %v8075_v10 = vcombine.low %v173_v62, %v177_v63 }
  0x7c   :  { %v305_v1 = vld [vmem:[#allocation5 + $0x620] sm:$0xff]  ;;  %6379 = vmatpush2.bf16.msra.mxu1 %v8211_v3 }
  0x7d   :  { %v8204_v5 = vcombine.high %v301_v0, %v305_v1  ;;  %v421_v6 = vld [vmem:[#allocation5 + $0x9c0] sm:$0xff]  ;;  %6339 = vmatprep.subr.bf16.mxu0 %v8076_v4  ;;  %v8203_v11 = vcombine.low %v301_v0, %v305_v1 }
  0x7e   :  { %v425_v7 = vld [vmem:[#allocation5 + $0x9e0] sm:$0xff]  ;;  %6340 = vmatpush2.bf16.msra.mxu0 %v8075_v10 }
  0x7f   :  { %v549_v8 = vld [vmem:[#allocation5 + $0xdc0] sm:$0xff]  ;;  %v8324_v12 = vcombine.high %v421_v6, %v425_v7  ;;  %6380 = vmatprep.subr.bf16.mxu1 %v8204_v5  ;;  %v8323_v21 = vcombine.low %v421_v6, %v425_v7 }
  0x80   :  { %v553_v9 = vld [vmem:[#allocation5 + $0xde0] sm:$0xff]  ;;  %6381 = vmatpush2.bf16.msra.mxu1 %v8203_v11 }
  0x81   :  { %v8452_v13 = vcombine.high %v549_v8, %v553_v9  ;;  %v413_v14 = vld [vmem:[#allocation5 + $0x980] sm:$0xff]  ;;  %6391 = vmatprep.subr.bf16.mxu0 %v8324_v12  ;;  %v8451_v23 = vcombine.low %v549_v8, %v553_v9  ;;  %6342 = vmatmul.mubr.bf16.vlgmr.msra.gmra.mxu0 %v9281_v16 }
  0x82   :  { %v417_v15 = vld [vmem:[#allocation5 + $0x9a0] sm:$0xff]  ;;  %6392 = vmatpush1.bf16.msra.mxu0 %v8323_v21  ;;  %6423 = vmatprep.mubr.bf16.mxu0 %v9293_v27 }
  0x83   :  { %v541_v17 = vld [vmem:[#allocation5 + $0xd80] sm:$0xff]  ;;  %v8316_v24 = vcombine.high %v413_v14, %v417_v15  ;;  %6432 = vmatprep.subr.bf16.mxu1 %v8452_v13  ;;  %6383 = vmatmul.mubr.bf16.vlgmr.msra.gmra.mxu1 %v9287_v20  ;;  %v8315_v30 = vcombine.low %v413_v14, %v417_v15 }
  0x84   :  { %v545_v18 = vld [vmem:[#allocation5 + $0xda0] sm:$0xff]  ;;  %6433 = vmatpush1.bf16.msra.mxu1 %v8451_v23  ;;  %6464 = vmatprep.mubr.bf16.mxu1 %v9298_v29 }
  0x85   :  { %v8444_v25 = vcombine.high %v541_v17, %v545_v18  ;;  %v405_v53 = vld [vmem:[#allocation5 + $0x940] sm:$0xff]  ;;  %6393 = vmatprep.subr.bf16.mxu0 %v8316_v24  ;;  %v8443_v31 = vcombine.low %v541_v17, %v545_v18 }
  0x86   :  { %v409_v26 = vld [vmem:[#allocation5 + $0x960] sm:$0xff]  ;;  %6394 = vmatpush1.bf16.msra.mxu0 %v8315_v30 }
  0x87   :  { %v533_v28 = vld [vmem:[#allocation5 + $0xd40] sm:$0xff]  ;;  %v8308_v32 = vcombine.high %v405_v53, %v409_v26  ;;  %6434 = vmatprep.subr.bf16.mxu1 %v8444_v25  ;;  %v8307_v38 = vcombine.low %v405_v53, %v409_v26 }
  0x88   :  { %v537_v54 = vld [vmem:[#allocation5 + $0xd60] sm:$0xff]  ;;  %6435 = vmatpush1.bf16.msra.mxu1 %v8443_v31 }
  0x89   :  { %v8436_v33 = vcombine.high %v533_v28, %v537_v54  ;;  %v397_v34 = vld [vmem:[#allocation5 + $0x900] sm:$0xff]  ;;  %6395 = vmatprep.subr.bf16.mxu0 %v8308_v32  ;;  %v8435_v39 = vcombine.low %v533_v28, %v537_v54 }
  0x8a   :  { %v401_v35 = vld [vmem:[#allocation5 + $0x920] sm:$0xff]  ;;  %6396 = vmatpush1.bf16.msra.mxu0 %v8307_v38 }
  0x8b   :  { %v525_v36 = vld [vmem:[#allocation5 + $0xd00] sm:$0xff]  ;;  %v8300_v40 = vcombine.high %v397_v34, %v401_v35  ;;  %6436 = vmatprep.subr.bf16.mxu1 %v8436_v33  ;;  %v8299_v46 = vcombine.low %v397_v34, %v401_v35 }
  0x8c   :  { %v529_v37 = vld [vmem:[#allocation5 + $0xd20] sm:$0xff]  ;;  %6437 = vmatpush1.bf16.msra.mxu1 %v8435_v39 }
  0x8d   :  { %v8428_v41 = vcombine.high %v525_v36, %v529_v37  ;;  %v389_v42 = vld [vmem:[#allocation5 + $0x8c0] sm:$0xff]  ;;  %6397 = vmatprep.subr.bf16.mxu0 %v8300_v40  ;;  %v8427_v47 = vcombine.low %v525_v36, %v529_v37 }
  0x8e   :  { %v393_v43 = vld [vmem:[#allocation5 + $0x8e0] sm:$0xff]  ;;  %6398 = vmatpush1.bf16.msra.mxu0 %v8299_v46 }
  0x8f   :  { %v517_v44 = vld [vmem:[#allocation5 + $0xcc0] sm:$0xff]  ;;  %v8292_v48 = vcombine.high %v389_v42, %v393_v43  ;;  %6438 = vmatprep.subr.bf16.mxu1 %v8428_v41  ;;  %v8291_v56 = vcombine.low %v389_v42, %v393_v43 }
  0x90   :  { %v521_v45 = vld [vmem:[#allocation5 + $0xce0] sm:$0xff]  ;;  %6439 = vmatpush1.bf16.msra.mxu1 %v8427_v47 }
  0x91   :  { %v8420_v49 = vcombine.high %v517_v44, %v521_v45  ;;  %v381_v50 = vld [vmem:[#allocation5 + $0x880] sm:$0xff]  ;;  %6399 = vmatprep.subr.bf16.mxu0 %v8292_v48  ;;  %v8419_v57 = vcombine.low %v517_v44, %v521_v45 }
  0x92   :  { %v385_v51 = vld [vmem:[#allocation5 + $0x8a0] sm:$0xff]  ;;  %6400 = vmatpush1.bf16.msra.mxu0 %v8291_v56 }
  0x93   :  { %v509_v52 = vld [vmem:[#allocation5 + $0xc80] sm:$0xff]  ;;  %v8284_v60 = vcombine.high %v381_v50, %v385_v51  ;;  %6440 = vmatprep.subr.bf16.mxu1 %v8420_v49  ;;  %v8283_v2 = vcombine.low %v381_v50, %v385_v51 }
  0x94   :  { %v513_v55 = vld [vmem:[#allocation5 + $0xca0] sm:$0xff]  ;;  %6441 = vmatpush1.bf16.msra.mxu1 %v8419_v57 }
  0x95   :  { %v8412_v61 = vcombine.high %v509_v52, %v513_v55  ;;  %v373_v62 = vld [vmem:[#allocation5 + $0x840] sm:$0xff]  ;;  %6401 = vmatprep.subr.bf16.mxu0 %v8284_v60  ;;  %v8411_v3 = vcombine.low %v509_v52, %v513_v55 }
  0x96   :  { %v377_v63 = vld [vmem:[#allocation5 + $0x860] sm:$0xff]  ;;  %6402 = vmatpush1.bf16.msra.mxu0 %v8283_v2 }
  0x97   :  { %v501_v0 = vld [vmem:[#allocation5 + $0xc40] sm:$0xff]  ;;  %v8276_v4 = vcombine.high %v373_v62, %v377_v63  ;;  %6442 = vmatprep.subr.bf16.mxu1 %v8412_v61  ;;  %v8275_v10 = vcombine.low %v373_v62, %v377_v63 }
  0x98   :  { %v505_v1 = vld [vmem:[#allocation5 + $0xc60] sm:$0xff]  ;;  %6443 = vmatpush1.bf16.msra.mxu1 %v8411_v3 }
  0x99   :  { %v8404_v5 = vcombine.high %v501_v0, %v505_v1  ;;  %v365_v6 = vld [vmem:[#allocation5 + $0x800] sm:$0xff]  ;;  %6403 = vmatprep.subr.bf16.mxu0 %v8276_v4  ;;  %v8403_v11 = vcombine.low %v501_v0, %v505_v1 }
  0x9a   :  { %v369_v7 = vld [vmem:[#allocation5 + $0x820] sm:$0xff]  ;;  %6404 = vmatpush1.bf16.msra.mxu0 %v8275_v10 }
  0x9b   :  { %v493_v8 = vld [vmem:[#allocation5 + $0xc00] sm:$0xff]  ;;  %v8268_v12 = vcombine.high %v365_v6, %v369_v7  ;;  %6444 = vmatprep.subr.bf16.mxu1 %v8404_v5  ;;  %v8267_v21 = vcombine.low %v365_v6, %v369_v7 }
  0x9c   :  { %v497_v9 = vld [vmem:[#allocation5 + $0xc20] sm:$0xff]  ;;  %6445 = vmatpush1.bf16.msra.mxu1 %v8403_v11 }
  0x9d   :  { %v8396_v13 = vcombine.high %v493_v8, %v497_v9  ;;  %v485_v14 = vld [vmem:[#allocation5 + $0xbc0] sm:$0xff]  ;;  %6405 = vmatprep.subr.bf16.mxu0 %v8268_v12  ;;  %v8395_v23 = vcombine.low %v493_v8, %v497_v9 }
  0x9e   :  { %v489_v15 = vld [vmem:[#allocation5 + $0xbe0] sm:$0xff]  ;;  %6406 = vmatpush1.bf16.msra.mxu0 %v8267_v21 }
  0x9f   :  { %v613_v17 = vld [vmem:[#allocation5 + $0xfc0] sm:$0xff]  ;;  %v8388_v24 = vcombine.high %v485_v14, %v489_v15  ;;  %6446 = vmatprep.subr.bf16.mxu1 %v8396_v13  ;;  %v8387_v30 = vcombine.low %v485_v14, %v489_v15 }
  0xa0   :  { %v617_v18 = vld [vmem:[#allocation5 + $0xfe0] sm:$0xff]  ;;  %6447 = vmatpush1.bf16.msra.mxu1 %v8395_v23 }
  0xa1   :  { %v8516_v25 = vcombine.high %v613_v17, %v617_v18  ;;  %v477_v53 = vld [vmem:[#allocation5 + $0xb80] sm:$0xff]  ;;  %6407 = vmatprep.subr.bf16.mxu0 %v8388_v24  ;;  %v8515_v31 = vcombine.low %v613_v17, %v617_v18 }
  0xa2   :  { %v481_v26 = vld [vmem:[#allocation5 + $0xba0] sm:$0xff]  ;;  %6408 = vmatpush2.bf16.msra.mxu0 %v8387_v30 }
  0xa3   :  { %v605_v28 = vld [vmem:[#allocation5 + $0xf80] sm:$0xff]  ;;  %v8380_v32 = vcombine.high %v477_v53, %v481_v26  ;;  %6448 = vmatprep.subr.bf16.mxu1 %v8516_v25  ;;  %v8379_v38 = vcombine.low %v477_v53, %v481_v26 }
  0xa4   :  { %v609_v54 = vld [vmem:[#allocation5 + $0xfa0] sm:$0xff]  ;;  %6449 = vmatpush2.bf16.msra.mxu1 %v8515_v31 }
  0xa5   :  { %v8508_v33 = vcombine.high %v605_v28, %v609_v54  ;;  %v469_v34 = vld [vmem:[#allocation5 + $0xb40] sm:$0xff]  ;;  %6409 = vmatprep.subr.bf16.mxu0 %v8380_v32  ;;  %v8507_v39 = vcombine.low %v605_v28, %v609_v54 }
  0xa6   :  { %v473_v35 = vld [vmem:[#allocation5 + $0xb60] sm:$0xff]  ;;  %6410 = vmatpush2.bf16.msra.mxu0 %v8379_v38 }
  0xa7   :  { %v597_v36 = vld [vmem:[#allocation5 + $0xf40] sm:$0xff]  ;;  %v8372_v40 = vcombine.high %v469_v34, %v473_v35  ;;  %6450 = vmatprep.subr.bf16.mxu1 %v8508_v33  ;;  %v8371_v46 = vcombine.low %v469_v34, %v473_v35 }
  0xa8   :  { %v601_v37 = vld [vmem:[#allocation5 + $0xf60] sm:$0xff]  ;;  %6451 = vmatpush2.bf16.msra.mxu1 %v8507_v39 }
  0xa9   :  { %v8500_v41 = vcombine.high %v597_v36, %v601_v37  ;;  %v461_v42 = vld [vmem:[#allocation5 + $0xb00] sm:$0xff]  ;;  %6411 = vmatprep.subr.bf16.mxu0 %v8372_v40  ;;  %v8499_v47 = vcombine.low %v597_v36, %v601_v37  ;;  %v9305_v36 = vcombine.low %v9283_v19, %v9283_v19  ;;  %v9311_v40 = vcombine.low %v9289_v22, %v9289_v22 }
  0xaa   :  { %v465_v43 = vld [vmem:[#allocation5 + $0xb20] sm:$0xff]  ;;  %6412 = vmatpush2.bf16.msra.mxu0 %v8371_v46 }
  0xab   :  { %v589_v44 = vld [vmem:[#allocation5 + $0xf00] sm:$0xff]  ;;  %v8364_v48 = vcombine.high %v461_v42, %v465_v43  ;;  %6452 = vmatprep.subr.bf16.mxu1 %v8500_v41  ;;  %v8363_v56 = vcombine.low %v461_v42, %v465_v43  ;;  %v9313_v42 = vld [vmem:[#allocation3 + $0x28] sm:$0xff] }
  0xac   :  { %v593_v45 = vld [vmem:[#allocation5 + $0xf20] sm:$0xff]  ;;  %6453 = vmatpush2.bf16.msra.mxu1 %v8499_v47 }
  0xad   :  { %v8492_v49 = vcombine.high %v589_v44, %v593_v45  ;;  %v453_v50 = vld [vmem:[#allocation5 + $0xac0] sm:$0xff]  ;;  %6413 = vmatprep.subr.bf16.mxu0 %v8364_v48  ;;  %v8491_v57 = vcombine.low %v589_v44, %v593_v45 }
  0xae   :  { %v457_v51 = vld [vmem:[#allocation5 + $0xae0] sm:$0xff]  ;;  %6414 = vmatpush2.bf16.msra.mxu0 %v8363_v56 }
  0xaf   :  { %v581_v52 = vld [vmem:[#allocation5 + $0xec0] sm:$0xff]  ;;  %v8356_v60 = vcombine.high %v453_v50, %v457_v51  ;;  %6454 = vmatprep.subr.bf16.mxu1 %v8492_v49  ;;  %v8355_v2 = vcombine.low %v453_v50, %v457_v51  ;;  %v9322_v49 = vcombine.high %v9313_v42, %v9313_v42 }
  0xb0   :  { %v585_v55 = vld [vmem:[#allocation5 + $0xee0] sm:$0xff]  ;;  %6455 = vmatpush2.bf16.msra.mxu1 %v8491_v57 }
  0xb1   :  { %v8484_v61 = vcombine.high %v581_v52, %v585_v55  ;;  %v445_v62 = vld [vmem:[#allocation5 + $0xa80] sm:$0xff]  ;;  %6415 = vmatprep.subr.bf16.mxu0 %v8356_v60  ;;  %v8483_v3 = vcombine.low %v581_v52, %v585_v55 }
  0xb2   :  { %v449_v63 = vld [vmem:[#allocation5 + $0xaa0] sm:$0xff]  ;;  %6416 = vmatpush2.bf16.msra.mxu0 %v8355_v2 }
  0xb3   :  { %v573_v0 = vld [vmem:[#allocation5 + $0xe80] sm:$0xff]  ;;  %v8348_v4 = vcombine.high %v445_v62, %v449_v63  ;;  %6456 = vmatprep.subr.bf16.mxu1 %v8484_v61  ;;  %v8347_v10 = vcombine.low %v445_v62, %v449_v63 }
  0xb4   :  { %v577_v1 = vld [vmem:[#allocation5 + $0xea0] sm:$0xff]  ;;  %6457 = vmatpush2.bf16.msra.mxu1 %v8483_v3 }
  0xb5   :  { %v8476_v5 = vcombine.high %v573_v0, %v577_v1  ;;  %v437_v6 = vld [vmem:[#allocation5 + $0xa40] sm:$0xff]  ;;  %6417 = vmatprep.subr.bf16.mxu0 %v8348_v4  ;;  %v8475_v11 = vcombine.low %v573_v0, %v577_v1 }
  0xb6   :  { %v441_v7 = vld [vmem:[#allocation5 + $0xa60] sm:$0xff]  ;;  %6418 = vmatpush2.bf16.msra.mxu0 %v8347_v10 }
  0xb7   :  { %v565_v8 = vld [vmem:[#allocation5 + $0xe40] sm:$0xff]  ;;  %v8340_v12 = vcombine.high %v437_v6, %v441_v7  ;;  %6458 = vmatprep.subr.bf16.mxu1 %v8476_v5  ;;  %v8339_v21 = vcombine.low %v437_v6, %v441_v7 }
  0xb8   :  { %v569_v9 = vld [vmem:[#allocation5 + $0xe60] sm:$0xff]  ;;  %6459 = vmatpush2.bf16.msra.mxu1 %v8475_v11 }
  0xb9   :  { %v8468_v13 = vcombine.high %v565_v8, %v569_v9  ;;  %v429_v14 = vld [vmem:[#allocation5 + $0xa00] sm:$0xff]  ;;  %6419 = vmatprep.subr.bf16.mxu0 %v8340_v12  ;;  %v8467_v23 = vcombine.low %v565_v8, %v569_v9 }
  0xba   :  { %v433_v15 = vld [vmem:[#allocation5 + $0xa20] sm:$0xff]  ;;  %6420 = vmatpush2.bf16.msra.mxu0 %v8339_v21 }
  0xbb   :  { %v557_v17 = vld [vmem:[#allocation5 + $0xe00] sm:$0xff]  ;;  %v8332_v24 = vcombine.high %v429_v14, %v433_v15  ;;  %6460 = vmatprep.subr.bf16.mxu1 %v8468_v13  ;;  %v8331_v30 = vcombine.low %v429_v14, %v433_v15 }
  0xbc   :  { %v561_v18 = vld [vmem:[#allocation5 + $0xe20] sm:$0xff]  ;;  %6461 = vmatpush2.bf16.msra.mxu1 %v8467_v23 }
  0xbd   :  { %v8460_v25 = vcombine.high %v557_v17, %v561_v18  ;;  %v677_v53 = vld [vmem:[#allocation5 + $0x11c0] sm:$0xff]  ;;  %6421 = vmatprep.subr.bf16.mxu0 %v8332_v24  ;;  %v8459_v31 = vcombine.low %v557_v17, %v561_v18 }
  0xbe   :  { %v681_v26 = vld [vmem:[#allocation5 + $0x11e0] sm:$0xff]  ;;  %6422 = vmatpush2.bf16.msra.mxu0 %v8331_v30 }
  0xbf   :  { %v805_v28 = vld [vmem:[#allocation5 + $0x15c0] sm:$0xff]  ;;  %v8580_v32 = vcombine.high %v677_v53, %v681_v26  ;;  %6462 = vmatprep.subr.bf16.mxu1 %v8460_v25  ;;  %v8579_v41 = vcombine.low %v677_v53, %v681_v26 }
  0xc0   :  { %v809_v54 = vld [vmem:[#allocation5 + $0x15e0] sm:$0xff]  ;;  %6463 = vmatpush2.bf16.msra.mxu1 %v8459_v31 }
  0xc1   :  { %v8708_v33 = vcombine.high %v805_v28, %v809_v54  ;;  %v669_v34 = vld [vmem:[#allocation5 + $0x1180] sm:$0xff]  ;;  %6473 = vmatprep.subr.bf16.mxu0 %v8580_v32  ;;  %v8707_v43 = vcombine.low %v805_v28, %v809_v54  ;;  %6424 = vmatmul.mubr.bf16.vlgmr.msra.gmra.mxu0 %v9305_v36 }
  0xc2   :  { %v673_v35 = vld [vmem:[#allocation5 + $0x11a0] sm:$0xff]  ;;  %6474 = vmatpush1.bf16.msra.mxu0 %v8579_v41 }
  0xc3   :  { %v797_v37 = vld [vmem:[#allocation5 + $0x1580] sm:$0xff]  ;;  %v8572_v44 = vcombine.high %v669_v34, %v673_v35  ;;  %6514 = vmatprep.subr.bf16.mxu1 %v8708_v33  ;;  %6465 = vmatmul.mubr.bf16.vlgmr.msra.gmra.mxu1 %v9311_v40  ;;  %v8571_v50 = vcombine.low %v669_v34, %v673_v35 }
  0xc4   :  { %v801_v38 = vld [vmem:[#allocation5 + $0x15a0] sm:$0xff]  ;;  %6515 = vmatpush1.bf16.msra.mxu1 %v8707_v43  ;;  %6546 = vmatprep.mubr.bf16.mxu1 %v9322_v49 }
  0xc5   :  { %v9307_v39 = vld [vmem:[#allocation3 + $0x20] sm:$0xff]  ;;  %v8700_v45 = vcombine.high %v797_v37, %v801_v38  ;;  %6475 = vmatprep.subr.bf16.mxu0 %v8572_v44  ;;  %v8699_v51 = vcombine.low %v797_v37, %v801_v38 }
  0xc6   :  { %v661_v19 = vld [vmem:[#allocation5 + $0x1140] sm:$0xff]  ;;  %v9317_v47 = vcombine.high %v9307_v39, %v9307_v39  ;;  %6476 = vmatpush1.bf16.msra.mxu0 %v8571_v50 }
  0xc7   :  { %v665_v46 = vld [vmem:[#allocation5 + $0x1160] sm:$0xff]  ;;  %6516 = vmatprep.subr.bf16.mxu1 %v8700_v45 }
  0xc8   :  { %v789_v48 = vld [vmem:[#allocation5 + $0x1540] sm:$0xff]  ;;  %v8564_v52 = vcombine.high %v661_v19, %v665_v46  ;;  %6505 = vmatprep.mubr.bf16.mxu0 %v9317_v47  ;;  %v8563_v62 = vcombine.low %v661_v19, %v665_v46  ;;  %6517 = vmatpush1.bf16.msra.mxu1 %v8699_v51 }
  0xc9   :  { %v793_v22 = vld [vmem:[#allocation5 + $0x1560] sm:$0xff] }
  0xca   :  { %v8692_v55 = vcombine.high %v789_v48, %v793_v22  ;;  %v653_v56 = vld [vmem:[#allocation5 + $0x1100] sm:$0xff]  ;;  %6477 = vmatprep.subr.bf16.mxu0 %v8564_v52  ;;  %v8691_v63 = vcombine.low %v789_v48, %v793_v22 }
  0xcb   :  { %v657_v57 = vld [vmem:[#allocation5 + $0x1120] sm:$0xff]  ;;  %6478 = vmatpush1.bf16.msra.mxu0 %v8563_v62 }
  0xcc   :  { %v781_v60 = vld [vmem:[#allocation5 + $0x1500] sm:$0xff]  ;;  %v8556_v0 = vcombine.high %v653_v56, %v657_v57  ;;  %6518 = vmatprep.subr.bf16.mxu1 %v8692_v55  ;;  %v8555_v6 = vcombine.low %v653_v56, %v657_v57 }
  0xcd   :  { %v785_v61 = vld [vmem:[#allocation5 + $0x1520] sm:$0xff]  ;;  %6519 = vmatpush1.bf16.msra.mxu1 %v8691_v63 }
  0xce   :  { %v8684_v1 = vcombine.high %v781_v60, %v785_v61  ;;  %v645_v2 = vld [vmem:[#allocation5 + $0x10c0] sm:$0xff]  ;;  %6479 = vmatprep.subr.bf16.mxu0 %v8556_v0  ;;  %v8683_v7 = vcombine.low %v781_v60, %v785_v61 }
  0xcf   :  { %v649_v3 = vld [vmem:[#allocation5 + $0x10e0] sm:$0xff]  ;;  %6480 = vmatpush1.bf16.msra.mxu0 %v8555_v6 }
  0xd0   :  { %v773_v4 = vld [vmem:[#allocation5 + $0x14c0] sm:$0xff]  ;;  %v8548_v8 = vcombine.high %v645_v2, %v649_v3  ;;  %6520 = vmatprep.subr.bf16.mxu1 %v8684_v1  ;;  %v8547_v14 = vcombine.low %v645_v2, %v649_v3 }
  0xd1   :  { %v777_v5 = vld [vmem:[#allocation5 + $0x14e0] sm:$0xff]  ;;  %6521 = vmatpush1.bf16.msra.mxu1 %v8683_v7 }
  0xd2   :  { %v8676_v9 = vcombine.high %v773_v4, %v777_v5  ;;  %v637_v10 = vld [vmem:[#allocation5 + $0x1080] sm:$0xff]  ;;  %6481 = vmatprep.subr.bf16.mxu0 %v8548_v8  ;;  %v8675_v15 = vcombine.low %v773_v4, %v777_v5 }
  0xd3   :  { %v641_v11 = vld [vmem:[#allocation5 + $0x10a0] sm:$0xff]  ;;  %6482 = vmatpush1.bf16.msra.mxu0 %v8547_v14 }
  0xd4   :  { %v765_v12 = vld [vmem:[#allocation5 + $0x1480] sm:$0xff]  ;;  %v8540_v17 = vcombine.high %v637_v10, %v641_v11  ;;  %6522 = vmatprep.subr.bf16.mxu1 %v8676_v9  ;;  %v8539_v53 = vcombine.low %v637_v10, %v641_v11 }
  0xd5   :  { %v769_v13 = vld [vmem:[#allocation5 + $0x14a0] sm:$0xff]  ;;  %6523 = vmatpush1.bf16.msra.mxu1 %v8675_v15 }
  0xd6   :  { %v8668_v18 = vcombine.high %v765_v12, %v769_v13  ;;  %v629_v21 = vld [vmem:[#allocation5 + $0x1040] sm:$0xff]  ;;  %6483 = vmatprep.subr.bf16.mxu0 %v8540_v17  ;;  %v8667_v26 = vcombine.low %v765_v12, %v769_v13 }
  0xd7   :  { %v633_v23 = vld [vmem:[#allocation5 + $0x1060] sm:$0xff]  ;;  %6484 = vmatpush1.bf16.msra.mxu0 %v8539_v53 }
  0xd8   :  { %v757_v24 = vld [vmem:[#allocation5 + $0x1440] sm:$0xff]  ;;  %v8532_v28 = vcombine.high %v629_v21, %v633_v23  ;;  %6524 = vmatprep.subr.bf16.mxu1 %v8668_v18  ;;  %v8531_v34 = vcombine.low %v629_v21, %v633_v23 }
  0xd9   :  { %v761_v25 = vld [vmem:[#allocation5 + $0x1460] sm:$0xff]  ;;  %6525 = vmatpush1.bf16.msra.mxu1 %v8667_v26 }
  0xda   :  { %v8660_v54 = vcombine.high %v757_v24, %v761_v25  ;;  %v621_v30 = vld [vmem:[#allocation5 + $0x1000] sm:$0xff]  ;;  %6485 = vmatprep.subr.bf16.mxu0 %v8532_v28  ;;  %v8659_v35 = vcombine.low %v757_v24, %v761_v25 }
  0xdb   :  { %v625_v31 = vld [vmem:[#allocation5 + $0x1020] sm:$0xff]  ;;  %6486 = vmatpush1.bf16.msra.mxu0 %v8531_v34 }
  0xdc   :  { %v749_v32 = vld [vmem:[#allocation5 + $0x1400] sm:$0xff]  ;;  %v8524_v37 = vcombine.high %v621_v30, %v625_v31  ;;  %6526 = vmatprep.subr.bf16.mxu1 %v8660_v54  ;;  %v8523_v19 = vcombine.low %v621_v30, %v625_v31 }
  0xdd   :  { %v753_v33 = vld [vmem:[#allocation5 + $0x1420] sm:$0xff]  ;;  %6527 = vmatpush1.bf16.msra.mxu1 %v8659_v35 }
  0xde   :  { %v8652_v38 = vcombine.high %v749_v32, %v753_v33  ;;  %v741_v41 = vld [vmem:[#allocation5 + $0x13c0] sm:$0xff]  ;;  %6487 = vmatprep.subr.bf16.mxu0 %v8524_v37  ;;  %v8651_v46 = vcombine.low %v749_v32, %v753_v33 }
  0xdf   :  { %v745_v43 = vld [vmem:[#allocation5 + $0x13e0] sm:$0xff]  ;;  %6488 = vmatpush1.bf16.msra.mxu0 %v8523_v19 }
  0xe0   :  { %v869_v44 = vld [vmem:[#allocation5 + $0x17c0] sm:$0xff]  ;;  %v8644_v48 = vcombine.high %v741_v41, %v745_v43  ;;  %6528 = vmatprep.subr.bf16.mxu1 %v8652_v38  ;;  %v8643_v56 = vcombine.low %v741_v41, %v745_v43 }
  0xe1   :  { %v873_v45 = vld [vmem:[#allocation5 + $0x17e0] sm:$0xff]  ;;  %6529 = vmatpush1.bf16.msra.mxu1 %v8651_v46 }
  0xe2   :  { %v8772_v22 = vcombine.high %v869_v44, %v873_v45  ;;  %v733_v50 = vld [vmem:[#allocation5 + $0x1380] sm:$0xff]  ;;  %6489 = vmatprep.subr.bf16.mxu0 %v8644_v48  ;;  %v8771_v57 = vcombine.low %v869_v44, %v873_v45 }
  0xe3   :  { %v737_v51 = vld [vmem:[#allocation5 + $0x13a0] sm:$0xff]  ;;  %6490 = vmatpush2.bf16.msra.mxu0 %v8643_v56 }
  0xe4   :  { %v861_v52 = vld [vmem:[#allocation5 + $0x1780] sm:$0xff]  ;;  %v8636_v60 = vcombine.high %v733_v50, %v737_v51  ;;  %6530 = vmatprep.subr.bf16.mxu1 %v8772_v22  ;;  %v8635_v2 = vcombine.low %v733_v50, %v737_v51 }
  0xe5   :  { %v865_v55 = vld [vmem:[#allocation5 + $0x17a0] sm:$0xff]  ;;  %6531 = vmatpush2.bf16.msra.mxu1 %v8771_v57 }
  0xe6   :  { %v8764_v61 = vcombine.high %v861_v52, %v865_v55  ;;  %v725_v62 = vld [vmem:[#allocation5 + $0x1340] sm:$0xff]  ;;  %6491 = vmatprep.subr.bf16.mxu0 %v8636_v60  ;;  %v8763_v3 = vcombine.low %v861_v52, %v865_v55 }
  0xe7   :  { %v729_v63 = vld [vmem:[#allocation5 + $0x1360] sm:$0xff]  ;;  %6492 = vmatpush2.bf16.msra.mxu0 %v8635_v2 }
  0xe8   :  { %v853_v0 = vld [vmem:[#allocation5 + $0x1740] sm:$0xff]  ;;  %v8628_v4 = vcombine.high %v725_v62, %v729_v63  ;;  %6532 = vmatprep.subr.bf16.mxu1 %v8764_v61  ;;  %v8627_v10 = vcombine.low %v725_v62, %v729_v63 }
  0xe9   :  { %v857_v1 = vld [vmem:[#allocation5 + $0x1760] sm:$0xff]  ;;  %6533 = vmatpush2.bf16.msra.mxu1 %v8763_v3 }
  0xea   :  { %v8756_v5 = vcombine.high %v853_v0, %v857_v1  ;;  %v717_v6 = vld [vmem:[#allocation5 + $0x1300] sm:$0xff]  ;;  %6493 = vmatprep.subr.bf16.mxu0 %v8628_v4  ;;  %v8755_v11 = vcombine.low %v853_v0, %v857_v1  ;;  %v9329_v4 = vcombine.low %v9307_v39, %v9307_v39 }
  0xeb   :  { %v721_v7 = vld [vmem:[#allocation5 + $0x1320] sm:$0xff]  ;;  %6494 = vmatpush2.bf16.msra.mxu0 %v8627_v10  ;;  %v9337_v10 = vld [vmem:[#allocation3 + $0x38] sm:$0xff] }
  0xec   :  { %v845_v8 = vld [vmem:[#allocation5 + $0x1700] sm:$0xff]  ;;  %v8620_v12 = vcombine.high %v717_v6, %v721_v7  ;;  %6534 = vmatprep.subr.bf16.mxu1 %v8756_v5  ;;  %v8619_v21 = vcombine.low %v717_v6, %v721_v7  ;;  %v9331_v7 = vld [vmem:[#allocation3 + $0x30] sm:$0xff] }
  0xed   :  { %v849_v9 = vld [vmem:[#allocation5 + $0x1720] sm:$0xff]  ;;  %6535 = vmatpush2.bf16.msra.mxu1 %v8755_v11 }
  0xee   :  { %v8748_v13 = vcombine.high %v845_v8, %v849_v9  ;;  %v709_v14 = vld [vmem:[#allocation5 + $0x12c0] sm:$0xff]  ;;  %6495 = vmatprep.subr.bf16.mxu0 %v8620_v12  ;;  %v8747_v23 = vcombine.low %v845_v8, %v849_v9  ;;  %v9335_v8 = vcombine.low %v9313_v42, %v9313_v42 }
  0xef   :  { %v713_v15 = vld [vmem:[#allocation5 + $0x12e0] sm:$0xff]  ;;  %6496 = vmatpush2.bf16.msra.mxu0 %v8619_v21 }
  0xf0   :  { %v837_v17 = vld [vmem:[#allocation5 + $0x16c0] sm:$0xff]  ;;  %v8612_v24 = vcombine.high %v709_v14, %v713_v15  ;;  %6536 = vmatprep.subr.bf16.mxu1 %v8748_v13  ;;  %v8611_v30 = vcombine.low %v709_v14, %v713_v15  ;;  %v9341_v15 = vcombine.high %v9331_v7, %v9331_v7 }
  0xf1   :  { %v841_v18 = vld [vmem:[#allocation5 + $0x16e0] sm:$0xff]  ;;  %6537 = vmatpush2.bf16.msra.mxu1 %v8747_v23 }
  0xf2   :  { %v8740_v25 = vcombine.high %v837_v17, %v841_v18  ;;  %v701_v53 = vld [vmem:[#allocation5 + $0x1280] sm:$0xff]  ;;  %6497 = vmatprep.subr.bf16.mxu0 %v8612_v24  ;;  %v8739_v31 = vcombine.low %v837_v17, %v841_v18  ;;  %v9346_v18 = vcombine.high %v9337_v10, %v9337_v10 }
  0xf3   :  { %v705_v26 = vld [vmem:[#allocation5 + $0x12a0] sm:$0xff]  ;;  %6498 = vmatpush2.bf16.msra.mxu0 %v8611_v30 }
  0xf4   :  { %v829_v28 = vld [vmem:[#allocation5 + $0x1680] sm:$0xff]  ;;  %v8604_v32 = vcombine.high %v701_v53, %v705_v26  ;;  %6538 = vmatprep.subr.bf16.mxu1 %v8740_v25  ;;  %v8603_v41 = vcombine.low %v701_v53, %v705_v26 }
  0xf5   :  { %v833_v54 = vld [vmem:[#allocation5 + $0x16a0] sm:$0xff]  ;;  %6539 = vmatpush2.bf16.msra.mxu1 %v8739_v31 }
  0xf6   :  { %v8732_v33 = vcombine.high %v829_v28, %v833_v54  ;;  %v693_v34 = vld [vmem:[#allocation5 + $0x1240] sm:$0xff]  ;;  %6499 = vmatprep.subr.bf16.mxu0 %v8604_v32  ;;  %v8731_v43 = vcombine.low %v829_v28, %v833_v54 }
  0xf7   :  { %v697_v35 = vld [vmem:[#allocation5 + $0x1260] sm:$0xff]  ;;  %6500 = vmatpush2.bf16.msra.mxu0 %v8603_v41 }
  0xf8   :  { %v821_v37 = vld [vmem:[#allocation5 + $0x1640] sm:$0xff]  ;;  %v8596_v44 = vcombine.high %v693_v34, %v697_v35  ;;  %6540 = vmatprep.subr.bf16.mxu1 %v8732_v33  ;;  %v8595_v50 = vcombine.low %v693_v34, %v697_v35 }
  0xf9   :  { %v825_v38 = vld [vmem:[#allocation5 + $0x1660] sm:$0xff]  ;;  %6541 = vmatpush2.bf16.msra.mxu1 %v8731_v43 }
  0xfa   :  { %v8724_v45 = vcombine.high %v821_v37, %v825_v38  ;;  %v685_v19 = vld [vmem:[#allocation5 + $0x1200] sm:$0xff]  ;;  %6501 = vmatprep.subr.bf16.mxu0 %v8596_v44  ;;  %v8723_v51 = vcombine.low %v821_v37, %v825_v38 }
  0xfb   :  { %v689_v46 = vld [vmem:[#allocation5 + $0x1220] sm:$0xff]  ;;  %6502 = vmatpush2.bf16.msra.mxu0 %v8595_v50 }
  0xfc   :  { %v813_v48 = vld [vmem:[#allocation5 + $0x1600] sm:$0xff]  ;;  %v8588_v52 = vcombine.high %v685_v19, %v689_v46  ;;  %6542 = vmatprep.subr.bf16.mxu1 %v8724_v45  ;;  %v8587_v62 = vcombine.low %v685_v19, %v689_v46 }
  0xfd   :  { %v817_v22 = vld [vmem:[#allocation5 + $0x1620] sm:$0xff]  ;;  %6543 = vmatpush2.bf16.msra.mxu1 %v8723_v51 }
  0xfe   :  { %v8716_v55 = vcombine.high %v813_v48, %v817_v22  ;;  %v933_v56 = vld [vmem:[#allocation5 + $0x19c0] sm:$0xff]  ;;  %6503 = vmatprep.subr.bf16.mxu0 %v8588_v52  ;;  %v8715_v63 = vcombine.low %v813_v48, %v817_v22 }
  0xff   :  { %v937_v57 = vld [vmem:[#allocation5 + $0x19e0] sm:$0xff]  ;;  %6504 = vmatpush2.bf16.msra.mxu0 %v8587_v62 }
 0x100   :  { %v1061_v60 = vld [vmem:[#allocation5 + $0x1dc0] sm:$0xff]  ;;  %v8836_v0 = vcombine.high %v933_v56, %v937_v57  ;;  %6544 = vmatprep.subr.bf16.mxu1 %v8716_v55  ;;  %v8835_v9 = vcombine.low %v933_v56, %v937_v57 }
 0x101   :  { %v1065_v61 = vld [vmem:[#allocation5 + $0x1de0] sm:$0xff]  ;;  %6545 = vmatpush2.bf16.msra.mxu1 %v8715_v63 }
 0x102   :  { %v8964_v1 = vcombine.high %v1061_v60, %v1065_v61  ;;  %v925_v2 = vld [vmem:[#allocation5 + $0x1980] sm:$0xff]  ;;  %6555 = vmatprep.subr.bf16.mxu0 %v8836_v0  ;;  %v8963_v11 = vcombine.low %v1061_v60, %v1065_v61  ;;  %6506 = vmatmul.mubr.bf16.vlgmr.msra.gmra.mxu0 %v9329_v4 }
 0x103   :  { %v929_v3 = vld [vmem:[#allocation5 + $0x19a0] sm:$0xff]  ;;  %6556 = vmatpush1.bf16.msra.mxu0 %v8835_v9  ;;  %6587 = vmatprep.mubr.bf16.mxu0 %v9341_v15 }
 0x104   :  { %v1053_v5 = vld [vmem:[#allocation5 + $0x1d80] sm:$0xff]  ;;  %v8828_v12 = vcombine.high %v925_v2, %v929_v3  ;;  %6596 = vmatprep.subr.bf16.mxu1 %v8964_v1  ;;  %6547 = vmatmul.mubr.bf16.vlgmr.msra.gmra.mxu1 %v9335_v8  ;;  %v8827_v21 = vcombine.low %v925_v2, %v929_v3 }
 0x105   :  { %v1057_v6 = vld [vmem:[#allocation5 + $0x1da0] sm:$0xff]  ;;  %6597 = vmatpush1.bf16.msra.mxu1 %v8963_v11  ;;  %6628 = vmatprep.mubr.bf16.mxu1 %v9346_v18 }
 0x106   :  { %v8956_v13 = vcombine.high %v1053_v5, %v1057_v6  ;;  %v917_v39 = vld [vmem:[#allocation5 + $0x1940] sm:$0xff]  ;;  %6557 = vmatprep.subr.bf16.mxu0 %v8828_v12  ;;  %v8955_v23 = vcombine.low %v1053_v5, %v1057_v6 }
 0x107   :  { %v921_v14 = vld [vmem:[#allocation5 + $0x1960] sm:$0xff]  ;;  %6558 = vmatpush1.bf16.msra.mxu0 %v8827_v21 }
 0x108   :  { %v1045_v17 = vld [vmem:[#allocation5 + $0x1d40] sm:$0xff]  ;;  %v8820_v24 = vcombine.high %v917_v39, %v921_v14  ;;  %6598 = vmatprep.subr.bf16.mxu1 %v8956_v13  ;;  %v8819_v30 = vcombine.low %v917_v39, %v921_v14 }
 0x109   :  { %v1049_v42 = vld [vmem:[#allocation5 + $0x1d60] sm:$0xff]  ;;  %6599 = vmatpush1.bf16.msra.mxu1 %v8955_v23 }
 0x10a   :  { %v8948_v25 = vcombine.high %v1045_v17, %v1049_v42  ;;  %v909_v53 = vld [vmem:[#allocation5 + $0x1900] sm:$0xff]  ;;  %6559 = vmatprep.subr.bf16.mxu0 %v8820_v24  ;;  %v8947_v31 = vcombine.low %v1045_v17, %v1049_v42 }
 0x10b   :  { %v913_v26 = vld [vmem:[#allocation5 + $0x1920] sm:$0xff]  ;;  %6560 = vmatpush1.bf16.msra.mxu0 %v8819_v30 }
 0x10c   :  { %v1037_v28 = vld [vmem:[#allocation5 + $0x1d00] sm:$0xff]  ;;  %v8812_v32 = vcombine.high %v909_v53, %v913_v26  ;;  %6600 = vmatprep.subr.bf16.mxu1 %v8948_v25  ;;  %v8811_v41 = vcombine.low %v909_v53, %v913_v26 }
 0x10d   :  { %v1041_v54 = vld [vmem:[#allocation5 + $0x1d20] sm:$0xff]  ;;  %6601 = vmatpush1.bf16.msra.mxu1 %v8947_v31 }
 0x10e   :  { %v8940_v33 = vcombine.high %v1037_v28, %v1041_v54  ;;  %v901_v34 = vld [vmem:[#allocation5 + $0x18c0] sm:$0xff]  ;;  %6561 = vmatprep.subr.bf16.mxu0 %v8812_v32  ;;  %v8939_v43 = vcombine.low %v1037_v28, %v1041_v54 }
 0x10f   :  { %v905_v35 = vld [vmem:[#allocation5 + $0x18e0] sm:$0xff]  ;;  %6562 = vmatpush1.bf16.msra.mxu0 %v8811_v41 }
 0x110   :  { %v1029_v37 = vld [vmem:[#allocation5 + $0x1cc0] sm:$0xff]  ;;  %v8804_v44 = vcombine.high %v901_v34, %v905_v35  ;;  %6602 = vmatprep.subr.bf16.mxu1 %v8940_v33  ;;  %v8803_v50 = vcombine.low %v901_v34, %v905_v35 }
 0x111   :  { %v1033_v38 = vld [vmem:[#allocation5 + $0x1ce0] sm:$0xff]  ;;  %6603 = vmatpush1.bf16.msra.mxu1 %v8939_v43 }
 0x112   :  { %v8932_v45 = vcombine.high %v1029_v37, %v1033_v38  ;;  %v893_v19 = vld [vmem:[#allocation5 + $0x1880] sm:$0xff]  ;;  %6563 = vmatprep.subr.bf16.mxu0 %v8804_v44  ;;  %v8931_v51 = vcombine.low %v1029_v37, %v1033_v38 }
 0x113   :  { %v897_v46 = vld [vmem:[#allocation5 + $0x18a0] sm:$0xff]  ;;  %6564 = vmatpush1.bf16.msra.mxu0 %v8803_v50 }
 0x114   :  { %v1021_v48 = vld [vmem:[#allocation5 + $0x1c80] sm:$0xff]  ;;  %v8796_v52 = vcombine.high %v893_v19, %v897_v46  ;;  %6604 = vmatprep.subr.bf16.mxu1 %v8932_v45  ;;  %v8795_v62 = vcombine.low %v893_v19, %v897_v46 }
 0x115   :  { %v1025_v22 = vld [vmem:[#allocation5 + $0x1ca0] sm:$0xff]  ;;  %6605 = vmatpush1.bf16.msra.mxu1 %v8931_v51 }
 0x116   :  { %v8924_v55 = vcombine.high %v1021_v48, %v1025_v22  ;;  %v885_v56 = vld [vmem:[#allocation5 + $0x1840] sm:$0xff]  ;;  %6565 = vmatprep.subr.bf16.mxu0 %v8796_v52  ;;  %v8923_v63 = vcombine.low %v1021_v48, %v1025_v22 }
 0x117   :  { %v889_v57 = vld [vmem:[#allocation5 + $0x1860] sm:$0xff]  ;;  %6566 = vmatpush1.bf16.msra.mxu0 %v8795_v62 }
 0x118   :  { %v1013_v60 = vld [vmem:[#allocation5 + $0x1c40] sm:$0xff]  ;;  %v8788_v0 = vcombine.high %v885_v56, %v889_v57  ;;  %6606 = vmatprep.subr.bf16.mxu1 %v8924_v55  ;;  %v8787_v9 = vcombine.low %v885_v56, %v889_v57 }
 0x119   :  { %v1017_v61 = vld [vmem:[#allocation5 + $0x1c60] sm:$0xff]  ;;  %6607 = vmatpush1.bf16.msra.mxu1 %v8923_v63 }
 0x11a   :  { %v8916_v1 = vcombine.high %v1013_v60, %v1017_v61  ;;  %v877_v2 = vld [vmem:[#allocation5 + $0x1800] sm:$0xff]  ;;  %6567 = vmatprep.subr.bf16.mxu0 %v8788_v0  ;;  %v8915_v11 = vcombine.low %v1013_v60, %v1017_v61 }
 0x11b   :  { %v881_v3 = vld [vmem:[#allocation5 + $0x1820] sm:$0xff]  ;;  %6568 = vmatpush1.bf16.msra.mxu0 %v8787_v9 }
 0x11c   :  { %v1005_v5 = vld [vmem:[#allocation5 + $0x1c00] sm:$0xff]  ;;  %v8780_v12 = vcombine.high %v877_v2, %v881_v3  ;;  %6608 = vmatprep.subr.bf16.mxu1 %v8916_v1  ;;  %v8779_v21 = vcombine.low %v877_v2, %v881_v3 }
 0x11d   :  { %v1009_v6 = vld [vmem:[#allocation5 + $0x1c20] sm:$0xff]  ;;  %6609 = vmatpush1.bf16.msra.mxu1 %v8915_v11 }
 0x11e   :  { %v8908_v13 = vcombine.high %v1005_v5, %v1009_v6  ;;  %v997_v39 = vld [vmem:[#allocation5 + $0x1bc0] sm:$0xff]  ;;  %6569 = vmatprep.subr.bf16.mxu0 %v8780_v12  ;;  %v8907_v23 = vcombine.low %v1005_v5, %v1009_v6 }
 0x11f   :  { %v1001_v14 = vld [vmem:[#allocation5 + $0x1be0] sm:$0xff]  ;;  %6570 = vmatpush1.bf16.msra.mxu0 %v8779_v21 }
 0x120   :  { %v1125_v17 = vld [vmem:[#allocation5 + $0x1fc0] sm:$0xff]  ;;  %v8900_v24 = vcombine.high %v997_v39, %v1001_v14  ;;  %6610 = vmatprep.subr.bf16.mxu1 %v8908_v13  ;;  %v8899_v30 = vcombine.low %v997_v39, %v1001_v14 }
 0x121   :  { %v1129_v42 = vld [vmem:[#allocation5 + $0x1fe0] sm:$0xff]  ;;  %6611 = vmatpush1.bf16.msra.mxu1 %v8907_v23 }
 0x122   :  { %v9028_v25 = vcombine.high %v1125_v17, %v1129_v42  ;;  %v989_v53 = vld [vmem:[#allocation5 + $0x1b80] sm:$0xff]  ;;  %6571 = vmatprep.subr.bf16.mxu0 %v8900_v24  ;;  %v9027_v31 = vcombine.low %v1125_v17, %v1129_v42 }
 0x123   :  { %v993_v26 = vld [vmem:[#allocation5 + $0x1ba0] sm:$0xff]  ;;  %6572 = vmatpush2.bf16.msra.mxu0 %v8899_v30 }
 0x124   :  { %v1117_v28 = vld [vmem:[#allocation5 + $0x1f80] sm:$0xff]  ;;  %v8892_v32 = vcombine.high %v989_v53, %v993_v26  ;;  %6612 = vmatprep.subr.bf16.mxu1 %v9028_v25  ;;  %v8891_v41 = vcombine.low %v989_v53, %v993_v26 }
 0x125   :  { %v1121_v54 = vld [vmem:[#allocation5 + $0x1fa0] sm:$0xff]  ;;  %6613 = vmatpush2.bf16.msra.mxu1 %v9027_v31 }
 0x126   :  { %v9020_v33 = vcombine.high %v1117_v28, %v1121_v54  ;;  %v981_v34 = vld [vmem:[#allocation5 + $0x1b40] sm:$0xff]  ;;  %6573 = vmatprep.subr.bf16.mxu0 %v8892_v32  ;;  %v9019_v43 = vcombine.low %v1117_v28, %v1121_v54 }
 0x127   :  { %v985_v35 = vld [vmem:[#allocation5 + $0x1b60] sm:$0xff]  ;;  %6574 = vmatpush2.bf16.msra.mxu0 %v8891_v41 }
 0x128   :  { %v1109_v37 = vld [vmem:[#allocation5 + $0x1f40] sm:$0xff]  ;;  %v8884_v44 = vcombine.high %v981_v34, %v985_v35  ;;  %6614 = vmatprep.subr.bf16.mxu1 %v9020_v33  ;;  %v8883_v50 = vcombine.low %v981_v34, %v985_v35  ;;  %v166_v34 = vld [vmem:[#allocation5 + $0x1c8] sm:$0xff] }
 0x129   :  { %v1113_v38 = vld [vmem:[#allocation5 + $0x1f60] sm:$0xff]  ;;  %6615 = vmatpush2.bf16.msra.mxu1 %v9019_v43  ;;  %v170_v35 = vld [vmem:[#allocation5 + $0x1e8] sm:$0xff] }
 0x12a   :  { %v9012_v45 = vcombine.high %v1109_v37, %v1113_v38  ;;  %v973_v19 = vld [vmem:[#allocation5 + $0x1b00] sm:$0xff]  ;;  %6575 = vmatprep.subr.bf16.mxu0 %v8884_v44  ;;  %v9011_v51 = vcombine.low %v1109_v37, %v1113_v38  ;;  %v294_v37 = vld [vmem:[#allocation5 + $0x5c8] sm:$0xff]  ;;  %v8070_v44 = vcombine.high %v166_v34, %v170_v35 }
 0x12b   :  { %v977_v46 = vld [vmem:[#allocation5 + $0x1b20] sm:$0xff]  ;;  %6576 = vmatpush2.bf16.msra.mxu0 %v8883_v50  ;;  %v298_v38 = vld [vmem:[#allocation5 + $0x5e8] sm:$0xff] }
 0x12c   :  { %v1101_v48 = vld [vmem:[#allocation5 + $0x1f00] sm:$0xff]  ;;  %v8876_v52 = vcombine.high %v973_v19, %v977_v46  ;;  %6616 = vmatprep.subr.bf16.mxu1 %v9012_v45  ;;  %v8875_v62 = vcombine.low %v973_v19, %v977_v46  ;;  %v8198_v45 = vcombine.high %v294_v37, %v298_v38  ;;  %v158_v19 = vld [vmem:[#allocation5 + $0x188] sm:$0xff] }
 0x12d   :  { %v1105_v22 = vld [vmem:[#allocation5 + $0x1f20] sm:$0xff]  ;;  %6617 = vmatpush2.bf16.msra.mxu1 %v9011_v51  ;;  %v162_v46 = vld [vmem:[#allocation5 + $0x1a8] sm:$0xff]  ;;  %v9357_v51 = vcombine.low %v9337_v10, %v9337_v10 }
 0x12e   :  { %v9004_v55 = vcombine.high %v1101_v48, %v1105_v22  ;;  %v965_v56 = vld [vmem:[#allocation5 + $0x1ac0] sm:$0xff]  ;;  %6577 = vmatprep.subr.bf16.mxu0 %v8876_v52  ;;  %v9003_v63 = vcombine.low %v1101_v48, %v1105_v22  ;;  %v9353_v48 = vcombine.low %v9331_v7, %v9331_v7  ;;  %v286_v22 = vld [vmem:[#allocation5 + $0x588] sm:$0xff]  ;;  %v8069_v52 = vcombine.low %v166_v34, %v170_v35 }
 0x12f   :  { %v969_v57 = vld [vmem:[#allocation5 + $0x1ae0] sm:$0xff]  ;;  %6578 = vmatpush2.bf16.msra.mxu0 %v8875_v62  ;;  %v290_v50 = vld [vmem:[#allocation5 + $0x5a8] sm:$0xff]  ;;  %v8061_v10 = vcombine.low %v158_v19, %v162_v46 }
 0x130   :  { %v1093_v60 = vld [vmem:[#allocation5 + $0x1ec0] sm:$0xff]  ;;  %v8868_v0 = vcombine.high %v965_v56, %v969_v57  ;;  %6618 = vmatprep.subr.bf16.mxu1 %v9004_v55  ;;  %v8867_v9 = vcombine.low %v965_v56, %v969_v57  ;;  %v8197_v55 = vcombine.low %v294_v37, %v298_v38  ;;  %v8062_v56 = vcombine.high %v158_v19, %v162_v46  ;;  %v278_v7 = vld [vmem:[#allocation5 + $0x548] sm:$0xff] }
 0x131   :  { %v1097_v61 = vld [vmem:[#allocation5 + $0x1ee0] sm:$0xff]  ;;  %6619 = vmatpush2.bf16.msra.mxu1 %v9003_v63  ;;  %v8190_v57 = vcombine.high %v286_v22, %v290_v50  ;;  %v282_v63 = vld [vmem:[#allocation5 + $0x568] sm:$0xff] }
 0x132   :  { %v8996_v1 = vcombine.high %v1093_v60, %v1097_v61  ;;  %v957_v2 = vld [vmem:[#allocation5 + $0x1a80] sm:$0xff]  ;;  %6579 = vmatprep.subr.bf16.mxu0 %v8868_v0  ;;  %v8995_v11 = vcombine.low %v1093_v60, %v1097_v61  ;;  %v150_v60 = vld [vmem:[#allocation5 + $0x148] sm:$0xff] }
 0x133   :  { %v961_v3 = vld [vmem:[#allocation5 + $0x1aa0] sm:$0xff]  ;;  %6580 = vmatpush2.bf16.msra.mxu0 %v8867_v9  ;;  %v154_v61 = vld [vmem:[#allocation5 + $0x168] sm:$0xff]  ;;  %v8182_v9 = vcombine.high %v278_v7, %v282_v63 }
 0x134   :  { %v1085_v5 = vld [vmem:[#allocation5 + $0x1e80] sm:$0xff]  ;;  %v8860_v12 = vcombine.high %v957_v2, %v961_v3  ;;  %6620 = vmatprep.subr.bf16.mxu1 %v8996_v1  ;;  %v8859_v21 = vcombine.low %v957_v2, %v961_v3  ;;  %v8189_v3 = vcombine.low %v286_v22, %v290_v50  ;;  %v126_v37 = vld [vmem:[#allocation5 + $0x88] sm:$0xff] }
 0x135   :  { %v1089_v6 = vld [vmem:[#allocation5 + $0x1ea0] sm:$0xff]  ;;  %6621 = vmatpush2.bf16.msra.mxu1 %v8995_v11  ;;  %v142_v11 = vld [vmem:[#allocation5 + $0x108] sm:$0xff] }
 0x136   :  { %v8988_v13 = vcombine.high %v1085_v5, %v1089_v6  ;;  %v949_v39 = vld [vmem:[#allocation5 + $0x1a40] sm:$0xff]  ;;  %6581 = vmatprep.subr.bf16.mxu0 %v8860_v12  ;;  %v8987_v23 = vcombine.low %v1085_v5, %v1089_v6  ;;  %v8054_v5 = vcombine.high %v150_v60, %v154_v61  ;;  %v146_v12 = vld [vmem:[#allocation5 + $0x128] sm:$0xff] }
 0x137   :  { %v953_v14 = vld [vmem:[#allocation5 + $0x1a60] sm:$0xff]  ;;  %6582 = vmatpush2.bf16.msra.mxu0 %v8859_v21  ;;  %v8053_v21 = vcombine.low %v150_v60, %v154_v61  ;;  %v130_v38 = vld [vmem:[#allocation5 + $0xa8] sm:$0xff] }
 0x138   :  { %v1077_v17 = vld [vmem:[#allocation5 + $0x1e40] sm:$0xff]  ;;  %v8852_v24 = vcombine.high %v949_v39, %v953_v14  ;;  %6622 = vmatprep.subr.bf16.mxu1 %v8988_v13  ;;  %v8851_v30 = vcombine.low %v949_v39, %v953_v14  ;;  %v270_v14 = vld [vmem:[#allocation5 + $0x508] sm:$0xff]  ;;  %v8030_v19 = vcombine.high %v126_v37, %v130_v38 }
 0x139   :  { %v1081_v42 = vld [vmem:[#allocation5 + $0x1e60] sm:$0xff]  ;;  %6623 = vmatpush2.bf16.msra.mxu1 %v8987_v23  ;;  %v118_v22 = vld [vmem:[#allocation5 + $0x48] sm:$0xff] }
 0x13a   :  { %v8980_v25 = vcombine.high %v1077_v17, %v1081_v42  ;;  %v941_v53 = vld [vmem:[#allocation5 + $0x1a00] sm:$0xff]  ;;  %6583 = vmatprep.subr.bf16.mxu0 %v8852_v24  ;;  %v8979_v31 = vcombine.low %v1077_v17, %v1081_v42  ;;  %v274_v17 = vld [vmem:[#allocation5 + $0x528] sm:$0xff]  ;;  %v8181_v24 = vcombine.low %v278_v7, %v282_v63 }
 0x13b   :  { %v945_v26 = vld [vmem:[#allocation5 + $0x1a20] sm:$0xff]  ;;  %6584 = vmatpush2.bf16.msra.mxu0 %v8851_v30  ;;  %v262_v30 = vld [vmem:[#allocation5 + $0x4c8] sm:$0xff] }
 0x13c   :  { %v1069_v28 = vld [vmem:[#allocation5 + $0x1e00] sm:$0xff]  ;;  %v8844_v32 = vcombine.high %v941_v53, %v945_v26  ;;  %6624 = vmatprep.subr.bf16.mxu1 %v8980_v25  ;;  %v8843_v41 = vcombine.low %v941_v53, %v945_v26  ;;  %v8046_v25 = vcombine.high %v142_v11, %v146_v12  ;;  %v8174_v26 = vcombine.high %v270_v14, %v274_v17  ;;  %v122_v50 = vld [vmem:[#allocation5 + $0x68] sm:$0xff] }
 0x13d   :  { %v1073_v54 = vld [vmem:[#allocation5 + $0x1e20] sm:$0xff]  ;;  %6625 = vmatpush2.bf16.msra.mxu1 %v8979_v31  ;;  %v266_v31 = vld [vmem:[#allocation5 + $0x4e8] sm:$0xff]  ;;  %v8022_v60 = vcombine.high %v118_v22, %v122_v50 }
 0x13e   :  { %v8972_v33 = vcombine.high %v1069_v28, %v1073_v54  ;;  %6585 = vmatprep.subr.bf16.mxu0 %v8844_v32  ;;  %v8971_v43 = vcombine.low %v1069_v28, %v1073_v54  ;;  %v134_v28 = vld [vmem:[#allocation5 + $0xc8] sm:$0xff]  ;;  %v8045_v32 = vcombine.low %v142_v11, %v146_v12  ;;  %v8166_v35 = vcombine.high %v262_v30, %v266_v31 }
 0x13f   :  { %6586 = vmatpush2.bf16.msra.mxu0 %v8843_v41  ;;  %v138_v54 = vld [vmem:[#allocation5 + $0xe8] sm:$0xff] }
 0x140   :  { %6626 = vmatprep.subr.bf16.mxu1 %v8972_v33  ;;  %6637 = vmatprep.subr.bf16.mxu0 %v8070_v44  ;;  %v8173_v33 = vcombine.low %v270_v14, %v274_v17  ;;  %v8038_v34 = vcombine.high %v134_v28, %v138_v54  ;;  %v254_v41 = vld [vmem:[#allocation5 + $0x488] sm:$0xff]  ;;  %v8037_v44 = vcombine.low %v134_v28, %v138_v54 }
 0x141   :  { %6627 = vmatpush2.bf16.msra.mxu1 %v8971_v43  ;;  %v6343_v62 = vpop.f32.mrf.mxu0  ;;  %v258_v43 = vld [vmem:[#allocation5 + $0x4a8] sm:$0xff] }
 0x142   :  { %6678 = vmatprep.subr.bf16.mxu1 %v8198_v45  ;;  %6588 = vmatmul.mubr.bf16.vlgmr.msra.gmra.mxu0 %v9353_v48  ;;  %v8165_v45 = vcombine.low %v262_v30, %v266_v31  ;;  %v8158_v46 = vcombine.high %v254_v41, %v258_v43  ;;  %v114_v7 = vld [vmem:[#allocation5 + $0x28] sm:$0xff] }
 0x143   :  { %v6384_v0 = vpop.f32.mrf.mxu1  ;;  %6638 = vmatpush1.bf16.msra.mxu0 %v8069_v52  ;;  %v6345_v2 = vpop.f32.mrf.mxu0  ;;  %6669 = vmatprep.mubr.bf16.mxu0 %v9271_v58  ;;  %v246_v52 = vld [vmem:[#allocation5 + $0x448] sm:$0xff] }
 0x144   :  { %6629 = vmatmul.mubr.bf16.vlgmr.msra.gmra.mxu1 %v9357_v51  ;;  %v9361_v1 = vadd.f32 %v6384_v0, %v6343_v62  ;;  %6639 = vmatprep.subr.bf16.mxu0 %v8062_v56  ;;  %v8029_v56 = vcombine.low %v126_v37, %v130_v38  ;;  %v110_v62 = vld [vmem:[#allocation5 + $0x8] sm:$0xff] }
 0x145   :  { %6679 = vmatpush1.bf16.msra.mxu1 %v8197_v55  ;;  %v6386_v6 = vpop.f32.mrf.mxu1  ;;  %v6347_v39 = vpop.f32.mrf.mxu0  ;;  %6710 = vmatprep.mubr.bf16.mxu1 %v9275_v59  ;;  %v250_v55 = vld [vmem:[#allocation5 + $0x468] sm:$0xff] }
 0x146   :  { %6680 = vmatprep.subr.bf16.mxu1 %v8190_v57  ;;  %v9364_v13 = vadd.f32 %v6386_v6, %v6345_v2  ;;  %v8157_v57 = vcombine.low %v254_v41, %v258_v43  ;;  %v8150_v61 = vcombine.high %v246_v52, %v250_v55  ;;  %v238_v63 = vld [vmem:[#allocation5 + $0x408] sm:$0xff]  ;;  %v8149_v2 = vcombine.low %v246_v52, %v250_v55 }
 0x147   :  { %v6388_v42 = vpop.f32.mrf.mxu1  ;;  %6640 = vmatpush1.bf16.msra.mxu0 %v8061_v10  ;;  %v6348_v23 = vpop.f32.mrf.mxu0  ;;  %v242_v0 = vld [vmem:[#allocation5 + $0x428] sm:$0xff]  ;;  %v8021_v10 = vcombine.low %v118_v22, %v122_v50  ;;  %v8013_v39 = vcombine.low %v110_v62, %v114_v7 }
 0x148   :  { %6641 = vmatprep.subr.bf16.mxu0 %v8054_v5  ;;  %v8142_v5 = vcombine.high %v238_v63, %v242_v0  ;;  %v230_v6 = vld [vmem:[#allocation5 + $0x3c8] sm:$0xff]  ;;  %v8141_v14 = vcombine.low %v238_v63, %v242_v0 }
 0x149   :  { %6681 = vmatpush1.bf16.msra.mxu1 %v8189_v3  ;;  %v6389_v53 = vpop.f32.mrf.mxu1  ;;  %v8014_v3 = vcombine.high %v110_v62, %v114_v7  ;;  %v358_v11 = vld [vmem:[#allocation5 + $0x7c8] sm:$0xff] }
 0x14a   :  { %6682 = vmatprep.subr.bf16.mxu1 %v8182_v9  ;;  %v234_v9 = vld [vmem:[#allocation5 + $0x3e8] sm:$0xff] }
 0x14b   :  { %6642 = vmatpush1.bf16.msra.mxu0 %v8053_v21  ;;  %v362_v12 = vld [vmem:[#allocation5 + $0x7e8] sm:$0xff]  ;;  %v8134_v17 = vcombine.high %v230_v6, %v234_v9  ;;  %v8133_v53 = vcombine.low %v230_v6, %v234_v9 }
 0x14c   :  { %6643 = vmatprep.subr.bf16.mxu0 %v8046_v25  ;;  %v8262_v42 = vcombine.high %v358_v11, %v362_v12  ;;  %v222_v21 = vld [vmem:[#allocation5 + $0x388] sm:$0xff] }
 0x14d   :  { %6683 = vmatpush1.bf16.msra.mxu1 %v8181_v24  ;;  %v226_v23 = vld [vmem:[#allocation5 + $0x3a8] sm:$0xff] }
 0x14e   :  { %6684 = vmatprep.subr.bf16.mxu1 %v8174_v26  ;;  %v350_v24 = vld [vmem:[#allocation5 + $0x788] sm:$0xff]  ;;  %v8261_v26 = vcombine.low %v358_v11, %v362_v12  ;;  %v8126_v28 = vcombine.high %v222_v21, %v226_v23 }
 0x14f   :  { %6644 = vmatpush1.bf16.msra.mxu0 %v8045_v32  ;;  %v354_v25 = vld [vmem:[#allocation5 + $0x7a8] sm:$0xff] }
 0x150   :  { %6645 = vmatprep.subr.bf16.mxu0 %v8038_v34  ;;  %v8254_v54 = vcombine.high %v350_v24, %v354_v25  ;;  %v214_v30 = vld [vmem:[#allocation5 + $0x348] sm:$0xff]  ;;  %v8125_v34 = vcombine.low %v222_v21, %v226_v23 }
 0x151   :  { %6685 = vmatpush1.bf16.msra.mxu1 %v8173_v33  ;;  %v218_v31 = vld [vmem:[#allocation5 + $0x368] sm:$0xff] }
 0x152   :  { %6686 = vmatprep.subr.bf16.mxu1 %v8166_v35  ;;  %v342_v32 = vld [vmem:[#allocation5 + $0x748] sm:$0xff]  ;;  %v8253_v35 = vcombine.low %v350_v24, %v354_v25  ;;  %v8118_v37 = vcombine.high %v214_v30, %v218_v31 }
 0x153   :  { %6646 = vmatpush1.bf16.msra.mxu0 %v8037_v44  ;;  %v346_v33 = vld [vmem:[#allocation5 + $0x768] sm:$0xff] }
 0x154   :  { %6647 = vmatprep.subr.bf16.mxu0 %v8030_v19  ;;  %v8246_v38 = vcombine.high %v342_v32, %v346_v33  ;;  %v206_v41 = vld [vmem:[#allocation5 + $0x308] sm:$0xff]  ;;  %v8117_v19 = vcombine.low %v214_v30, %v218_v31 }
 0x155   :  { %6687 = vmatpush1.bf16.msra.mxu1 %v8165_v45  ;;  %v210_v43 = vld [vmem:[#allocation5 + $0x328] sm:$0xff] }
 0x156   :  { %6688 = vmatprep.subr.bf16.mxu1 %v8158_v46  ;;  %v334_v44 = vld [vmem:[#allocation5 + $0x708] sm:$0xff]  ;;  %v8245_v46 = vcombine.low %v342_v32, %v346_v33  ;;  %v8110_v22 = vcombine.high %v206_v41, %v210_v43 }
 0x157   :  { %6648 = vmatpush1.bf16.msra.mxu0 %v8029_v56  ;;  %v338_v45 = vld [vmem:[#allocation5 + $0x728] sm:$0xff] }
 0x158   :  { %6649 = vmatprep.subr.bf16.mxu0 %v8022_v60  ;;  %v8238_v50 = vcombine.high %v334_v44, %v338_v45  ;;  %v198_v52 = vld [vmem:[#allocation5 + $0x2c8] sm:$0xff]  ;;  %v8109_v60 = vcombine.low %v206_v41, %v210_v43 }
 0x159   :  { %6689 = vmatpush1.bf16.msra.mxu1 %v8157_v57  ;;  %v202_v55 = vld [vmem:[#allocation5 + $0x2e8] sm:$0xff] }
 0x15a   :  { %6690 = vmatprep.subr.bf16.mxu1 %v8150_v61  ;;  %v326_v56 = vld [vmem:[#allocation5 + $0x6c8] sm:$0xff]  ;;  %v8237_v61 = vcombine.low %v334_v44, %v338_v45  ;;  %v8102_v62 = vcombine.high %v198_v52, %v202_v55 }
 0x15b   :  { %6650 = vmatpush1.bf16.msra.mxu0 %v8021_v10  ;;  %v330_v57 = vld [vmem:[#allocation5 + $0x6e8] sm:$0xff] }
 0x15c   :  { %6651 = vmatprep.subr.bf16.mxu0 %v8014_v3  ;;  %v8230_v7 = vcombine.high %v326_v56, %v330_v57  ;;  %v190_v63 = vld [vmem:[#allocation5 + $0x288] sm:$0xff]  ;;  %v8101_v3 = vcombine.low %v198_v52, %v202_v55 }
 0x15d   :  { %6691 = vmatpush1.bf16.msra.mxu1 %v8149_v2  ;;  %v194_v0 = vld [vmem:[#allocation5 + $0x2a8] sm:$0xff] }
 0x15e   :  { %6692 = vmatprep.subr.bf16.mxu1 %v8142_v5  ;;  %v318_v10 = vld [vmem:[#allocation5 + $0x688] sm:$0xff]  ;;  %v8229_v5 = vcombine.low %v326_v56, %v330_v57  ;;  %v8094_v6 = vcombine.high %v190_v63, %v194_v0 }
 0x15f   :  { %6652 = vmatpush1.bf16.msra.mxu0 %v8013_v39  ;;  %v322_v2 = vld [vmem:[#allocation5 + $0x6a8] sm:$0xff] }
 0x160   :  { %6653 = vmatprep.subr.bf16.mxu0 %v8134_v17  ;;  %v8222_v9 = vcombine.high %v318_v10, %v322_v2  ;;  %v182_v11 = vld [vmem:[#allocation5 + $0x248] sm:$0xff]  ;;  %v8093_v17 = vcombine.low %v190_v63, %v194_v0 }
 0x161   :  { %6693 = vmatpush1.bf16.msra.mxu1 %v8141_v14  ;;  %v186_v12 = vld [vmem:[#allocation5 + $0x268] sm:$0xff] }
 0x162   :  { %6694 = vmatprep.subr.bf16.mxu1 %v8262_v42  ;;  %v310_v39 = vld [vmem:[#allocation5 + $0x648] sm:$0xff]  ;;  %v8221_v42 = vcombine.low %v318_v10, %v322_v2  ;;  %v8086_v21 = vcombine.high %v182_v11, %v186_v12 }
 0x163   :  { %6654 = vmatpush2.bf16.msra.mxu0 %v8133_v53  ;;  %v314_v14 = vld [vmem:[#allocation5 + $0x668] sm:$0xff] }
 0x164   :  { %6655 = vmatprep.subr.bf16.mxu0 %v8126_v28  ;;  %v8214_v23 = vcombine.high %v310_v39, %v314_v14  ;;  %v174_v24 = vld [vmem:[#allocation5 + $0x208] sm:$0xff]  ;;  %v8085_v28 = vcombine.low %v182_v11, %v186_v12 }
 0x165   :  { %6695 = vmatpush2.bf16.msra.mxu1 %v8261_v26  ;;  %v178_v25 = vld [vmem:[#allocation5 + $0x228] sm:$0xff] }
 0x166   :  { %6696 = vmatprep.subr.bf16.mxu1 %v8254_v54  ;;  %v302_v53 = vld [vmem:[#allocation5 + $0x608] sm:$0xff]  ;;  %v8213_v54 = vcombine.low %v310_v39, %v314_v14  ;;  %v8078_v30 = vcombine.high %v174_v24, %v178_v25 }
 0x167   :  { %6656 = vmatpush2.bf16.msra.mxu0 %v8125_v34  ;;  %v306_v26 = vld [vmem:[#allocation5 + $0x628] sm:$0xff] }
 0x168   :  { %6657 = vmatprep.subr.bf16.mxu0 %v8118_v37  ;;  %v8206_v31 = vcombine.high %v302_v53, %v306_v26  ;;  %v422_v32 = vld [vmem:[#allocation5 + $0x9c8] sm:$0xff]  ;;  %v8077_v37 = vcombine.low %v174_v24, %v178_v25 }
 0x169   :  { %6697 = vmatpush2.bf16.msra.mxu1 %v8253_v35  ;;  %v426_v33 = vld [vmem:[#allocation5 + $0x9e8] sm:$0xff] }
 0x16a   :  { %6698 = vmatprep.subr.bf16.mxu1 %v8246_v38  ;;  %v550_v34 = vld [vmem:[#allocation5 + $0xdc8] sm:$0xff]  ;;  %v8205_v38 = vcombine.low %v302_v53, %v306_v26  ;;  %v8326_v41 = vcombine.high %v422_v32, %v426_v33 }
 0x16b   :  { %6658 = vmatpush2.bf16.msra.mxu0 %v8117_v19  ;;  %v554_v35 = vld [vmem:[#allocation5 + $0xde8] sm:$0xff] }
 0x16c   :  { %6659 = vmatprep.subr.bf16.mxu0 %v8110_v22  ;;  %v8454_v43 = vcombine.high %v550_v34, %v554_v35  ;;  %v414_v44 = vld [vmem:[#allocation5 + $0x988] sm:$0xff]  ;;  %v8325_v22 = vcombine.low %v422_v32, %v426_v33 }
 0x16d   :  { %6699 = vmatpush2.bf16.msra.mxu1 %v8245_v46  ;;  %v418_v45 = vld [vmem:[#allocation5 + $0x9a8] sm:$0xff] }
 0x16e   :  { %6700 = vmatprep.subr.bf16.mxu1 %v8238_v50  ;;  %v542_v19 = vld [vmem:[#allocation5 + $0xd88] sm:$0xff]  ;;  %v8453_v50 = vcombine.low %v550_v34, %v554_v35  ;;  %v8318_v52 = vcombine.high %v414_v44, %v418_v45  ;;  %v8317_v0 = vcombine.low %v414_v44, %v418_v45 }
 0x16f   :  { %6660 = vmatpush2.bf16.msra.mxu0 %v8109_v60  ;;  %v546_v46 = vld [vmem:[#allocation5 + $0xda8] sm:$0xff] }
 0x170   :  { %6661 = vmatprep.subr.bf16.mxu0 %v8102_v62  ;;  %v8446_v55 = vcombine.high %v542_v19, %v546_v46  ;;  %v406_v56 = vld [vmem:[#allocation5 + $0x948] sm:$0xff]  ;;  %v8445_v2 = vcombine.low %v542_v19, %v546_v46 }
 0x171   :  { %6701 = vmatpush2.bf16.msra.mxu1 %v8237_v61  ;;  %v410_v57 = vld [vmem:[#allocation5 + $0x968] sm:$0xff] }
 0x172   :  { %6702 = vmatprep.subr.bf16.mxu1 %v8230_v7  ;;  %v534_v61 = vld [vmem:[#allocation5 + $0xd48] sm:$0xff] }
 0x173   :  { %6662 = vmatpush2.bf16.msra.mxu0 %v8101_v3  ;;  %v538_v62 = vld [vmem:[#allocation5 + $0xd68] sm:$0xff]  ;;  %v8310_v3 = vcombine.high %v406_v56, %v410_v57 }
 0x174   :  { %6663 = vmatprep.subr.bf16.mxu0 %v8094_v6  ;;  %v8438_v11 = vcombine.high %v534_v61, %v538_v62  ;;  %v398_v12 = vld [vmem:[#allocation5 + $0x908] sm:$0xff] }
 0x175   :  { %6703 = vmatpush2.bf16.msra.mxu1 %v8229_v5  ;;  %v402_v39 = vld [vmem:[#allocation5 + $0x928] sm:$0xff] }
 0x176   :  { %6704 = vmatprep.subr.bf16.mxu1 %v8222_v9  ;;  %v526_v14 = vld [vmem:[#allocation5 + $0xd08] sm:$0xff]  ;;  %v8302_v25 = vcombine.high %v398_v12, %v402_v39  ;;  %v8301_v32 = vcombine.low %v398_v12, %v402_v39 }
 0x177   :  { %6664 = vmatpush2.bf16.msra.mxu0 %v8093_v17  ;;  %v530_v17 = vld [vmem:[#allocation5 + $0xd28] sm:$0xff] }
 0x178   :  { %6665 = vmatprep.subr.bf16.mxu0 %v8086_v21  ;;  %v8430_v26 = vcombine.high %v526_v14, %v530_v17  ;;  %v8429_v33 = vcombine.low %v526_v14, %v530_v17  ;;  %v614_v12 = vld [vmem:[#allocation5 + $0xfc8] sm:$0xff] }
 0x179   :  { %6705 = vmatpush2.bf16.msra.mxu1 %v8221_v42  ;;  %v618_v39 = vld [vmem:[#allocation5 + $0xfe8] sm:$0xff] }
 0x17a   :  { %6706 = vmatprep.subr.bf16.mxu1 %v8214_v23  ;;  %v8309_v23 = vcombine.low %v406_v56, %v410_v57 }
 0x17b   :  { %6666 = vmatpush2.bf16.msra.mxu0 %v8085_v28  ;;  %v390_v28 = vld [vmem:[#allocation5 + $0x8c8] sm:$0xff] }
 0x17c   :  { %6667 = vmatprep.subr.bf16.mxu0 %v8078_v30  ;;  %v518_v30 = vld [vmem:[#allocation5 + $0xcc8] sm:$0xff] }
 0x17d   :  { %6707 = vmatpush2.bf16.msra.mxu1 %v8213_v54  ;;  %v394_v54 = vld [vmem:[#allocation5 + $0x8e8] sm:$0xff] }
 0x17e   :  { %6708 = vmatprep.subr.bf16.mxu1 %v8206_v31  ;;  %v522_v31 = vld [vmem:[#allocation5 + $0xce8] sm:$0xff]  ;;  %v8294_v34 = vcombine.high %v390_v28, %v394_v54  ;;  %v8293_v44 = vcombine.low %v390_v28, %v394_v54 }
 0x17f   :  { %6668 = vmatpush2.bf16.msra.mxu0 %v8077_v37  ;;  %v8422_v35 = vcombine.high %v518_v30, %v522_v31  ;;  %v382_v37 = vld [vmem:[#allocation5 + $0x888] sm:$0xff]  ;;  %v8421_v45 = vcombine.low %v518_v30, %v522_v31 }
 0x180   :  { %6719 = vmatprep.subr.bf16.mxu0 %v8326_v41  ;;  %v510_v41 = vld [vmem:[#allocation5 + $0xc88] sm:$0xff] }
 0x181   :  { %6709 = vmatpush2.bf16.msra.mxu1 %v8205_v38  ;;  %v6425_v60 = vpop.f32.mrf.mxu0  ;;  %v386_v38 = vld [vmem:[#allocation5 + $0x8a8] sm:$0xff] }
 0x182   :  { %6760 = vmatprep.subr.bf16.mxu1 %v8454_v43  ;;  %6670 = vmatmul.mubr.bf16.vlgmr.msra.gmra.mxu0 %v9281_v16  ;;  %v6426_v7 = vadd.f32 %v6425_v60, %v9361_v1  ;;  %v514_v43 = vld [vmem:[#allocation5 + $0xca8] sm:$0xff]  ;;  %v8286_v19 = vcombine.high %v382_v37, %v386_v38  ;;  %v8285_v56 = vcombine.low %v382_v37, %v386_v38 }
 0x183   :  { %v6466_v63 = vpop.f32.mrf.mxu1  ;;  %6720 = vmatpush1.bf16.msra.mxu0 %v8325_v22  ;;  %v6427_v10 = vpop.f32.mrf.mxu0  ;;  %6751 = vmatprep.mubr.bf16.mxu0 %v9293_v27  ;;  %v8414_v46 = vcombine.high %v510_v41, %v514_v43  ;;  %v374_v22 = vld [vmem:[#allocation5 + $0x848] sm:$0xff]  ;;  %v8413_v57 = vcombine.low %v510_v41, %v514_v43 }
 0x184   :  { %6711 = vmatmul.mubr.bf16.vlgmr.msra.gmra.mxu1 %v9287_v20  ;;  %6721 = vmatprep.subr.bf16.mxu0 %v8318_v52  ;;  %v9370_v5 = vadd.f32 %v6466_v63, %v6426_v7  ;;  %v6428_v6 = vadd.f32 %v6427_v10, %v9364_v13  ;;  %v8437_v13 = vcombine.low %v534_v61, %v538_v62  ;;  %v502_v52 = vld [vmem:[#allocation5 + $0xc48] sm:$0xff] }
 0x185   :  { %6761 = vmatpush1.bf16.msra.mxu1 %v8453_v50  ;;  %v6468_v9 = vpop.f32.mrf.mxu1  ;;  %v6429_v1 = vpop.f32.mrf.mxu0  ;;  %6792 = vmatprep.mubr.bf16.mxu1 %v9298_v29  ;;  %v378_v50 = vld [vmem:[#allocation5 + $0x868] sm:$0xff] }
 0x186   :  { %6762 = vmatprep.subr.bf16.mxu1 %v8446_v55  ;;  %v9375_v42 = vadd.f32 %v6468_v9, %v6428_v6  ;;  %v506_v55 = vld [vmem:[#allocation5 + $0xc68] sm:$0xff]  ;;  %v8278_v60 = vcombine.high %v374_v22, %v378_v50  ;;  %v8277_v10 = vcombine.low %v374_v22, %v378_v50 }
 0x187   :  { %v6470_v21 = vpop.f32.mrf.mxu1  ;;  %6722 = vmatpush1.bf16.msra.mxu0 %v8317_v0  ;;  %v6430_v24 = vpop.f32.mrf.mxu0  ;;  %v8406_v61 = vcombine.high %v502_v52, %v506_v55  ;;  %v366_v62 = vld [vmem:[#allocation5 + $0x808] sm:$0xff] }
 0x188   :  { %6723 = vmatprep.subr.bf16.mxu0 %v8310_v3  ;;  %v370_v7 = vld [vmem:[#allocation5 + $0x828] sm:$0xff]  ;;  %v8518_v21 = vcombine.high %v614_v12, %v618_v39 }
 0x189   :  { %6763 = vmatpush1.bf16.msra.mxu1 %v8445_v2  ;;  %v6471_v53 = vpop.f32.mrf.mxu1  ;;  %v494_v63 = vld [vmem:[#allocation5 + $0xc08] sm:$0xff]  ;;  %v8405_v2 = vcombine.low %v502_v52, %v506_v55  ;;  %v8270_v3 = vcombine.high %v366_v62, %v370_v7  ;;  %v8269_v1 = vcombine.low %v366_v62, %v370_v7 }
 0x18a   :  { %6764 = vmatprep.subr.bf16.mxu1 %v8438_v11  ;;  %v498_v0 = vld [vmem:[#allocation5 + $0xc28] sm:$0xff] }
 0x18b   :  { %6724 = vmatpush1.bf16.msra.mxu0 %v8309_v23  ;;  %v8398_v6 = vcombine.high %v494_v63, %v498_v0  ;;  %v486_v9 = vld [vmem:[#allocation5 + $0xbc8] sm:$0xff]  ;;  %v8397_v14 = vcombine.low %v494_v63, %v498_v0 }
 0x18c   :  { %6725 = vmatprep.subr.bf16.mxu0 %v8302_v25  ;;  %v490_v11 = vld [vmem:[#allocation5 + $0xbe8] sm:$0xff] }
 0x18d   :  { %6765 = vmatpush1.bf16.msra.mxu1 %v8437_v13  ;;  %v8390_v17 = vcombine.high %v486_v9, %v490_v11  ;;  %v478_v23 = vld [vmem:[#allocation5 + $0xb88] sm:$0xff]  ;;  %v8389_v53 = vcombine.low %v486_v9, %v490_v11 }
 0x18e   :  { %6766 = vmatprep.subr.bf16.mxu1 %v8430_v26  ;;  %v482_v24 = vld [vmem:[#allocation5 + $0xba8] sm:$0xff]  ;;  %v8517_v26 = vcombine.low %v614_v12, %v618_v39 }
 0x18f   :  { %6726 = vmatpush1.bf16.msra.mxu0 %v8301_v32  ;;  %v606_v13 = vld [vmem:[#allocation5 + $0xf88] sm:$0xff]  ;;  %v8382_v28 = vcombine.high %v478_v23, %v482_v24 }
 0x190   :  { %6727 = vmatprep.subr.bf16.mxu0 %v8294_v34  ;;  %v610_v25 = vld [vmem:[#allocation5 + $0xfa8] sm:$0xff]  ;;  %v8381_v34 = vcombine.low %v478_v23, %v482_v24 }
 0x191   :  { %6767 = vmatpush1.bf16.msra.mxu1 %v8429_v33  ;;  %v8510_v54 = vcombine.high %v606_v13, %v610_v25  ;;  %v470_v30 = vld [vmem:[#allocation5 + $0xb48] sm:$0xff] }
 0x192   :  { %6768 = vmatprep.subr.bf16.mxu1 %v8422_v35  ;;  %v474_v31 = vld [vmem:[#allocation5 + $0xb68] sm:$0xff]  ;;  %v8509_v35 = vcombine.low %v606_v13, %v610_v25 }
 0x193   :  { %6728 = vmatpush1.bf16.msra.mxu0 %v8293_v44  ;;  %v598_v32 = vld [vmem:[#allocation5 + $0xf48] sm:$0xff]  ;;  %v8374_v37 = vcombine.high %v470_v30, %v474_v31 }
 0x194   :  { %6729 = vmatprep.subr.bf16.mxu0 %v8286_v19  ;;  %v602_v33 = vld [vmem:[#allocation5 + $0xf68] sm:$0xff]  ;;  %v8373_v19 = vcombine.low %v470_v30, %v474_v31 }
 0x195   :  { %6769 = vmatpush1.bf16.msra.mxu1 %v8421_v45  ;;  %v8502_v38 = vcombine.high %v598_v32, %v602_v33  ;;  %v462_v41 = vld [vmem:[#allocation5 + $0xb08] sm:$0xff] }
 0x196   :  { %6770 = vmatprep.subr.bf16.mxu1 %v8414_v46  ;;  %v466_v43 = vld [vmem:[#allocation5 + $0xb28] sm:$0xff]  ;;  %v8501_v46 = vcombine.low %v598_v32, %v602_v33 }
 0x197   :  { %6730 = vmatpush1.bf16.msra.mxu0 %v8285_v56  ;;  %v590_v44 = vld [vmem:[#allocation5 + $0xf08] sm:$0xff]  ;;  %v8366_v22 = vcombine.high %v462_v41, %v466_v43 }
 0x198   :  { %6731 = vmatprep.subr.bf16.mxu0 %v8278_v60  ;;  %v594_v45 = vld [vmem:[#allocation5 + $0xf28] sm:$0xff]  ;;  %v8365_v60 = vcombine.low %v462_v41, %v466_v43 }
 0x199   :  { %6771 = vmatpush1.bf16.msra.mxu1 %v8413_v57  ;;  %v8494_v50 = vcombine.high %v590_v44, %v594_v45  ;;  %v454_v52 = vld [vmem:[#allocation5 + $0xac8] sm:$0xff] }
 0x19a   :  { %6772 = vmatprep.subr.bf16.mxu1 %v8406_v61  ;;  %v458_v55 = vld [vmem:[#allocation5 + $0xae8] sm:$0xff]  ;;  %v8493_v61 = vcombine.low %v590_v44, %v594_v45 }
 0x19b   :  { %6732 = vmatpush1.bf16.msra.mxu0 %v8277_v10  ;;  %v582_v56 = vld [vmem:[#allocation5 + $0xec8] sm:$0xff]  ;;  %v8358_v62 = vcombine.high %v454_v52, %v458_v55 }
 0x19c   :  { %6733 = vmatprep.subr.bf16.mxu0 %v8270_v3  ;;  %v586_v57 = vld [vmem:[#allocation5 + $0xee8] sm:$0xff]  ;;  %v8357_v3 = vcombine.low %v454_v52, %v458_v55 }
 0x19d   :  { %6773 = vmatpush1.bf16.msra.mxu1 %v8405_v2  ;;  %v8486_v7 = vcombine.high %v582_v56, %v586_v57  ;;  %v446_v63 = vld [vmem:[#allocation5 + $0xa88] sm:$0xff] }
 0x19e   :  { %6774 = vmatprep.subr.bf16.mxu1 %v8398_v6  ;;  %v450_v0 = vld [vmem:[#allocation5 + $0xaa8] sm:$0xff]  ;;  %v8485_v6 = vcombine.low %v582_v56, %v586_v57 }
 0x19f   :  { %6734 = vmatpush1.bf16.msra.mxu0 %v8269_v1  ;;  %v574_v10 = vld [vmem:[#allocation5 + $0xe88] sm:$0xff]  ;;  %v8350_v9 = vcombine.high %v446_v63, %v450_v0 }
 0x1a0   :  { %6735 = vmatprep.subr.bf16.mxu0 %v8390_v17  ;;  %v578_v2 = vld [vmem:[#allocation5 + $0xea8] sm:$0xff]  ;;  %v8349_v17 = vcombine.low %v446_v63, %v450_v0 }
 0x1a1   :  { %6775 = vmatpush1.bf16.msra.mxu1 %v8397_v14  ;;  %v8478_v11 = vcombine.high %v574_v10, %v578_v2  ;;  %v438_v12 = vld [vmem:[#allocation5 + $0xa48] sm:$0xff] }
 0x1a2   :  { %6776 = vmatprep.subr.bf16.mxu1 %v8518_v21  ;;  %v442_v39 = vld [vmem:[#allocation5 + $0xa68] sm:$0xff]  ;;  %v8477_v21 = vcombine.low %v574_v10, %v578_v2 }
 0x1a3   :  { %6736 = vmatpush2.bf16.msra.mxu0 %v8389_v53  ;;  %v566_v1 = vld [vmem:[#allocation5 + $0xe48] sm:$0xff]  ;;  %v8342_v23 = vcombine.high %v438_v12, %v442_v39 }
 0x1a4   :  { %6737 = vmatprep.subr.bf16.mxu0 %v8382_v28  ;;  %v570_v14 = vld [vmem:[#allocation5 + $0xe68] sm:$0xff]  ;;  %v8341_v28 = vcombine.low %v438_v12, %v442_v39 }
 0x1a5   :  { %6777 = vmatpush2.bf16.msra.mxu1 %v8517_v26  ;;  %v8470_v24 = vcombine.high %v566_v1, %v570_v14  ;;  %v430_v13 = vld [vmem:[#allocation5 + $0xa08] sm:$0xff] }
 0x1a6   :  { %6778 = vmatprep.subr.bf16.mxu1 %v8510_v54  ;;  %v434_v25 = vld [vmem:[#allocation5 + $0xa28] sm:$0xff]  ;;  %v8469_v54 = vcombine.low %v566_v1, %v570_v14 }
 0x1a7   :  { %6738 = vmatpush2.bf16.msra.mxu0 %v8381_v34  ;;  %v558_v53 = vld [vmem:[#allocation5 + $0xe08] sm:$0xff]  ;;  %v8334_v30 = vcombine.high %v430_v13, %v434_v25 }
 0x1a8   :  { %6739 = vmatprep.subr.bf16.mxu0 %v8374_v37  ;;  %v562_v26 = vld [vmem:[#allocation5 + $0xe28] sm:$0xff]  ;;  %v8333_v37 = vcombine.low %v430_v13, %v434_v25 }
 0x1a9   :  { %6779 = vmatpush2.bf16.msra.mxu1 %v8509_v35  ;;  %v8462_v31 = vcombine.high %v558_v53, %v562_v26  ;;  %v678_v32 = vld [vmem:[#allocation5 + $0x11c8] sm:$0xff] }
 0x1aa   :  { %6780 = vmatprep.subr.bf16.mxu1 %v8502_v38  ;;  %v682_v33 = vld [vmem:[#allocation5 + $0x11e8] sm:$0xff]  ;;  %v8461_v38 = vcombine.low %v558_v53, %v562_v26 }
 0x1ab   :  { %6740 = vmatpush2.bf16.msra.mxu0 %v8373_v19  ;;  %v806_v34 = vld [vmem:[#allocation5 + $0x15c8] sm:$0xff]  ;;  %v8582_v41 = vcombine.high %v678_v32, %v682_v33 }
 0x1ac   :  { %6741 = vmatprep.subr.bf16.mxu0 %v8366_v22  ;;  %v810_v35 = vld [vmem:[#allocation5 + $0x15e8] sm:$0xff]  ;;  %v8581_v22 = vcombine.low %v678_v32, %v682_v33 }
 0x1ad   :  { %6781 = vmatpush2.bf16.msra.mxu1 %v8501_v46  ;;  %v8710_v43 = vcombine.high %v806_v34, %v810_v35  ;;  %v670_v44 = vld [vmem:[#allocation5 + $0x1188] sm:$0xff] }
 0x1ae   :  { %6782 = vmatprep.subr.bf16.mxu1 %v8494_v50  ;;  %v674_v45 = vld [vmem:[#allocation5 + $0x11a8] sm:$0xff]  ;;  %v8709_v50 = vcombine.low %v806_v34, %v810_v35 }
 0x1af   :  { %6742 = vmatpush2.bf16.msra.mxu0 %v8365_v60  ;;  %v798_v19 = vld [vmem:[#allocation5 + $0x1588] sm:$0xff]  ;;  %v8574_v52 = vcombine.high %v670_v44, %v674_v45  ;;  %v8573_v0 = vcombine.low %v670_v44, %v674_v45 }
 0x1b0   :  { %6743 = vmatprep.subr.bf16.mxu0 %v8358_v62  ;;  %v802_v46 = vld [vmem:[#allocation5 + $0x15a8] sm:$0xff] }
 0x1b1   :  { %6783 = vmatpush2.bf16.msra.mxu1 %v8493_v61  ;;  %v8702_v55 = vcombine.high %v798_v19, %v802_v46  ;;  %v662_v56 = vld [vmem:[#allocation5 + $0x1148] sm:$0xff]  ;;  %v8701_v2 = vcombine.low %v798_v19, %v802_v46 }
 0x1b2   :  { %6784 = vmatprep.subr.bf16.mxu1 %v8486_v7  ;;  %v666_v57 = vld [vmem:[#allocation5 + $0x1168] sm:$0xff] }
 0x1b3   :  { %6744 = vmatpush2.bf16.msra.mxu0 %v8357_v3  ;;  %v790_v61 = vld [vmem:[#allocation5 + $0x1548] sm:$0xff]  ;;  %v8566_v3 = vcombine.high %v662_v56, %v666_v57 }
 0x1b4   :  { %6745 = vmatprep.subr.bf16.mxu0 %v8350_v9  ;;  %v794_v62 = vld [vmem:[#allocation5 + $0x1568] sm:$0xff] }
 0x1b5   :  { %6785 = vmatpush2.bf16.msra.mxu1 %v8485_v6  ;;  %v8694_v12 = vcombine.high %v790_v61, %v794_v62  ;;  %v654_v39 = vld [vmem:[#allocation5 + $0x1108] sm:$0xff] }
 0x1b6   :  { %6786 = vmatprep.subr.bf16.mxu1 %v8478_v11  ;;  %v658_v1 = vld [vmem:[#allocation5 + $0x1128] sm:$0xff] }
 0x1b7   :  { %6746 = vmatpush2.bf16.msra.mxu0 %v8349_v17  ;;  %v782_v14 = vld [vmem:[#allocation5 + $0x1508] sm:$0xff]  ;;  %v8558_v25 = vcombine.high %v654_v39, %v658_v1  ;;  %v8557_v32 = vcombine.low %v654_v39, %v658_v1 }
 0x1b8   :  { %6747 = vmatprep.subr.bf16.mxu0 %v8342_v23  ;;  %v786_v17 = vld [vmem:[#allocation5 + $0x1528] sm:$0xff] }
 0x1b9   :  { %6787 = vmatpush2.bf16.msra.mxu1 %v8477_v21  ;;  %v8686_v26 = vcombine.high %v782_v14, %v786_v17  ;;  %v8685_v33 = vcombine.low %v782_v14, %v786_v17  ;;  %v870_v39 = vld [vmem:[#allocation5 + $0x17c8] sm:$0xff] }
 0x1ba   :  { %6788 = vmatprep.subr.bf16.mxu1 %v8470_v24  ;;  %v8565_v24 = vcombine.low %v662_v56, %v666_v57  ;;  %v874_v1 = vld [vmem:[#allocation5 + $0x17e8] sm:$0xff] }
 0x1bb   :  { %6748 = vmatpush2.bf16.msra.mxu0 %v8341_v28  ;;  %v646_v28 = vld [vmem:[#allocation5 + $0x10c8] sm:$0xff] }
 0x1bc   :  { %6749 = vmatprep.subr.bf16.mxu0 %v8334_v30  ;;  %v774_v30 = vld [vmem:[#allocation5 + $0x14c8] sm:$0xff] }
 0x1bd   :  { %6789 = vmatpush2.bf16.msra.mxu1 %v8469_v54  ;;  %v650_v54 = vld [vmem:[#allocation5 + $0x10e8] sm:$0xff] }
 0x1be   :  { %6790 = vmatprep.subr.bf16.mxu1 %v8462_v31  ;;  %v778_v31 = vld [vmem:[#allocation5 + $0x14e8] sm:$0xff]  ;;  %v8550_v34 = vcombine.high %v646_v28, %v650_v54  ;;  %v8549_v44 = vcombine.low %v646_v28, %v650_v54 }
 0x1bf   :  { %6750 = vmatpush2.bf16.msra.mxu0 %v8333_v37  ;;  %v8678_v35 = vcombine.high %v774_v30, %v778_v31  ;;  %v638_v37 = vld [vmem:[#allocation5 + $0x1088] sm:$0xff]  ;;  %v8677_v45 = vcombine.low %v774_v30, %v778_v31 }
 0x1c0   :  { %6801 = vmatprep.subr.bf16.mxu0 %v8582_v41  ;;  %v766_v41 = vld [vmem:[#allocation5 + $0x1488] sm:$0xff] }
 0x1c1   :  { %6791 = vmatpush2.bf16.msra.mxu1 %v8461_v38  ;;  %v642_v38 = vld [vmem:[#allocation5 + $0x10a8] sm:$0xff] }
 0x1c2   :  { %6842 = vmatprep.subr.bf16.mxu1 %v8710_v43  ;;  %v6507_v60 = vpop.f32.mrf.mxu0  ;;  %6752 = vmatmul.mubr.bf16.vlgmr.msra.gmra.mxu0 %v9305_v36  ;;  %v770_v43 = vld [vmem:[#allocation5 + $0x14a8] sm:$0xff]  ;;  %v8542_v19 = vcombine.high %v638_v37, %v642_v38  ;;  %v8541_v56 = vcombine.low %v638_v37, %v642_v38 }
 0x1c3   :  { %v6508_v7 = vadd.f32 %v6507_v60, %v9370_v5  ;;  %6802 = vmatpush1.bf16.msra.mxu0 %v8581_v22  ;;  %6833 = vmatprep.mubr.bf16.mxu0 %v9317_v47  ;;  %v8670_v46 = vcombine.high %v766_v41, %v770_v43  ;;  %v630_v22 = vld [vmem:[#allocation5 + $0x1048] sm:$0xff]  ;;  %v8669_v57 = vcombine.low %v766_v41, %v770_v43 }
 0x1c4   :  { %v6548_v63 = vpop.f32.mrf.mxu1  ;;  %6793 = vmatmul.mubr.bf16.vlgmr.msra.gmra.mxu1 %v9311_v40  ;;  %v6509_v10 = vpop.f32.mrf.mxu0  ;;  %6803 = vmatprep.subr.bf16.mxu0 %v8574_v52  ;;  %v758_v52 = vld [vmem:[#allocation5 + $0x1448] sm:$0xff] }
 0x1c5   :  { %6843 = vmatpush1.bf16.msra.mxu1 %v8709_v50  ;;  %v9380_v6 = vadd.f32 %v6548_v63, %v6508_v7  ;;  %v6510_v9 = vadd.f32 %v6509_v10, %v9375_v42  ;;  %6874 = vmatprep.mubr.bf16.mxu1 %v9322_v49  ;;  %v8693_v42 = vcombine.low %v790_v61, %v794_v62  ;;  %v634_v50 = vld [vmem:[#allocation5 + $0x1068] sm:$0xff] }
 0x1c6   :  { %v6550_v11 = vpop.f32.mrf.mxu1  ;;  %6844 = vmatprep.subr.bf16.mxu1 %v8702_v55  ;;  %v6511_v5 = vpop.f32.mrf.mxu0  ;;  %v762_v55 = vld [vmem:[#allocation5 + $0x1468] sm:$0xff]  ;;  %v8534_v60 = vcombine.high %v630_v22, %v634_v50  ;;  %v8533_v10 = vcombine.low %v630_v22, %v634_v50 }
 0x1c7   :  { %v9385_v21 = vadd.f32 %v6550_v11, %v6510_v9  ;;  %6804 = vmatpush1.bf16.msra.mxu0 %v8573_v0  ;;  %v8662_v61 = vcombine.high %v758_v52, %v762_v55  ;;  %v622_v62 = vld [vmem:[#allocation5 + $0x1008] sm:$0xff] }
 0x1c8   :  { %v6552_v23 = vpop.f32.mrf.mxu1  ;;  %v6512_v13 = vpop.f32.mrf.mxu0  ;;  %6805 = vmatprep.subr.bf16.mxu0 %v8566_v3  ;;  %v626_v7 = vld [vmem:[#allocation5 + $0x1028] sm:$0xff] }
 0x1c9   :  { %6845 = vmatpush1.bf16.msra.mxu1 %v8701_v2  ;;  %v750_v63 = vld [vmem:[#allocation5 + $0x1408] sm:$0xff]  ;;  %v8661_v2 = vcombine.low %v758_v52, %v762_v55  ;;  %v8526_v3 = vcombine.high %v622_v62, %v626_v7  ;;  %v8525_v5 = vcombine.low %v622_v62, %v626_v7  ;;  %v8774_v23 = vcombine.high %v870_v39, %v874_v1 }
 0x1ca   :  { %v6553_v53 = vpop.f32.mrf.mxu1  ;;  %6846 = vmatprep.subr.bf16.mxu1 %v8694_v12  ;;  %v754_v0 = vld [vmem:[#allocation5 + $0x1428] sm:$0xff] }
 0x1cb   :  { %6806 = vmatpush1.bf16.msra.mxu0 %v8565_v24  ;;  %v8654_v9 = vcombine.high %v750_v63, %v754_v0  ;;  %v742_v11 = vld [vmem:[#allocation5 + $0x13c8] sm:$0xff]  ;;  %v8653_v14 = vcombine.low %v750_v63, %v754_v0 }
 0x1cc   :  { %6807 = vmatprep.subr.bf16.mxu0 %v8558_v25  ;;  %v746_v12 = vld [vmem:[#allocation5 + $0x13e8] sm:$0xff] }
 0x1cd   :  { %6847 = vmatpush1.bf16.msra.mxu1 %v8693_v42  ;;  %v8646_v17 = vcombine.high %v742_v11, %v746_v12  ;;  %v734_v24 = vld [vmem:[#allocation5 + $0x1388] sm:$0xff]  ;;  %v8645_v53 = vcombine.low %v742_v11, %v746_v12 }
 0x1ce   :  { %6848 = vmatprep.subr.bf16.mxu1 %v8686_v26  ;;  %v738_v13 = vld [vmem:[#allocation5 + $0x13a8] sm:$0xff]  ;;  %v8773_v26 = vcombine.low %v870_v39, %v874_v1 }
 0x1cf   :  { %6808 = vmatpush1.bf16.msra.mxu0 %v8557_v32  ;;  %v862_v42 = vld [vmem:[#allocation5 + $0x1788] sm:$0xff]  ;;  %v8638_v28 = vcombine.high %v734_v24, %v738_v13 }
 0x1d0   :  { %6809 = vmatprep.subr.bf16.mxu0 %v8550_v34  ;;  %v866_v25 = vld [vmem:[#allocation5 + $0x17a8] sm:$0xff]  ;;  %v8637_v34 = vcombine.low %v734_v24, %v738_v13 }
 0x1d1   :  { %6849 = vmatpush1.bf16.msra.mxu1 %v8685_v33  ;;  %v8766_v54 = vcombine.high %v862_v42, %v866_v25  ;;  %v726_v30 = vld [vmem:[#allocation5 + $0x1348] sm:$0xff] }
 0x1d2   :  { %6850 = vmatprep.subr.bf16.mxu1 %v8678_v35  ;;  %v730_v31 = vld [vmem:[#allocation5 + $0x1368] sm:$0xff]  ;;  %v8765_v35 = vcombine.low %v862_v42, %v866_v25 }
 0x1d3   :  { %6810 = vmatpush1.bf16.msra.mxu0 %v8549_v44  ;;  %v854_v32 = vld [vmem:[#allocation5 + $0x1748] sm:$0xff]  ;;  %v8630_v37 = vcombine.high %v726_v30, %v730_v31 }
 0x1d4   :  { %6811 = vmatprep.subr.bf16.mxu0 %v8542_v19  ;;  %v858_v33 = vld [vmem:[#allocation5 + $0x1768] sm:$0xff]  ;;  %v8629_v19 = vcombine.low %v726_v30, %v730_v31 }
 0x1d5   :  { %6851 = vmatpush1.bf16.msra.mxu1 %v8677_v45  ;;  %v8758_v38 = vcombine.high %v854_v32, %v858_v33  ;;  %v718_v41 = vld [vmem:[#allocation5 + $0x1308] sm:$0xff] }
 0x1d6   :  { %6852 = vmatprep.subr.bf16.mxu1 %v8670_v46  ;;  %v722_v43 = vld [vmem:[#allocation5 + $0x1328] sm:$0xff]  ;;  %v8757_v46 = vcombine.low %v854_v32, %v858_v33 }
 0x1d7   :  { %6812 = vmatpush1.bf16.msra.mxu0 %v8541_v56  ;;  %v846_v44 = vld [vmem:[#allocation5 + $0x1708] sm:$0xff]  ;;  %v8622_v22 = vcombine.high %v718_v41, %v722_v43 }
 0x1d8   :  { %6813 = vmatprep.subr.bf16.mxu0 %v8534_v60  ;;  %v850_v45 = vld [vmem:[#allocation5 + $0x1728] sm:$0xff]  ;;  %v8621_v60 = vcombine.low %v718_v41, %v722_v43 }
 0x1d9   :  { %6853 = vmatpush1.bf16.msra.mxu1 %v8669_v57  ;;  %v8750_v50 = vcombine.high %v846_v44, %v850_v45  ;;  %v710_v52 = vld [vmem:[#allocation5 + $0x12c8] sm:$0xff] }
 0x1da   :  { %6854 = vmatprep.subr.bf16.mxu1 %v8662_v61  ;;  %v714_v55 = vld [vmem:[#allocation5 + $0x12e8] sm:$0xff]  ;;  %v8749_v61 = vcombine.low %v846_v44, %v850_v45 }
 0x1db   :  { %6814 = vmatpush1.bf16.msra.mxu0 %v8533_v10  ;;  %v838_v56 = vld [vmem:[#allocation5 + $0x16c8] sm:$0xff]  ;;  %v8614_v62 = vcombine.high %v710_v52, %v714_v55 }
 0x1dc   :  { %6815 = vmatprep.subr.bf16.mxu0 %v8526_v3  ;;  %v842_v57 = vld [vmem:[#allocation5 + $0x16e8] sm:$0xff]  ;;  %v8613_v3 = vcombine.low %v710_v52, %v714_v55 }
 0x1dd   :  { %6855 = vmatpush1.bf16.msra.mxu1 %v8661_v2  ;;  %v8742_v7 = vcombine.high %v838_v56, %v842_v57  ;;  %v702_v63 = vld [vmem:[#allocation5 + $0x1288] sm:$0xff] }
 0x1de   :  { %6856 = vmatprep.subr.bf16.mxu1 %v8654_v9  ;;  %v706_v0 = vld [vmem:[#allocation5 + $0x12a8] sm:$0xff]  ;;  %v8741_v9 = vcombine.low %v838_v56, %v842_v57 }
 0x1df   :  { %6816 = vmatpush1.bf16.msra.mxu0 %v8525_v5  ;;  %v830_v10 = vld [vmem:[#allocation5 + $0x1688] sm:$0xff]  ;;  %v8606_v11 = vcombine.high %v702_v63, %v706_v0 }
 0x1e0   :  { %6817 = vmatprep.subr.bf16.mxu0 %v8646_v17  ;;  %v834_v2 = vld [vmem:[#allocation5 + $0x16a8] sm:$0xff]  ;;  %v8605_v17 = vcombine.low %v702_v63, %v706_v0 }
 0x1e1   :  { %6857 = vmatpush1.bf16.msra.mxu1 %v8653_v14  ;;  %v8734_v12 = vcombine.high %v830_v10, %v834_v2  ;;  %v694_v39 = vld [vmem:[#allocation5 + $0x1248] sm:$0xff] }
 0x1e2   :  { %6858 = vmatprep.subr.bf16.mxu1 %v8774_v23  ;;  %v698_v1 = vld [vmem:[#allocation5 + $0x1268] sm:$0xff]  ;;  %v8733_v23 = vcombine.low %v830_v10, %v834_v2 }
 0x1e3   :  { %6818 = vmatpush2.bf16.msra.mxu0 %v8645_v53  ;;  %v822_v5 = vld [vmem:[#allocation5 + $0x1648] sm:$0xff]  ;;  %v8598_v24 = vcombine.high %v694_v39, %v698_v1 }
 0x1e4   :  { %6819 = vmatprep.subr.bf16.mxu0 %v8638_v28  ;;  %v826_v14 = vld [vmem:[#allocation5 + $0x1668] sm:$0xff]  ;;  %v8597_v28 = vcombine.low %v694_v39, %v698_v1 }
 0x1e5   :  { %6859 = vmatpush2.bf16.msra.mxu1 %v8773_v26  ;;  %v8726_v13 = vcombine.high %v822_v5, %v826_v14  ;;  %v686_v42 = vld [vmem:[#allocation5 + $0x1208] sm:$0xff] }
 0x1e6   :  { %6860 = vmatprep.subr.bf16.mxu1 %v8766_v54  ;;  %v690_v25 = vld [vmem:[#allocation5 + $0x1228] sm:$0xff]  ;;  %v8725_v54 = vcombine.low %v822_v5, %v826_v14 }
 0x1e7   :  { %6820 = vmatpush2.bf16.msra.mxu0 %v8637_v34  ;;  %v814_v53 = vld [vmem:[#allocation5 + $0x1608] sm:$0xff]  ;;  %v8590_v30 = vcombine.high %v686_v42, %v690_v25 }
 0x1e8   :  { %6821 = vmatprep.subr.bf16.mxu0 %v8630_v37  ;;  %v818_v26 = vld [vmem:[#allocation5 + $0x1628] sm:$0xff]  ;;  %v8589_v37 = vcombine.low %v686_v42, %v690_v25 }
 0x1e9   :  { %6861 = vmatpush2.bf16.msra.mxu1 %v8765_v35  ;;  %v8718_v31 = vcombine.high %v814_v53, %v818_v26  ;;  %v934_v32 = vld [vmem:[#allocation5 + $0x19c8] sm:$0xff] }
 0x1ea   :  { %6862 = vmatprep.subr.bf16.mxu1 %v8758_v38  ;;  %v938_v33 = vld [vmem:[#allocation5 + $0x19e8] sm:$0xff]  ;;  %v8717_v38 = vcombine.low %v814_v53, %v818_v26 }
 0x1eb   :  { %6822 = vmatpush2.bf16.msra.mxu0 %v8629_v19  ;;  %v1062_v34 = vld [vmem:[#allocation5 + $0x1dc8] sm:$0xff]  ;;  %v8838_v41 = vcombine.high %v934_v32, %v938_v33 }
 0x1ec   :  { %6823 = vmatprep.subr.bf16.mxu0 %v8622_v22  ;;  %v1066_v35 = vld [vmem:[#allocation5 + $0x1de8] sm:$0xff]  ;;  %v8837_v22 = vcombine.low %v934_v32, %v938_v33 }
 0x1ed   :  { %6863 = vmatpush2.bf16.msra.mxu1 %v8757_v46  ;;  %v8966_v43 = vcombine.high %v1062_v34, %v1066_v35  ;;  %v926_v44 = vld [vmem:[#allocation5 + $0x1988] sm:$0xff] }
 0x1ee   :  { %6864 = vmatprep.subr.bf16.mxu1 %v8750_v50  ;;  %v930_v45 = vld [vmem:[#allocation5 + $0x19a8] sm:$0xff]  ;;  %v8965_v50 = vcombine.low %v1062_v34, %v1066_v35 }
 0x1ef   :  { %6824 = vmatpush2.bf16.msra.mxu0 %v8621_v60  ;;  %v1054_v19 = vld [vmem:[#allocation5 + $0x1d88] sm:$0xff]  ;;  %v8830_v52 = vcombine.high %v926_v44, %v930_v45  ;;  %v8829_v0 = vcombine.low %v926_v44, %v930_v45 }
 0x1f0   :  { %6825 = vmatprep.subr.bf16.mxu0 %v8614_v62  ;;  %v1058_v46 = vld [vmem:[#allocation5 + $0x1da8] sm:$0xff] }
 0x1f1   :  { %6865 = vmatpush2.bf16.msra.mxu1 %v8749_v61  ;;  %v8958_v55 = vcombine.high %v1054_v19, %v1058_v46  ;;  %v918_v56 = vld [vmem:[#allocation5 + $0x1948] sm:$0xff]  ;;  %v8957_v2 = vcombine.low %v1054_v19, %v1058_v46 }
 0x1f2   :  { %6866 = vmatprep.subr.bf16.mxu1 %v8742_v7  ;;  %v922_v57 = vld [vmem:[#allocation5 + $0x1968] sm:$0xff] }
 0x1f3   :  { %6826 = vmatpush2.bf16.msra.mxu0 %v8613_v3  ;;  %v1046_v61 = vld [vmem:[#allocation5 + $0x1d48] sm:$0xff]  ;;  %v8822_v3 = vcombine.high %v918_v56, %v922_v57 }
 0x1f4   :  { %6827 = vmatprep.subr.bf16.mxu0 %v8606_v11  ;;  %v1050_v62 = vld [vmem:[#allocation5 + $0x1d68] sm:$0xff] }
 0x1f5   :  { %6867 = vmatpush2.bf16.msra.mxu1 %v8741_v9  ;;  %v8950_v39 = vcombine.high %v1046_v61, %v1050_v62  ;;  %v910_v1 = vld [vmem:[#allocation5 + $0x1908] sm:$0xff] }
 0x1f6   :  { %6868 = vmatprep.subr.bf16.mxu1 %v8734_v12  ;;  %v914_v5 = vld [vmem:[#allocation5 + $0x1928] sm:$0xff] }
 0x1f7   :  { %6828 = vmatpush2.bf16.msra.mxu0 %v8605_v17  ;;  %v1038_v14 = vld [vmem:[#allocation5 + $0x1d08] sm:$0xff]  ;;  %v8814_v25 = vcombine.high %v910_v1, %v914_v5  ;;  %v8813_v32 = vcombine.low %v910_v1, %v914_v5 }
 0x1f8   :  { %6829 = vmatprep.subr.bf16.mxu0 %v8598_v24  ;;  %v1042_v17 = vld [vmem:[#allocation5 + $0x1d28] sm:$0xff] }
 0x1f9   :  { %6869 = vmatpush2.bf16.msra.mxu1 %v8733_v23  ;;  %v8942_v26 = vcombine.high %v1038_v14, %v1042_v17  ;;  %v8941_v33 = vcombine.low %v1038_v14, %v1042_v17  ;;  %v1126_v1 = vld [vmem:[#allocation5 + $0x1fc8] sm:$0xff] }
 0x1fa   :  { %6870 = vmatprep.subr.bf16.mxu1 %v8726_v13  ;;  %v8821_v13 = vcombine.low %v918_v56, %v922_v57  ;;  %v1130_v5 = vld [vmem:[#allocation5 + $0x1fe8] sm:$0xff] }
 0x1fb   :  { %6830 = vmatpush2.bf16.msra.mxu0 %v8597_v28  ;;  %v902_v28 = vld [vmem:[#allocation5 + $0x18c8] sm:$0xff] }
 0x1fc   :  { %6831 = vmatprep.subr.bf16.mxu0 %v8590_v30  ;;  %v1030_v30 = vld [vmem:[#allocation5 + $0x1cc8] sm:$0xff] }
 0x1fd   :  { %6871 = vmatpush2.bf16.msra.mxu1 %v8725_v54  ;;  %v906_v54 = vld [vmem:[#allocation5 + $0x18e8] sm:$0xff] }
 0x1fe   :  { %6872 = vmatprep.subr.bf16.mxu1 %v8718_v31  ;;  %v1034_v31 = vld [vmem:[#allocation5 + $0x1ce8] sm:$0xff]  ;;  %v8806_v34 = vcombine.high %v902_v28, %v906_v54  ;;  %v8805_v44 = vcombine.low %v902_v28, %v906_v54 }
 0x1ff   :  { %6832 = vmatpush2.bf16.msra.mxu0 %v8589_v37  ;;  %v8934_v35 = vcombine.high %v1030_v30, %v1034_v31  ;;  %v894_v37 = vld [vmem:[#allocation5 + $0x1888] sm:$0xff]  ;;  %v8933_v45 = vcombine.low %v1030_v30, %v1034_v31 }
 0x200   :  { %6883 = vmatprep.subr.bf16.mxu0 %v8838_v41  ;;  %v1022_v41 = vld [vmem:[#allocation5 + $0x1c88] sm:$0xff] }
 0x201   :  { %6873 = vmatpush2.bf16.msra.mxu1 %v8717_v38  ;;  %v898_v38 = vld [vmem:[#allocation5 + $0x18a8] sm:$0xff] }
 0x202   :  { %6924 = vmatprep.subr.bf16.mxu1 %v8966_v43  ;;  %v6589_v60 = vpop.f32.mrf.mxu0  ;;  %6834 = vmatmul.mubr.bf16.vlgmr.msra.gmra.mxu0 %v9329_v4  ;;  %v1026_v43 = vld [vmem:[#allocation5 + $0x1ca8] sm:$0xff]  ;;  %v8798_v19 = vcombine.high %v894_v37, %v898_v38  ;;  %v8797_v56 = vcombine.low %v894_v37, %v898_v38 }
 0x203   :  { %v6590_v7 = vadd.f32 %v6589_v60, %v9380_v6  ;;  %6884 = vmatpush1.bf16.msra.mxu0 %v8837_v22  ;;  %6915 = vmatprep.mubr.bf16.mxu0 %v9341_v15  ;;  %v8926_v46 = vcombine.high %v1022_v41, %v1026_v43  ;;  %v886_v22 = vld [vmem:[#allocation5 + $0x1848] sm:$0xff]  ;;  %v8925_v57 = vcombine.low %v1022_v41, %v1026_v43 }
 0x204   :  { %v6630_v63 = vpop.f32.mrf.mxu1  ;;  %6875 = vmatmul.mubr.bf16.vlgmr.msra.gmra.mxu1 %v9335_v8  ;;  %v6591_v10 = vpop.f32.mrf.mxu0  ;;  %6885 = vmatprep.subr.bf16.mxu0 %v8830_v52  ;;  %v1014_v52 = vld [vmem:[#allocation5 + $0x1c48] sm:$0xff] }
 0x205   :  { %6925 = vmatpush1.bf16.msra.mxu1 %v8965_v50  ;;  %v9390_v9 = vadd.f32 %v6630_v63, %v6590_v7  ;;  %v6592_v11 = vadd.f32 %v6591_v10, %v9385_v21  ;;  %6956 = vmatprep.mubr.bf16.mxu1 %v9346_v18  ;;  %v8949_v21 = vcombine.low %v1046_v61, %v1050_v62  ;;  %v890_v50 = vld [vmem:[#allocation5 + $0x1868] sm:$0xff] }
 0x206   :  { %v6632_v12 = vpop.f32.mrf.mxu1  ;;  %6926 = vmatprep.subr.bf16.mxu1 %v8958_v55  ;;  %v6593_v6 = vpop.f32.mrf.mxu0  ;;  %v1018_v55 = vld [vmem:[#allocation5 + $0x1c68] sm:$0xff]  ;;  %v8790_v60 = vcombine.high %v886_v22, %v890_v50  ;;  %v8789_v10 = vcombine.low %v886_v22, %v890_v50 }
 0x207   :  { %v9395_v23 = vadd.f32 %v6632_v12, %v6592_v11  ;;  %6886 = vmatpush1.bf16.msra.mxu0 %v8829_v0  ;;  %v8918_v61 = vcombine.high %v1014_v52, %v1018_v55  ;;  %v878_v62 = vld [vmem:[#allocation5 + $0x1808] sm:$0xff] }
 0x208   :  { %v6634_v24 = vpop.f32.mrf.mxu1  ;;  %v6594_v42 = vpop.f32.mrf.mxu0  ;;  %6887 = vmatprep.subr.bf16.mxu0 %v8822_v3  ;;  %v882_v7 = vld [vmem:[#allocation5 + $0x1828] sm:$0xff] }
 0x209   :  { %6927 = vmatpush1.bf16.msra.mxu1 %v8957_v2  ;;  %v1006_v63 = vld [vmem:[#allocation5 + $0x1c08] sm:$0xff]  ;;  %v8917_v2 = vcombine.low %v1014_v52, %v1018_v55  ;;  %v8782_v3 = vcombine.high %v878_v62, %v882_v7  ;;  %v8781_v6 = vcombine.low %v878_v62, %v882_v7  ;;  %v9030_v24 = vcombine.high %v1126_v1, %v1130_v5 }
 0x20a   :  { %v6635_v53 = vpop.f32.mrf.mxu1  ;;  %6928 = vmatprep.subr.bf16.mxu1 %v8950_v39  ;;  %v1010_v0 = vld [vmem:[#allocation5 + $0x1c28] sm:$0xff] }
 0x20b   :  { %6888 = vmatpush1.bf16.msra.mxu0 %v8821_v13  ;;  %v8910_v11 = vcombine.high %v1006_v63, %v1010_v0  ;;  %v998_v12 = vld [vmem:[#allocation5 + $0x1bc8] sm:$0xff]  ;;  %v8909_v14 = vcombine.low %v1006_v63, %v1010_v0 }
 0x20c   :  { %6889 = vmatprep.subr.bf16.mxu0 %v8814_v25  ;;  %v1002_v39 = vld [vmem:[#allocation5 + $0x1be8] sm:$0xff] }
 0x20d   :  { %6929 = vmatpush1.bf16.msra.mxu1 %v8949_v21  ;;  %v8902_v17 = vcombine.high %v998_v12, %v1002_v39  ;;  %v990_v13 = vld [vmem:[#allocation5 + $0x1b88] sm:$0xff]  ;;  %v8901_v53 = vcombine.low %v998_v12, %v1002_v39 }
 0x20e   :  { %6930 = vmatprep.subr.bf16.mxu1 %v8942_v26  ;;  %v994_v42 = vld [vmem:[#allocation5 + $0x1ba8] sm:$0xff]  ;;  %v9029_v26 = vcombine.low %v1126_v1, %v1130_v5 }
 0x20f   :  { %6890 = vmatpush1.bf16.msra.mxu0 %v8813_v32  ;;  %v1118_v21 = vld [vmem:[#allocation5 + $0x1f88] sm:$0xff]  ;;  %v8894_v28 = vcombine.high %v990_v13, %v994_v42 }
 0x210   :  { %6891 = vmatprep.subr.bf16.mxu0 %v8806_v34  ;;  %v1122_v25 = vld [vmem:[#allocation5 + $0x1fa8] sm:$0xff]  ;;  %v8893_v34 = vcombine.low %v990_v13, %v994_v42 }
 0x211   :  { %6931 = vmatpush1.bf16.msra.mxu1 %v8941_v33  ;;  %v9022_v54 = vcombine.high %v1118_v21, %v1122_v25  ;;  %v982_v30 = vld [vmem:[#allocation5 + $0x1b48] sm:$0xff] }
 0x212   :  { %6932 = vmatprep.subr.bf16.mxu1 %v8934_v35  ;;  %v986_v31 = vld [vmem:[#allocation5 + $0x1b68] sm:$0xff]  ;;  %v9021_v35 = vcombine.low %v1118_v21, %v1122_v25 }
 0x213   :  { %6892 = vmatpush1.bf16.msra.mxu0 %v8805_v44  ;;  %v1110_v32 = vld [vmem:[#allocation5 + $0x1f48] sm:$0xff]  ;;  %v8886_v37 = vcombine.high %v982_v30, %v986_v31 }
 0x214   :  { %6893 = vmatprep.subr.bf16.mxu0 %v8798_v19  ;;  %v1114_v33 = vld [vmem:[#allocation5 + $0x1f68] sm:$0xff]  ;;  %v8885_v19 = vcombine.low %v982_v30, %v986_v31 }
 0x215   :  { %6933 = vmatpush1.bf16.msra.mxu1 %v8933_v45  ;;  %v9014_v38 = vcombine.high %v1110_v32, %v1114_v33  ;;  %v974_v41 = vld [vmem:[#allocation5 + $0x1b08] sm:$0xff] }
 0x216   :  { %6934 = vmatprep.subr.bf16.mxu1 %v8926_v46  ;;  %v978_v43 = vld [vmem:[#allocation5 + $0x1b28] sm:$0xff]  ;;  %v9013_v46 = vcombine.low %v1110_v32, %v1114_v33  ;;  %v167_v32 = vld [vmem:[#allocation5 + $0x1d0] sm:$0xff] }
 0x217   :  { %6894 = vmatpush1.bf16.msra.mxu0 %v8797_v56  ;;  %v1102_v44 = vld [vmem:[#allocation5 + $0x1f08] sm:$0xff]  ;;  %v8878_v22 = vcombine.high %v974_v41, %v978_v43  ;;  %v171_v33 = vld [vmem:[#allocation5 + $0x1f0] sm:$0xff] }
 0x218   :  { %6895 = vmatprep.subr.bf16.mxu0 %v8790_v60  ;;  %v1106_v45 = vld [vmem:[#allocation5 + $0x1f28] sm:$0xff]  ;;  %v8877_v60 = vcombine.low %v974_v41, %v978_v43  ;;  %v8072_v41 = vcombine.high %v167_v32, %v171_v33 }
 0x219   :  { %6935 = vmatpush1.bf16.msra.mxu1 %v8925_v57  ;;  %v9006_v50 = vcombine.high %v1102_v44, %v1106_v45  ;;  %v966_v52 = vld [vmem:[#allocation5 + $0x1ac8] sm:$0xff] }
 0x21a   :  { %6936 = vmatprep.subr.bf16.mxu1 %v8918_v61  ;;  %v970_v55 = vld [vmem:[#allocation5 + $0x1ae8] sm:$0xff]  ;;  %v9005_v61 = vcombine.low %v1102_v44, %v1106_v45  ;;  %v159_v44 = vld [vmem:[#allocation5 + $0x190] sm:$0xff] }
 0x21b   :  { %6896 = vmatpush1.bf16.msra.mxu0 %v8789_v10  ;;  %v1094_v56 = vld [vmem:[#allocation5 + $0x1ec8] sm:$0xff]  ;;  %v8870_v62 = vcombine.high %v966_v52, %v970_v55  ;;  %v163_v45 = vld [vmem:[#allocation5 + $0x1b0] sm:$0xff] }
 0x21c   :  { %6897 = vmatprep.subr.bf16.mxu0 %v8782_v3  ;;  %v1098_v57 = vld [vmem:[#allocation5 + $0x1ee8] sm:$0xff]  ;;  %v8869_v3 = vcombine.low %v966_v52, %v970_v55  ;;  %v8064_v52 = vcombine.high %v159_v44, %v163_v45 }
 0x21d   :  { %6937 = vmatpush1.bf16.msra.mxu1 %v8917_v2  ;;  %v8998_v7 = vcombine.high %v1094_v56, %v1098_v57  ;;  %v958_v63 = vld [vmem:[#allocation5 + $0x1a88] sm:$0xff] }
 0x21e   :  { %6938 = vmatprep.subr.bf16.mxu1 %v8910_v11  ;;  %v962_v0 = vld [vmem:[#allocation5 + $0x1aa8] sm:$0xff]  ;;  %v8997_v11 = vcombine.low %v1094_v56, %v1098_v57  ;;  %v151_v56 = vld [vmem:[#allocation5 + $0x150] sm:$0xff] }
 0x21f   :  { %6898 = vmatpush1.bf16.msra.mxu0 %v8781_v6  ;;  %v1086_v10 = vld [vmem:[#allocation5 + $0x1e88] sm:$0xff]  ;;  %v8862_v12 = vcombine.high %v958_v63, %v962_v0  ;;  %v155_v57 = vld [vmem:[#allocation5 + $0x170] sm:$0xff] }
 0x220   :  { %6899 = vmatprep.subr.bf16.mxu0 %v8902_v17  ;;  %v1090_v2 = vld [vmem:[#allocation5 + $0x1ea8] sm:$0xff]  ;;  %v8861_v17 = vcombine.low %v958_v63, %v962_v0  ;;  %v8063_v63 = vcombine.low %v159_v44, %v163_v45 }
 0x221   :  { %6939 = vmatpush1.bf16.msra.mxu1 %v8909_v14  ;;  %v8990_v39 = vcombine.high %v1086_v10, %v1090_v2  ;;  %v950_v1 = vld [vmem:[#allocation5 + $0x1a48] sm:$0xff] }
 0x222   :  { %6940 = vmatprep.subr.bf16.mxu1 %v9030_v24  ;;  %v954_v5 = vld [vmem:[#allocation5 + $0x1a68] sm:$0xff]  ;;  %v8989_v24 = vcombine.low %v1086_v10, %v1090_v2 }
 0x223   :  { %6900 = vmatpush2.bf16.msra.mxu0 %v8901_v53  ;;  %v1078_v6 = vld [vmem:[#allocation5 + $0x1e48] sm:$0xff]  ;;  %v8854_v13 = vcombine.high %v950_v1, %v954_v5 }
 0x224   :  { %6901 = vmatprep.subr.bf16.mxu0 %v8894_v28  ;;  %v1082_v14 = vld [vmem:[#allocation5 + $0x1e68] sm:$0xff]  ;;  %v8853_v28 = vcombine.low %v950_v1, %v954_v5  ;;  %v147_v1 = vld [vmem:[#allocation5 + $0x130] sm:$0xff] }
 0x225   :  { %6941 = vmatpush2.bf16.msra.mxu1 %v9029_v26  ;;  %v8982_v42 = vcombine.high %v1078_v6, %v1082_v14  ;;  %v942_v21 = vld [vmem:[#allocation5 + $0x1a08] sm:$0xff] }
 0x226   :  { %6942 = vmatprep.subr.bf16.mxu1 %v9022_v54  ;;  %v946_v25 = vld [vmem:[#allocation5 + $0x1a28] sm:$0xff]  ;;  %v8981_v54 = vcombine.low %v1078_v6, %v1082_v14  ;;  %v271_v14 = vld [vmem:[#allocation5 + $0x510] sm:$0xff] }
 0x227   :  { %6902 = vmatpush2.bf16.msra.mxu0 %v8893_v34  ;;  %v1070_v53 = vld [vmem:[#allocation5 + $0x1e08] sm:$0xff]  ;;  %v8846_v30 = vcombine.high %v942_v21, %v946_v25  ;;  %v295_v34 = vld [vmem:[#allocation5 + $0x5d0] sm:$0xff] }
 0x228   :  { %6903 = vmatprep.subr.bf16.mxu0 %v8886_v37  ;;  %v1074_v26 = vld [vmem:[#allocation5 + $0x1e28] sm:$0xff]  ;;  %v8845_v37 = vcombine.low %v942_v21, %v946_v25 }
 0x229   :  { %6943 = vmatpush2.bf16.msra.mxu1 %v9021_v35  ;;  %v8974_v31 = vcombine.high %v1070_v53, %v1074_v26  ;;  %v299_v35 = vld [vmem:[#allocation5 + $0x5f0] sm:$0xff] }
 0x22a   :  { %6944 = vmatprep.subr.bf16.mxu1 %v9014_v38  ;;  %v8973_v38 = vcombine.low %v1070_v53, %v1074_v26  ;;  %v8200_v43 = vcombine.high %v295_v34, %v299_v35 }
 0x22b   :  { %6904 = vmatpush2.bf16.msra.mxu0 %v8885_v19  ;;  %v287_v19 = vld [vmem:[#allocation5 + $0x590] sm:$0xff] }
 0x22c   :  { %6905 = vmatprep.subr.bf16.mxu0 %v8878_v22  ;;  %v8071_v22 = vcombine.low %v167_v32, %v171_v33 }
 0x22d   :  { %6945 = vmatpush2.bf16.msra.mxu1 %v9013_v46  ;;  %v291_v46 = vld [vmem:[#allocation5 + $0x5b0] sm:$0xff] }
 0x22e   :  { %6946 = vmatprep.subr.bf16.mxu1 %v9006_v50  ;;  %v8199_v50 = vcombine.low %v295_v34, %v299_v35  ;;  %v8192_v55 = vcombine.high %v287_v19, %v291_v46  ;;  %v8191_v2 = vcombine.low %v287_v19, %v291_v46 }
 0x22f   :  { %6906 = vmatpush2.bf16.msra.mxu0 %v8877_v60 }
 0x230   :  { %6907 = vmatprep.subr.bf16.mxu0 %v8870_v62  ;;  %v283_v62 = vld [vmem:[#allocation5 + $0x570] sm:$0xff] }
 0x231   :  { %6947 = vmatpush2.bf16.msra.mxu1 %v9005_v61  ;;  %v279_v61 = vld [vmem:[#allocation5 + $0x550] sm:$0xff] }
 0x232   :  { %6948 = vmatprep.subr.bf16.mxu1 %v8998_v7  ;;  %v8183_v21 = vcombine.low %v279_v61, %v283_v62 }
 0x233   :  { %6908 = vmatpush2.bf16.msra.mxu0 %v8869_v3  ;;  %v8056_v3 = vcombine.high %v151_v56, %v155_v57 }
 0x234   :  { %6909 = vmatprep.subr.bf16.mxu0 %v8862_v12  ;;  %v8184_v12 = vcombine.high %v279_v61, %v283_v62  ;;  %v111_v62 = vld [vmem:[#allocation5 + $0x10] sm:$0xff] }
 0x235   :  { %6949 = vmatpush2.bf16.msra.mxu1 %v8997_v11 }
 0x236   :  { %6950 = vmatprep.subr.bf16.mxu1 %v8990_v39  ;;  %v143_v39 = vld [vmem:[#allocation5 + $0x110] sm:$0xff] }
 0x237   :  { %6910 = vmatpush2.bf16.msra.mxu0 %v8861_v17  ;;  %v275_v17 = vld [vmem:[#allocation5 + $0x530] sm:$0xff]  ;;  %v8048_v25 = vcombine.high %v143_v39, %v147_v1  ;;  %v8047_v32 = vcombine.low %v143_v39, %v147_v1 }
 0x238   :  { %6911 = vmatprep.subr.bf16.mxu0 %v8854_v13  ;;  %v8055_v13 = vcombine.low %v151_v56, %v155_v57  ;;  %v8176_v26 = vcombine.high %v271_v14, %v275_v17  ;;  %v8175_v33 = vcombine.low %v271_v14, %v275_v17  ;;  %v231_v39 = vld [vmem:[#allocation5 + $0x3d0] sm:$0xff] }
 0x239   :  { %6951 = vmatpush2.bf16.msra.mxu1 %v8989_v24  ;;  %v235_v1 = vld [vmem:[#allocation5 + $0x3f0] sm:$0xff] }
 0x23a   :  { %6952 = vmatprep.subr.bf16.mxu1 %v8982_v42  ;;  %v363_v14 = vld [vmem:[#allocation5 + $0x7f0] sm:$0xff] }
 0x23b   :  { %6912 = vmatpush2.bf16.msra.mxu0 %v8853_v28  ;;  %v135_v28 = vld [vmem:[#allocation5 + $0xd0] sm:$0xff] }
 0x23c   :  { %6913 = vmatprep.subr.bf16.mxu0 %v8846_v30  ;;  %v263_v30 = vld [vmem:[#allocation5 + $0x4d0] sm:$0xff] }
 0x23d   :  { %6953 = vmatpush2.bf16.msra.mxu1 %v8981_v54  ;;  %v139_v54 = vld [vmem:[#allocation5 + $0xf0] sm:$0xff] }
 0x23e   :  { %6954 = vmatprep.subr.bf16.mxu1 %v8974_v31  ;;  %v267_v31 = vld [vmem:[#allocation5 + $0x4f0] sm:$0xff]  ;;  %v8040_v34 = vcombine.high %v135_v28, %v139_v54  ;;  %v8039_v44 = vcombine.low %v135_v28, %v139_v54  ;;  %v8135_v28 = vcombine.low %v231_v39, %v235_v1 }
 0x23f   :  { %6914 = vmatpush2.bf16.msra.mxu0 %v8845_v37  ;;  %v8168_v35 = vcombine.high %v263_v30, %v267_v31  ;;  %v127_v37 = vld [vmem:[#allocation5 + $0x90] sm:$0xff]  ;;  %v8167_v45 = vcombine.low %v263_v30, %v267_v31 }
 0x240   :  { %6965 = vmatprep.subr.bf16.mxu0 %v8072_v41  ;;  %v255_v41 = vld [vmem:[#allocation5 + $0x490] sm:$0xff] }
 0x241   :  { %6955 = vmatpush2.bf16.msra.mxu1 %v8973_v38  ;;  %v131_v38 = vld [vmem:[#allocation5 + $0xb0] sm:$0xff] }
 0x242   :  { %7006 = vmatprep.subr.bf16.mxu1 %v8200_v43  ;;  %v6671_v60 = vpop.f32.mrf.mxu0  ;;  %6916 = vmatmul.mubr.bf16.vlgmr.msra.gmra.mxu0 %v9353_v48  ;;  %v259_v43 = vld [vmem:[#allocation5 + $0x4b0] sm:$0xff]  ;;  %v8032_v19 = vcombine.high %v127_v37, %v131_v38  ;;  %v8031_v56 = vcombine.low %v127_v37, %v131_v38 }
 0x243   :  { %6966 = vmatpush1.bf16.msra.mxu0 %v8071_v22  ;;  %6997 = vmatprep.mubr.bf16.mxu0 %v9271_v58  ;;  %v8160_v46 = vcombine.high %v255_v41, %v259_v43  ;;  %v119_v22 = vld [vmem:[#allocation5 + $0x50] sm:$0xff]  ;;  %v8159_v57 = vcombine.low %v255_v41, %v259_v43 }
 0x244   :  { %v6712_v7 = vpop.f32.mrf.mxu1  ;;  %6957 = vmatmul.mubr.bf16.vlgmr.msra.gmra.mxu1 %v9357_v51  ;;  %v6673_v10 = vpop.f32.mrf.mxu0  ;;  %6967 = vmatprep.subr.bf16.mxu0 %v8064_v52  ;;  %v247_v52 = vld [vmem:[#allocation5 + $0x450] sm:$0xff] }
 0x245   :  { %v9399_v0 = vadd.f32 %v6712_v7, %v6671_v60  ;;  %7007 = vmatpush1.bf16.msra.mxu1 %v8199_v50  ;;  %7038 = vmatprep.mubr.bf16.mxu1 %v9275_v59  ;;  %v123_v50 = vld [vmem:[#allocation5 + $0x70] sm:$0xff] }
 0x246   :  { %v6714_v11 = vpop.f32.mrf.mxu1  ;;  %7008 = vmatprep.subr.bf16.mxu1 %v8192_v55  ;;  %v6675_v6 = vpop.f32.mrf.mxu0  ;;  %v251_v55 = vld [vmem:[#allocation5 + $0x470] sm:$0xff]  ;;  %v8024_v60 = vcombine.high %v119_v22, %v123_v50 }
 0x247   :  { %v9402_v5 = vadd.f32 %v6714_v11, %v6673_v10  ;;  %6968 = vmatpush1.bf16.msra.mxu0 %v8063_v63  ;;  %v8152_v61 = vcombine.high %v247_v52, %v251_v55  ;;  %v115_v7 = vld [vmem:[#allocation5 + $0x30] sm:$0xff] }
 0x248   :  { %v6716_v24 = vpop.f32.mrf.mxu1  ;;  %v6676_v42 = vpop.f32.mrf.mxu0  ;;  %6969 = vmatprep.subr.bf16.mxu0 %v8056_v3  ;;  %v239_v63 = vld [vmem:[#allocation5 + $0x410] sm:$0xff]  ;;  %v8151_v3 = vcombine.low %v247_v52, %v251_v55  ;;  %v8016_v11 = vcombine.high %v111_v62, %v115_v7  ;;  %v8015_v17 = vcombine.low %v111_v62, %v115_v7 }
 0x249   :  { %7009 = vmatpush1.bf16.msra.mxu1 %v8191_v2  ;;  %v243_v10 = vld [vmem:[#allocation5 + $0x430] sm:$0xff]  ;;  %v8023_v2 = vcombine.low %v119_v22, %v123_v50 }
 0x24a   :  { %v6717_v53 = vpop.f32.mrf.mxu1  ;;  %7010 = vmatprep.subr.bf16.mxu1 %v8184_v12  ;;  %v8144_v12 = vcombine.high %v239_v63, %v243_v10  ;;  %v359_v6 = vld [vmem:[#allocation5 + $0x7d0] sm:$0xff]  ;;  %v8143_v24 = vcombine.low %v239_v63, %v243_v10 }
 0x24b   :  { %6970 = vmatpush1.bf16.msra.mxu0 %v8055_v13  ;;  %v8136_v13 = vcombine.high %v231_v39, %v235_v1  ;;  %v8264_v42 = vcombine.high %v359_v6, %v363_v14  ;;  %v351_v53 = vld [vmem:[#allocation5 + $0x790] sm:$0xff]  ;;  %v8263_v54 = vcombine.low %v359_v6, %v363_v14 }
 0x24c   :  { %6971 = vmatprep.subr.bf16.mxu0 %v8048_v25  ;;  %v227_v25 = vld [vmem:[#allocation5 + $0x3b0] sm:$0xff] }
 0x24d   :  { %7011 = vmatpush1.bf16.msra.mxu1 %v8183_v21  ;;  %v223_v21 = vld [vmem:[#allocation5 + $0x390] sm:$0xff] }
 0x24e   :  { %7012 = vmatprep.subr.bf16.mxu1 %v8176_v26  ;;  %v355_v26 = vld [vmem:[#allocation5 + $0x7b0] sm:$0xff]  ;;  %v8128_v30 = vcombine.high %v223_v21, %v227_v25  ;;  %v8127_v37 = vcombine.low %v223_v21, %v227_v25 }
 0x24f   :  { %6972 = vmatpush1.bf16.msra.mxu0 %v8047_v32  ;;  %v8256_v31 = vcombine.high %v351_v53, %v355_v26  ;;  %v215_v32 = vld [vmem:[#allocation5 + $0x350] sm:$0xff]  ;;  %v8255_v38 = vcombine.low %v351_v53, %v355_v26 }
 0x250   :  { %6973 = vmatprep.subr.bf16.mxu0 %v8040_v34  ;;  %v343_v34 = vld [vmem:[#allocation5 + $0x750] sm:$0xff] }
 0x251   :  { %7013 = vmatpush1.bf16.msra.mxu1 %v8175_v33  ;;  %v219_v33 = vld [vmem:[#allocation5 + $0x370] sm:$0xff] }
 0x252   :  { %7014 = vmatprep.subr.bf16.mxu1 %v8168_v35  ;;  %v347_v35 = vld [vmem:[#allocation5 + $0x770] sm:$0xff]  ;;  %v8120_v41 = vcombine.high %v215_v32, %v219_v33  ;;  %v8119_v22 = vcombine.low %v215_v32, %v219_v33 }
 0x253   :  { %6974 = vmatpush1.bf16.msra.mxu0 %v8039_v44  ;;  %v8248_v43 = vcombine.high %v343_v34, %v347_v35  ;;  %v207_v44 = vld [vmem:[#allocation5 + $0x310] sm:$0xff]  ;;  %v8247_v50 = vcombine.low %v343_v34, %v347_v35 }
 0x254   :  { %6975 = vmatprep.subr.bf16.mxu0 %v8032_v19  ;;  %v335_v19 = vld [vmem:[#allocation5 + $0x710] sm:$0xff] }
 0x255   :  { %7015 = vmatpush1.bf16.msra.mxu1 %v8167_v45  ;;  %v211_v45 = vld [vmem:[#allocation5 + $0x330] sm:$0xff] }
 0x256   :  { %7016 = vmatprep.subr.bf16.mxu1 %v8160_v46  ;;  %v339_v46 = vld [vmem:[#allocation5 + $0x730] sm:$0xff]  ;;  %v8112_v52 = vcombine.high %v207_v44, %v211_v45  ;;  %v8111_v62 = vcombine.low %v207_v44, %v211_v45 }
 0x257   :  { %6976 = vmatpush1.bf16.msra.mxu0 %v8031_v56  ;;  %v8240_v55 = vcombine.high %v335_v19, %v339_v46  ;;  %v199_v56 = vld [vmem:[#allocation5 + $0x2d0] sm:$0xff]  ;;  %v8239_v7 = vcombine.low %v335_v19, %v339_v46 }
 0x258   :  { %6977 = vmatprep.subr.bf16.mxu0 %v8024_v60  ;;  %v327_v60 = vld [vmem:[#allocation5 + $0x6d0] sm:$0xff] }
 0x259   :  { %7017 = vmatpush1.bf16.msra.mxu1 %v8159_v57  ;;  %v203_v57 = vld [vmem:[#allocation5 + $0x2f0] sm:$0xff] }
 0x25a   :  { %7018 = vmatprep.subr.bf16.mxu1 %v8152_v61  ;;  %v331_v61 = vld [vmem:[#allocation5 + $0x6f0] sm:$0xff]  ;;  %v8104_v63 = vcombine.high %v199_v56, %v203_v57  ;;  %v8103_v39 = vcombine.low %v199_v56, %v203_v57 }
 0x25b   :  { %6978 = vmatpush1.bf16.msra.mxu0 %v8023_v2  ;;  %v8232_v10 = vcombine.high %v327_v60, %v331_v61  ;;  %v191_v2 = vld [vmem:[#allocation5 + $0x290] sm:$0xff]  ;;  %v8231_v1 = vcombine.low %v327_v60, %v331_v61 }
 0x25c   :  { %6979 = vmatprep.subr.bf16.mxu0 %v8016_v11  ;;  %v319_v11 = vld [vmem:[#allocation5 + $0x690] sm:$0xff] }
 0x25d   :  { %7019 = vmatpush1.bf16.msra.mxu1 %v8151_v3  ;;  %v195_v3 = vld [vmem:[#allocation5 + $0x2b0] sm:$0xff] }
 0x25e   :  { %7020 = vmatprep.subr.bf16.mxu1 %v8144_v12  ;;  %v323_v12 = vld [vmem:[#allocation5 + $0x6b0] sm:$0xff]  ;;  %v8096_v6 = vcombine.high %v191_v2, %v195_v3  ;;  %v8095_v21 = vcombine.low %v191_v2, %v195_v3 }
 0x25f   :  { %6980 = vmatpush1.bf16.msra.mxu0 %v8015_v17  ;;  %v8224_v14 = vcombine.high %v319_v11, %v323_v12  ;;  %v183_v17 = vld [vmem:[#allocation5 + $0x250] sm:$0xff]  ;;  %v8223_v25 = vcombine.low %v319_v11, %v323_v12 }
 0x260   :  { %6981 = vmatprep.subr.bf16.mxu0 %v8136_v13  ;;  %v311_v13 = vld [vmem:[#allocation5 + $0x650] sm:$0xff] }
 0x261   :  { %7021 = vmatpush1.bf16.msra.mxu1 %v8143_v24  ;;  %v187_v24 = vld [vmem:[#allocation5 + $0x270] sm:$0xff] }
 0x262   :  { %7022 = vmatprep.subr.bf16.mxu1 %v8264_v42  ;;  %v315_v42 = vld [vmem:[#allocation5 + $0x670] sm:$0xff]  ;;  %v8088_v53 = vcombine.high %v183_v17, %v187_v24  ;;  %v8087_v32 = vcombine.low %v183_v17, %v187_v24 }
 0x263   :  { %6982 = vmatpush2.bf16.msra.mxu0 %v8135_v28  ;;  %v8216_v26 = vcombine.high %v311_v13, %v315_v42  ;;  %v175_v28 = vld [vmem:[#allocation5 + $0x210] sm:$0xff]  ;;  %v8215_v33 = vcombine.low %v311_v13, %v315_v42 }
 0x264   :  { %6983 = vmatprep.subr.bf16.mxu0 %v8128_v30  ;;  %v303_v30 = vld [vmem:[#allocation5 + $0x610] sm:$0xff] }
 0x265   :  { %7023 = vmatpush2.bf16.msra.mxu1 %v8263_v54  ;;  %v179_v54 = vld [vmem:[#allocation5 + $0x230] sm:$0xff] }
 0x266   :  { %7024 = vmatprep.subr.bf16.mxu1 %v8256_v31  ;;  %v307_v31 = vld [vmem:[#allocation5 + $0x630] sm:$0xff]  ;;  %v8080_v34 = vcombine.high %v175_v28, %v179_v54  ;;  %v8079_v44 = vcombine.low %v175_v28, %v179_v54 }
 0x267   :  { %6984 = vmatpush2.bf16.msra.mxu0 %v8127_v37  ;;  %v8208_v35 = vcombine.high %v303_v30, %v307_v31  ;;  %v423_v37 = vld [vmem:[#allocation5 + $0x9d0] sm:$0xff]  ;;  %v8207_v45 = vcombine.low %v303_v30, %v307_v31 }
 0x268   :  { %6985 = vmatprep.subr.bf16.mxu0 %v8120_v41  ;;  %v551_v41 = vld [vmem:[#allocation5 + $0xdd0] sm:$0xff] }
 0x269   :  { %7025 = vmatpush2.bf16.msra.mxu1 %v8255_v38  ;;  %v427_v38 = vld [vmem:[#allocation5 + $0x9f0] sm:$0xff] }
 0x26a   :  { %7026 = vmatprep.subr.bf16.mxu1 %v8248_v43  ;;  %v555_v43 = vld [vmem:[#allocation5 + $0xdf0] sm:$0xff]  ;;  %v8328_v19 = vcombine.high %v423_v37, %v427_v38  ;;  %v8327_v56 = vcombine.low %v423_v37, %v427_v38 }
 0x26b   :  { %6986 = vmatpush2.bf16.msra.mxu0 %v8119_v22  ;;  %v8456_v46 = vcombine.high %v551_v41, %v555_v43  ;;  %v415_v22 = vld [vmem:[#allocation5 + $0x990] sm:$0xff]  ;;  %v8455_v57 = vcombine.low %v551_v41, %v555_v43 }
 0x26c   :  { %6987 = vmatprep.subr.bf16.mxu0 %v8112_v52  ;;  %v543_v52 = vld [vmem:[#allocation5 + $0xd90] sm:$0xff] }
 0x26d   :  { %7027 = vmatpush2.bf16.msra.mxu1 %v8247_v50  ;;  %v419_v50 = vld [vmem:[#allocation5 + $0x9b0] sm:$0xff] }
 0x26e   :  { %7028 = vmatprep.subr.bf16.mxu1 %v8240_v55  ;;  %v547_v55 = vld [vmem:[#allocation5 + $0xdb0] sm:$0xff]  ;;  %v8320_v60 = vcombine.high %v415_v22, %v419_v50  ;;  %v8319_v12 = vcombine.low %v415_v22, %v419_v50 }
 0x26f   :  { %6988 = vmatpush2.bf16.msra.mxu0 %v8111_v62  ;;  %v8448_v61 = vcombine.high %v543_v52, %v547_v55  ;;  %v407_v62 = vld [vmem:[#allocation5 + $0x950] sm:$0xff] }
 0x270   :  { %6989 = vmatprep.subr.bf16.mxu0 %v8104_v63  ;;  %v539_v2 = vld [vmem:[#allocation5 + $0xd70] sm:$0xff] }
 0x271   :  { %7029 = vmatpush2.bf16.msra.mxu1 %v8239_v7  ;;  %v411_v7 = vld [vmem:[#allocation5 + $0x970] sm:$0xff] }
 0x272   :  { %7030 = vmatprep.subr.bf16.mxu1 %v8232_v10  ;;  %v535_v10 = vld [vmem:[#allocation5 + $0xd50] sm:$0xff]  ;;  %v8311_v54 = vcombine.low %v407_v62, %v411_v7 }
 0x273   :  { %6990 = vmatpush2.bf16.msra.mxu0 %v8103_v39  ;;  %v8440_v13 = vcombine.high %v535_v10, %v539_v2  ;;  %v399_v42 = vld [vmem:[#allocation5 + $0x910] sm:$0xff] }
 0x274   :  { %6991 = vmatprep.subr.bf16.mxu0 %v8096_v6  ;;  %v8312_v6 = vcombine.high %v407_v62, %v411_v7  ;;  %v519_v37 = vld [vmem:[#allocation5 + $0xcd0] sm:$0xff] }
 0x275   :  { %7031 = vmatpush2.bf16.msra.mxu1 %v8231_v1  ;;  %v8447_v1 = vcombine.low %v543_v52, %v547_v55  ;;  %v523_v38 = vld [vmem:[#allocation5 + $0xcf0] sm:$0xff] }
 0x276   :  { %7032 = vmatprep.subr.bf16.mxu1 %v8224_v14  ;;  %v511_v22 = vld [vmem:[#allocation5 + $0xc90] sm:$0xff]  ;;  %v8423_v55 = vcombine.low %v519_v37, %v523_v38 }
 0x277   :  { %6992 = vmatpush2.bf16.msra.mxu0 %v8095_v21  ;;  %v403_v21 = vld [vmem:[#allocation5 + $0x930] sm:$0xff] }
 0x278   :  { %6993 = vmatprep.subr.bf16.mxu0 %v8088_v53  ;;  %v531_v53 = vld [vmem:[#allocation5 + $0xd30] sm:$0xff]  ;;  %v8304_v31 = vcombine.high %v399_v42, %v403_v21  ;;  %v8303_v41 = vcombine.low %v399_v42, %v403_v21 }
 0x279   :  { %7033 = vmatpush2.bf16.msra.mxu1 %v8223_v25  ;;  %v527_v25 = vld [vmem:[#allocation5 + $0xd10] sm:$0xff] }
 0x27a   :  { %7034 = vmatprep.subr.bf16.mxu1 %v8216_v26  ;;  %v8431_v43 = vcombine.low %v527_v25, %v531_v53  ;;  %v515_v50 = vld [vmem:[#allocation5 + $0xcb0] sm:$0xff] }
 0x27b   :  { %6994 = vmatpush2.bf16.msra.mxu0 %v8087_v32  ;;  %v503_v62 = vld [vmem:[#allocation5 + $0xc50] sm:$0xff] }
 0x27c   :  { %6995 = vmatprep.subr.bf16.mxu0 %v8080_v34  ;;  %v391_v34 = vld [vmem:[#allocation5 + $0x8d0] sm:$0xff] }
 0x27d   :  { %7035 = vmatpush2.bf16.msra.mxu1 %v8215_v33  ;;  %v8432_v33 = vcombine.high %v527_v25, %v531_v53  ;;  %v507_v7 = vld [vmem:[#allocation5 + $0xc70] sm:$0xff] }
 0x27e   :  { %7036 = vmatprep.subr.bf16.mxu1 %v8208_v35  ;;  %v395_v35 = vld [vmem:[#allocation5 + $0x8f0] sm:$0xff] }
 0x27f   :  { %6996 = vmatpush2.bf16.msra.mxu0 %v8079_v44  ;;  %v8296_v44 = vcombine.high %v391_v34, %v395_v35  ;;  %v8295_v52 = vcombine.low %v391_v34, %v395_v35  ;;  %v487_v42 = vld [vmem:[#allocation5 + $0xbd0] sm:$0xff] }
 0x280   :  { %7047 = vmatprep.subr.bf16.mxu0 %v8328_v19  ;;  %v383_v19 = vld [vmem:[#allocation5 + $0x890] sm:$0xff] }
 0x281   :  { %7037 = vmatpush2.bf16.msra.mxu1 %v8207_v45  ;;  %v8424_v45 = vcombine.high %v519_v37, %v523_v38  ;;  %v491_v21 = vld [vmem:[#allocation5 + $0xbf0] sm:$0xff] }
 0x282   :  { %7088 = vmatprep.subr.bf16.mxu1 %v8456_v46  ;;  %v6753_v63 = vpop.f32.mrf.mxu0  ;;  %6998 = vmatmul.mubr.bf16.vlgmr.msra.gmra.mxu0 %v9281_v16  ;;  %v387_v46 = vld [vmem:[#allocation5 + $0x8b0] sm:$0xff]  ;;  %v8391_v34 = vcombine.low %v487_v42, %v491_v21 }
 0x283   :  { %v6754_v3 = vadd.f32 %v6753_v63, %v9399_v0  ;;  %7048 = vmatpush1.bf16.msra.mxu0 %v8327_v56  ;;  %7079 = vmatprep.mubr.bf16.mxu0 %v9293_v27  ;;  %v8288_v56 = vcombine.high %v383_v19, %v387_v46  ;;  %v8287_v63 = vcombine.low %v383_v19, %v387_v46  ;;  %v619_v25 = vld [vmem:[#allocation5 + $0xff0] sm:$0xff] }
 0x284   :  { %v6794_v11 = vpop.f32.mrf.mxu1  ;;  %7039 = vmatmul.mubr.bf16.vlgmr.msra.gmra.mxu1 %v9287_v20  ;;  %v6755_v39 = vpop.f32.mrf.mxu0  ;;  %7049 = vmatprep.subr.bf16.mxu0 %v8320_v60  ;;  %v375_v60 = vld [vmem:[#allocation5 + $0x850] sm:$0xff] }
 0x285   :  { %7089 = vmatpush1.bf16.msra.mxu1 %v8455_v57  ;;  %v9408_v14 = vadd.f32 %v6794_v11, %v6754_v3  ;;  %v6756_v17 = vadd.f32 %v6755_v39, %v9402_v5  ;;  %7120 = vmatprep.mubr.bf16.mxu1 %v9298_v29  ;;  %v8439_v5 = vcombine.low %v535_v10, %v539_v2  ;;  %v367_v11 = vld [vmem:[#allocation5 + $0x810] sm:$0xff] }
 0x286   :  { %v6796_v24 = vpop.f32.mrf.mxu1  ;;  %7090 = vmatprep.subr.bf16.mxu1 %v8448_v61  ;;  %v6757_v0 = vpop.f32.mrf.mxu0  ;;  %v8416_v57 = vcombine.high %v511_v22, %v515_v50  ;;  %v379_v61 = vld [vmem:[#allocation5 + $0x870] sm:$0xff]  ;;  %v8415_v10 = vcombine.low %v511_v22, %v515_v50  ;;  %v8408_v3 = vcombine.high %v503_v62, %v507_v7 }
 0x287   :  { %v9413_v26 = vadd.f32 %v6796_v24, %v6756_v17  ;;  %7050 = vmatpush1.bf16.msra.mxu0 %v8319_v12  ;;  %v8280_v2 = vcombine.high %v375_v60, %v379_v61  ;;  %v371_v12 = vld [vmem:[#allocation5 + $0x830] sm:$0xff]  ;;  %v8407_v17 = vcombine.low %v503_v62, %v507_v7 }
 0x288   :  { %v6798_v28 = vpop.f32.mrf.mxu1  ;;  %v6758_v30 = vpop.f32.mrf.mxu0  ;;  %7051 = vmatprep.subr.bf16.mxu0 %v8312_v6  ;;  %v495_v39 = vld [vmem:[#allocation5 + $0xc10] sm:$0xff]  ;;  %v8279_v6 = vcombine.low %v375_v60, %v379_v61  ;;  %v8272_v24 = vcombine.high %v367_v11, %v371_v12  ;;  %v8271_v53 = vcombine.low %v367_v11, %v371_v12 }
 0x289   :  { %7091 = vmatpush1.bf16.msra.mxu1 %v8447_v1  ;;  %v499_v1 = vld [vmem:[#allocation5 + $0xc30] sm:$0xff] }
 0x28a   :  { %v6799_v32 = vpop.f32.mrf.mxu1  ;;  %7092 = vmatprep.subr.bf16.mxu1 %v8440_v13  ;;  %v8400_v13 = vcombine.high %v495_v39, %v499_v1  ;;  %v615_v0 = vld [vmem:[#allocation5 + $0xfd0] sm:$0xff]  ;;  %v8399_v28 = vcombine.low %v495_v39, %v499_v1 }
 0x28b   :  { %7052 = vmatpush1.bf16.msra.mxu0 %v8311_v54  ;;  %v8392_v54 = vcombine.high %v487_v42, %v491_v21  ;;  %v8520_v30 = vcombine.high %v615_v0, %v619_v25  ;;  %v607_v32 = vld [vmem:[#allocation5 + $0xf90] sm:$0xff]  ;;  %v8519_v35 = vcombine.low %v615_v0, %v619_v25 }
 0x28c   :  { %7053 = vmatprep.subr.bf16.mxu0 %v8304_v31  ;;  %v483_v31 = vld [vmem:[#allocation5 + $0xbb0] sm:$0xff] }
 0x28d   :  { %7093 = vmatpush1.bf16.msra.mxu1 %v8439_v5  ;;  %v479_v5 = vld [vmem:[#allocation5 + $0xb90] sm:$0xff] }
 0x28e   :  { %7094 = vmatprep.subr.bf16.mxu1 %v8432_v33  ;;  %v611_v33 = vld [vmem:[#allocation5 + $0xfb0] sm:$0xff]  ;;  %v8384_v37 = vcombine.high %v479_v5, %v483_v31  ;;  %v8383_v19 = vcombine.low %v479_v5, %v483_v31 }
 0x28f   :  { %7054 = vmatpush1.bf16.msra.mxu0 %v8303_v41  ;;  %v8512_v38 = vcombine.high %v607_v32, %v611_v33  ;;  %v471_v41 = vld [vmem:[#allocation5 + $0xb50] sm:$0xff]  ;;  %v8511_v46 = vcombine.low %v607_v32, %v611_v33 }
 0x290   :  { %7055 = vmatprep.subr.bf16.mxu0 %v8296_v44  ;;  %v599_v44 = vld [vmem:[#allocation5 + $0xf50] sm:$0xff] }
 0x291   :  { %7095 = vmatpush1.bf16.msra.mxu1 %v8431_v43  ;;  %v475_v43 = vld [vmem:[#allocation5 + $0xb70] sm:$0xff] }
 0x292   :  { %7096 = vmatprep.subr.bf16.mxu1 %v8424_v45  ;;  %v603_v45 = vld [vmem:[#allocation5 + $0xf70] sm:$0xff]  ;;  %v8376_v22 = vcombine.high %v471_v41, %v475_v43  ;;  %v8375_v60 = vcombine.low %v471_v41, %v475_v43 }
 0x293   :  { %7056 = vmatpush1.bf16.msra.mxu0 %v8295_v52  ;;  %v8504_v50 = vcombine.high %v599_v44, %v603_v45  ;;  %v463_v52 = vld [vmem:[#allocation5 + $0xb10] sm:$0xff]  ;;  %v8503_v61 = vcombine.low %v599_v44, %v603_v45 }
 0x294   :  { %7057 = vmatprep.subr.bf16.mxu0 %v8288_v56  ;;  %v591_v56 = vld [vmem:[#allocation5 + $0xf10] sm:$0xff] }
 0x295   :  { %7097 = vmatpush1.bf16.msra.mxu1 %v8423_v55  ;;  %v467_v55 = vld [vmem:[#allocation5 + $0xb30] sm:$0xff] }
 0x296   :  { %7098 = vmatprep.subr.bf16.mxu1 %v8416_v57  ;;  %v595_v57 = vld [vmem:[#allocation5 + $0xf30] sm:$0xff]  ;;  %v8368_v62 = vcombine.high %v463_v52, %v467_v55  ;;  %v8367_v11 = vcombine.low %v463_v52, %v467_v55 }
 0x297   :  { %7058 = vmatpush1.bf16.msra.mxu0 %v8287_v63  ;;  %v8496_v7 = vcombine.high %v591_v56, %v595_v57  ;;  %v455_v63 = vld [vmem:[#allocation5 + $0xad0] sm:$0xff]  ;;  %v8495_v12 = vcombine.low %v591_v56, %v595_v57 }
 0x298   :  { %7059 = vmatprep.subr.bf16.mxu0 %v8280_v2  ;;  %v583_v2 = vld [vmem:[#allocation5 + $0xed0] sm:$0xff] }
 0x299   :  { %7099 = vmatpush1.bf16.msra.mxu1 %v8415_v10  ;;  %v459_v10 = vld [vmem:[#allocation5 + $0xaf0] sm:$0xff] }
 0x29a   :  { %7100 = vmatprep.subr.bf16.mxu1 %v8408_v3  ;;  %v587_v3 = vld [vmem:[#allocation5 + $0xef0] sm:$0xff]  ;;  %v8360_v39 = vcombine.high %v455_v63, %v459_v10  ;;  %v8359_v42 = vcombine.low %v455_v63, %v459_v10 }
 0x29b   :  { %7060 = vmatpush1.bf16.msra.mxu0 %v8279_v6  ;;  %v8488_v1 = vcombine.high %v583_v2, %v587_v3  ;;  %v447_v6 = vld [vmem:[#allocation5 + $0xa90] sm:$0xff]  ;;  %v8487_v21 = vcombine.low %v583_v2, %v587_v3 }
 0x29c   :  { %7061 = vmatprep.subr.bf16.mxu0 %v8272_v24  ;;  %v575_v24 = vld [vmem:[#allocation5 + $0xe90] sm:$0xff] }
 0x29d   :  { %7101 = vmatpush1.bf16.msra.mxu1 %v8407_v17  ;;  %v451_v17 = vld [vmem:[#allocation5 + $0xab0] sm:$0xff] }
 0x29e   :  { %7102 = vmatprep.subr.bf16.mxu1 %v8400_v13  ;;  %v579_v13 = vld [vmem:[#allocation5 + $0xeb0] sm:$0xff]  ;;  %v8352_v0 = vcombine.high %v447_v6, %v451_v17  ;;  %v8351_v5 = vcombine.low %v447_v6, %v451_v17 }
 0x29f   :  { %7062 = vmatpush1.bf16.msra.mxu0 %v8271_v53  ;;  %v8480_v25 = vcombine.high %v575_v24, %v579_v13  ;;  %v439_v53 = vld [vmem:[#allocation5 + $0xa50] sm:$0xff]  ;;  %v8479_v31 = vcombine.low %v575_v24, %v579_v13 }
 0x2a0   :  { %7063 = vmatprep.subr.bf16.mxu0 %v8392_v54  ;;  %v567_v54 = vld [vmem:[#allocation5 + $0xe50] sm:$0xff] }
 0x2a1   :  { %7103 = vmatpush1.bf16.msra.mxu1 %v8399_v28  ;;  %v443_v28 = vld [vmem:[#allocation5 + $0xa70] sm:$0xff] }
 0x2a2   :  { %7104 = vmatprep.subr.bf16.mxu1 %v8520_v30  ;;  %v571_v30 = vld [vmem:[#allocation5 + $0xe70] sm:$0xff]  ;;  %v8344_v32 = vcombine.high %v439_v53, %v443_v28  ;;  %v8343_v41 = vcombine.low %v439_v53, %v443_v28 }
 0x2a3   :  { %7064 = vmatpush2.bf16.msra.mxu0 %v8391_v34  ;;  %v8472_v33 = vcombine.high %v567_v54, %v571_v30  ;;  %v431_v34 = vld [vmem:[#allocation5 + $0xa10] sm:$0xff]  ;;  %v8471_v43 = vcombine.low %v567_v54, %v571_v30 }
 0x2a4   :  { %7065 = vmatprep.subr.bf16.mxu0 %v8384_v37  ;;  %v559_v37 = vld [vmem:[#allocation5 + $0xe10] sm:$0xff] }
 0x2a5   :  { %7105 = vmatpush2.bf16.msra.mxu1 %v8519_v35  ;;  %v435_v35 = vld [vmem:[#allocation5 + $0xa30] sm:$0xff] }
 0x2a6   :  { %7106 = vmatprep.subr.bf16.mxu1 %v8512_v38  ;;  %v563_v38 = vld [vmem:[#allocation5 + $0xe30] sm:$0xff]  ;;  %v8336_v44 = vcombine.high %v431_v34, %v435_v35  ;;  %v8335_v52 = vcombine.low %v431_v34, %v435_v35 }
 0x2a7   :  { %7066 = vmatpush2.bf16.msra.mxu0 %v8383_v19  ;;  %v8464_v45 = vcombine.high %v559_v37, %v563_v38  ;;  %v679_v19 = vld [vmem:[#allocation5 + $0x11d0] sm:$0xff]  ;;  %v8463_v55 = vcombine.low %v559_v37, %v563_v38 }
 0x2a8   :  { %7067 = vmatprep.subr.bf16.mxu0 %v8376_v22  ;;  %v807_v22 = vld [vmem:[#allocation5 + $0x15d0] sm:$0xff] }
 0x2a9   :  { %7107 = vmatpush2.bf16.msra.mxu1 %v8511_v46  ;;  %v683_v46 = vld [vmem:[#allocation5 + $0x11f0] sm:$0xff] }
 0x2aa   :  { %7108 = vmatprep.subr.bf16.mxu1 %v8504_v50  ;;  %v811_v50 = vld [vmem:[#allocation5 + $0x15f0] sm:$0xff]  ;;  %v8584_v56 = vcombine.high %v679_v19, %v683_v46  ;;  %v8583_v63 = vcombine.low %v679_v19, %v683_v46 }
 0x2ab   :  { %7068 = vmatpush2.bf16.msra.mxu0 %v8375_v60  ;;  %v8712_v57 = vcombine.high %v807_v22, %v811_v50  ;;  %v671_v60 = vld [vmem:[#allocation5 + $0x1190] sm:$0xff]  ;;  %v8711_v10 = vcombine.low %v807_v22, %v811_v50 }
 0x2ac   :  { %7069 = vmatprep.subr.bf16.mxu0 %v8368_v62  ;;  %v799_v62 = vld [vmem:[#allocation5 + $0x1590] sm:$0xff] }
 0x2ad   :  { %7109 = vmatpush2.bf16.msra.mxu1 %v8503_v61  ;;  %v675_v61 = vld [vmem:[#allocation5 + $0x11b0] sm:$0xff] }
 0x2ae   :  { %7110 = vmatprep.subr.bf16.mxu1 %v8496_v7  ;;  %v803_v7 = vld [vmem:[#allocation5 + $0x15b0] sm:$0xff]  ;;  %v8576_v2 = vcombine.high %v671_v60, %v675_v61  ;;  %v8575_v13 = vcombine.low %v671_v60, %v675_v61 }
 0x2af   :  { %7070 = vmatpush2.bf16.msra.mxu0 %v8367_v11  ;;  %v8704_v3 = vcombine.high %v799_v62, %v803_v7  ;;  %v663_v11 = vld [vmem:[#allocation5 + $0x1150] sm:$0xff] }
 0x2b0   :  { %7071 = vmatprep.subr.bf16.mxu0 %v8360_v39  ;;  %v795_v6 = vld [vmem:[#allocation5 + $0x1570] sm:$0xff] }
 0x2b1   :  { %7111 = vmatpush2.bf16.msra.mxu1 %v8495_v12  ;;  %v667_v12 = vld [vmem:[#allocation5 + $0x1170] sm:$0xff] }
 0x2b2   :  { %7112 = vmatprep.subr.bf16.mxu1 %v8488_v1  ;;  %v791_v1 = vld [vmem:[#allocation5 + $0x1550] sm:$0xff]  ;;  %v8567_v35 = vcombine.low %v663_v11, %v667_v12 }
 0x2b3   :  { %7072 = vmatpush2.bf16.msra.mxu0 %v8359_v42  ;;  %v8696_v54 = vcombine.high %v791_v1, %v795_v6  ;;  %v655_v30 = vld [vmem:[#allocation5 + $0x1110] sm:$0xff] }
 0x2b4   :  { %7073 = vmatprep.subr.bf16.mxu0 %v8352_v0  ;;  %v8568_v0 = vcombine.high %v663_v11, %v667_v12  ;;  %v775_v19 = vld [vmem:[#allocation5 + $0x14d0] sm:$0xff] }
 0x2b5   :  { %7113 = vmatpush2.bf16.msra.mxu1 %v8487_v21  ;;  %v8703_v21 = vcombine.low %v799_v62, %v803_v7  ;;  %v779_v46 = vld [vmem:[#allocation5 + $0x14f0] sm:$0xff] }
 0x2b6   :  { %7114 = vmatprep.subr.bf16.mxu1 %v8480_v25  ;;  %v767_v60 = vld [vmem:[#allocation5 + $0x1490] sm:$0xff]  ;;  %v8679_v7 = vcombine.low %v775_v19, %v779_v46 }
 0x2b7   :  { %7074 = vmatpush2.bf16.msra.mxu0 %v8351_v5  ;;  %v659_v5 = vld [vmem:[#allocation5 + $0x1130] sm:$0xff] }
 0x2b8   :  { %7075 = vmatprep.subr.bf16.mxu0 %v8344_v32  ;;  %v787_v32 = vld [vmem:[#allocation5 + $0x1530] sm:$0xff]  ;;  %v8560_v38 = vcombine.high %v655_v30, %v659_v5  ;;  %v8559_v22 = vcombine.low %v655_v30, %v659_v5 }
 0x2b9   :  { %7115 = vmatpush2.bf16.msra.mxu1 %v8479_v31  ;;  %v783_v31 = vld [vmem:[#allocation5 + $0x1510] sm:$0xff] }
 0x2ba   :  { %7116 = vmatprep.subr.bf16.mxu1 %v8472_v33  ;;  %v8687_v50 = vcombine.low %v783_v31, %v787_v32  ;;  %v771_v61 = vld [vmem:[#allocation5 + $0x14b0] sm:$0xff] }
 0x2bb   :  { %7076 = vmatpush2.bf16.msra.mxu0 %v8343_v41  ;;  %v759_v11 = vld [vmem:[#allocation5 + $0x1450] sm:$0xff] }
 0x2bc   :  { %7077 = vmatprep.subr.bf16.mxu0 %v8336_v44  ;;  %v647_v44 = vld [vmem:[#allocation5 + $0x10d0] sm:$0xff] }
 0x2bd   :  { %7117 = vmatpush2.bf16.msra.mxu1 %v8471_v43  ;;  %v8688_v43 = vcombine.high %v783_v31, %v787_v32  ;;  %v763_v12 = vld [vmem:[#allocation5 + $0x1470] sm:$0xff] }
 0x2be   :  { %7118 = vmatprep.subr.bf16.mxu1 %v8464_v45  ;;  %v651_v45 = vld [vmem:[#allocation5 + $0x10f0] sm:$0xff] }
 0x2bf   :  { %7078 = vmatpush2.bf16.msra.mxu0 %v8335_v52  ;;  %v8552_v52 = vcombine.high %v647_v44, %v651_v45  ;;  %v8551_v62 = vcombine.low %v647_v44, %v651_v45  ;;  %v743_v30 = vld [vmem:[#allocation5 + $0x13d0] sm:$0xff] }
 0x2c0   :  { %7129 = vmatprep.subr.bf16.mxu0 %v8584_v56  ;;  %v639_v56 = vld [vmem:[#allocation5 + $0x1090] sm:$0xff] }
 0x2c1   :  { %7119 = vmatpush2.bf16.msra.mxu1 %v8463_v55  ;;  %v8680_v55 = vcombine.high %v775_v19, %v779_v46  ;;  %v747_v5 = vld [vmem:[#allocation5 + $0x13f0] sm:$0xff] }
 0x2c2   :  { %7170 = vmatprep.subr.bf16.mxu1 %v8712_v57  ;;  %v6835_v39 = vpop.f32.mrf.mxu0  ;;  %7080 = vmatmul.mubr.bf16.vlgmr.msra.gmra.mxu0 %v9305_v36  ;;  %v643_v57 = vld [vmem:[#allocation5 + $0x10b0] sm:$0xff]  ;;  %v8647_v44 = vcombine.low %v743_v30, %v747_v5 }
 0x2c3   :  { %v6836_v17 = vadd.f32 %v6835_v39, %v9408_v14  ;;  %7130 = vmatpush1.bf16.msra.mxu0 %v8583_v63  ;;  %7161 = vmatprep.mubr.bf16.mxu0 %v9317_v47  ;;  %v8544_v63 = vcombine.high %v639_v56, %v643_v57  ;;  %v8543_v39 = vcombine.low %v639_v56, %v643_v57  ;;  %v875_v31 = vld [vmem:[#allocation5 + $0x17f0] sm:$0xff] }
 0x2c4   :  { %v6876_v24 = vpop.f32.mrf.mxu1  ;;  %7121 = vmatmul.mubr.bf16.vlgmr.msra.gmra.mxu1 %v9311_v40  ;;  %v6837_v42 = vpop.f32.mrf.mxu0  ;;  %7131 = vmatprep.subr.bf16.mxu0 %v8576_v2  ;;  %v631_v2 = vld [vmem:[#allocation5 + $0x1050] sm:$0xff] }
 0x2c5   :  { %7171 = vmatpush1.bf16.msra.mxu1 %v8711_v10  ;;  %v9418_v25 = vadd.f32 %v6876_v24, %v6836_v17  ;;  %v6838_v53 = vadd.f32 %v6837_v42, %v9413_v26  ;;  %7202 = vmatprep.mubr.bf16.mxu1 %v9322_v49  ;;  %v8695_v26 = vcombine.low %v791_v1, %v795_v6  ;;  %v623_v24 = vld [vmem:[#allocation5 + $0x1010] sm:$0xff] }
 0x2c6   :  { %v6878_v28 = vpop.f32.mrf.mxu1  ;;  %7172 = vmatprep.subr.bf16.mxu1 %v8704_v3  ;;  %v6839_v14 = vpop.f32.mrf.mxu0  ;;  %v8672_v10 = vcombine.high %v767_v60, %v771_v61  ;;  %v635_v3 = vld [vmem:[#allocation5 + $0x1070] sm:$0xff]  ;;  %v8671_v1 = vcombine.low %v767_v60, %v771_v61  ;;  %v8664_v17 = vcombine.high %v759_v11, %v763_v12 }
 0x2c7   :  { %v9423_v33 = vadd.f32 %v6878_v28, %v6838_v53  ;;  %7132 = vmatpush1.bf16.msra.mxu0 %v8575_v13  ;;  %v8536_v6 = vcombine.high %v631_v2, %v635_v3  ;;  %v627_v13 = vld [vmem:[#allocation5 + $0x1030] sm:$0xff]  ;;  %v8663_v53 = vcombine.low %v759_v11, %v763_v12 }
 0x2c8   :  { %v6880_v34 = vpop.f32.mrf.mxu1  ;;  %v6840_v37 = vpop.f32.mrf.mxu0  ;;  %7133 = vmatprep.subr.bf16.mxu0 %v8568_v0  ;;  %v751_v42 = vld [vmem:[#allocation5 + $0x1410] sm:$0xff]  ;;  %v8535_v0 = vcombine.low %v631_v2, %v635_v3  ;;  %v8528_v28 = vcombine.high %v623_v24, %v627_v13  ;;  %v8527_v32 = vcombine.low %v623_v24, %v627_v13 }
 0x2c9   :  { %7173 = vmatpush1.bf16.msra.mxu1 %v8703_v21  ;;  %v755_v21 = vld [vmem:[#allocation5 + $0x1430] sm:$0xff] }
 0x2ca   :  { %v6881_v41 = vpop.f32.mrf.mxu1  ;;  %7174 = vmatprep.subr.bf16.mxu1 %v8696_v54  ;;  %v8656_v54 = vcombine.high %v751_v42, %v755_v21  ;;  %v871_v14 = vld [vmem:[#allocation5 + $0x17d0] sm:$0xff]  ;;  %v8655_v34 = vcombine.low %v751_v42, %v755_v21 }
 0x2cb   :  { %7134 = vmatpush1.bf16.msra.mxu0 %v8567_v35  ;;  %v8648_v35 = vcombine.high %v743_v30, %v747_v5  ;;  %v8776_v37 = vcombine.high %v871_v14, %v875_v31  ;;  %v863_v41 = vld [vmem:[#allocation5 + $0x1790] sm:$0xff]  ;;  %v8775_v45 = vcombine.low %v871_v14, %v875_v31 }
 0x2cc   :  { %7135 = vmatprep.subr.bf16.mxu0 %v8560_v38  ;;  %v739_v38 = vld [vmem:[#allocation5 + $0x13b0] sm:$0xff] }
 0x2cd   :  { %7175 = vmatpush1.bf16.msra.mxu1 %v8695_v26  ;;  %v735_v26 = vld [vmem:[#allocation5 + $0x1390] sm:$0xff] }
 0x2ce   :  { %7176 = vmatprep.subr.bf16.mxu1 %v8688_v43  ;;  %v867_v43 = vld [vmem:[#allocation5 + $0x17b0] sm:$0xff]  ;;  %v8640_v19 = vcombine.high %v735_v26, %v739_v38  ;;  %v8639_v56 = vcombine.low %v735_v26, %v739_v38 }
 0x2cf   :  { %7136 = vmatpush1.bf16.msra.mxu0 %v8559_v22  ;;  %v8768_v46 = vcombine.high %v863_v41, %v867_v43  ;;  %v727_v22 = vld [vmem:[#allocation5 + $0x1350] sm:$0xff]  ;;  %v8767_v57 = vcombine.low %v863_v41, %v867_v43 }
 0x2d0   :  { %7137 = vmatprep.subr.bf16.mxu0 %v8552_v52  ;;  %v855_v52 = vld [vmem:[#allocation5 + $0x1750] sm:$0xff] }
 0x2d1   :  { %7177 = vmatpush1.bf16.msra.mxu1 %v8687_v50  ;;  %v731_v50 = vld [vmem:[#allocation5 + $0x1370] sm:$0xff] }
 0x2d2   :  { %7178 = vmatprep.subr.bf16.mxu1 %v8680_v55  ;;  %v859_v55 = vld [vmem:[#allocation5 + $0x1770] sm:$0xff]  ;;  %v8632_v60 = vcombine.high %v727_v22, %v731_v50  ;;  %v8631_v2 = vcombine.low %v727_v22, %v731_v50 }
 0x2d3   :  { %7138 = vmatpush1.bf16.msra.mxu0 %v8551_v62  ;;  %v8760_v61 = vcombine.high %v855_v52, %v859_v55  ;;  %v719_v62 = vld [vmem:[#allocation5 + $0x1310] sm:$0xff]  ;;  %v8759_v3 = vcombine.low %v855_v52, %v859_v55 }
 0x2d4   :  { %7139 = vmatprep.subr.bf16.mxu0 %v8544_v63  ;;  %v847_v63 = vld [vmem:[#allocation5 + $0x1710] sm:$0xff] }
 0x2d5   :  { %7179 = vmatpush1.bf16.msra.mxu1 %v8679_v7  ;;  %v723_v7 = vld [vmem:[#allocation5 + $0x1330] sm:$0xff] }
 0x2d6   :  { %7180 = vmatprep.subr.bf16.mxu1 %v8672_v10  ;;  %v851_v10 = vld [vmem:[#allocation5 + $0x1730] sm:$0xff]  ;;  %v8624_v11 = vcombine.high %v719_v62, %v723_v7  ;;  %v8623_v24 = vcombine.low %v719_v62, %v723_v7 }
 0x2d7   :  { %7140 = vmatpush1.bf16.msra.mxu0 %v8543_v39  ;;  %v8752_v12 = vcombine.high %v847_v63, %v851_v10  ;;  %v711_v39 = vld [vmem:[#allocation5 + $0x12d0] sm:$0xff]  ;;  %v8751_v13 = vcombine.low %v847_v63, %v851_v10 }
 0x2d8   :  { %7141 = vmatprep.subr.bf16.mxu0 %v8536_v6  ;;  %v839_v6 = vld [vmem:[#allocation5 + $0x16d0] sm:$0xff] }
 0x2d9   :  { %7181 = vmatpush1.bf16.msra.mxu1 %v8671_v1  ;;  %v715_v1 = vld [vmem:[#allocation5 + $0x12f0] sm:$0xff] }
 0x2da   :  { %7182 = vmatprep.subr.bf16.mxu1 %v8664_v17  ;;  %v843_v17 = vld [vmem:[#allocation5 + $0x16f0] sm:$0xff]  ;;  %v8616_v42 = vcombine.high %v711_v39, %v715_v1  ;;  %v8615_v30 = vcombine.low %v711_v39, %v715_v1 }
 0x2db   :  { %7142 = vmatpush1.bf16.msra.mxu0 %v8535_v0  ;;  %v8744_v21 = vcombine.high %v839_v6, %v843_v17  ;;  %v703_v0 = vld [vmem:[#allocation5 + $0x1290] sm:$0xff]  ;;  %v8743_v5 = vcombine.low %v839_v6, %v843_v17 }
 0x2dc   :  { %7143 = vmatprep.subr.bf16.mxu0 %v8528_v28  ;;  %v831_v28 = vld [vmem:[#allocation5 + $0x1690] sm:$0xff] }
 0x2dd   :  { %7183 = vmatpush1.bf16.msra.mxu1 %v8663_v53  ;;  %v707_v53 = vld [vmem:[#allocation5 + $0x12b0] sm:$0xff] }
 0x2de   :  { %7184 = vmatprep.subr.bf16.mxu1 %v8656_v54  ;;  %v835_v54 = vld [vmem:[#allocation5 + $0x16b0] sm:$0xff]  ;;  %v8608_v14 = vcombine.high %v703_v0, %v707_v53  ;;  %v8607_v26 = vcombine.low %v703_v0, %v707_v53 }
 0x2df   :  { %7144 = vmatpush1.bf16.msra.mxu0 %v8527_v32  ;;  %v8736_v31 = vcombine.high %v831_v28, %v835_v54  ;;  %v695_v32 = vld [vmem:[#allocation5 + $0x1250] sm:$0xff]  ;;  %v8735_v38 = vcombine.low %v831_v28, %v835_v54 }
 0x2e0   :  { %7145 = vmatprep.subr.bf16.mxu0 %v8648_v35  ;;  %v823_v35 = vld [vmem:[#allocation5 + $0x1650] sm:$0xff] }
 0x2e1   :  { %7185 = vmatpush1.bf16.msra.mxu1 %v8655_v34  ;;  %v699_v34 = vld [vmem:[#allocation5 + $0x1270] sm:$0xff] }
 0x2e2   :  { %7186 = vmatprep.subr.bf16.mxu1 %v8776_v37  ;;  %v827_v37 = vld [vmem:[#allocation5 + $0x1670] sm:$0xff]  ;;  %v8600_v41 = vcombine.high %v695_v32, %v699_v34  ;;  %v8599_v22 = vcombine.low %v695_v32, %v699_v34 }
 0x2e3   :  { %7146 = vmatpush2.bf16.msra.mxu0 %v8647_v44  ;;  %v8728_v43 = vcombine.high %v823_v35, %v827_v37  ;;  %v687_v44 = vld [vmem:[#allocation5 + $0x1210] sm:$0xff]  ;;  %v8727_v50 = vcombine.low %v823_v35, %v827_v37 }
 0x2e4   :  { %7147 = vmatprep.subr.bf16.mxu0 %v8640_v19  ;;  %v815_v19 = vld [vmem:[#allocation5 + $0x1610] sm:$0xff] }
 0x2e5   :  { %7187 = vmatpush2.bf16.msra.mxu1 %v8775_v45  ;;  %v691_v45 = vld [vmem:[#allocation5 + $0x1230] sm:$0xff] }
 0x2e6   :  { %7188 = vmatprep.subr.bf16.mxu1 %v8768_v46  ;;  %v819_v46 = vld [vmem:[#allocation5 + $0x1630] sm:$0xff]  ;;  %v8592_v52 = vcombine.high %v687_v44, %v691_v45  ;;  %v8591_v62 = vcombine.low %v687_v44, %v691_v45 }
 0x2e7   :  { %7148 = vmatpush2.bf16.msra.mxu0 %v8639_v56  ;;  %v8720_v55 = vcombine.high %v815_v19, %v819_v46  ;;  %v935_v56 = vld [vmem:[#allocation5 + $0x19d0] sm:$0xff]  ;;  %v8719_v7 = vcombine.low %v815_v19, %v819_v46 }
 0x2e8   :  { %7149 = vmatprep.subr.bf16.mxu0 %v8632_v60  ;;  %v1063_v60 = vld [vmem:[#allocation5 + $0x1dd0] sm:$0xff] }
 0x2e9   :  { %7189 = vmatpush2.bf16.msra.mxu1 %v8767_v57  ;;  %v939_v57 = vld [vmem:[#allocation5 + $0x19f0] sm:$0xff] }
 0x2ea   :  { %7190 = vmatprep.subr.bf16.mxu1 %v8760_v61  ;;  %v1067_v61 = vld [vmem:[#allocation5 + $0x1df0] sm:$0xff]  ;;  %v8840_v63 = vcombine.high %v935_v56, %v939_v57  ;;  %v8839_v39 = vcombine.low %v935_v56, %v939_v57 }
 0x2eb   :  { %7150 = vmatpush2.bf16.msra.mxu0 %v8631_v2  ;;  %v8968_v10 = vcombine.high %v1063_v60, %v1067_v61  ;;  %v927_v2 = vld [vmem:[#allocation5 + $0x1990] sm:$0xff]  ;;  %v8967_v1 = vcombine.low %v1063_v60, %v1067_v61 }
 0x2ec   :  { %7151 = vmatprep.subr.bf16.mxu0 %v8624_v11  ;;  %v1055_v11 = vld [vmem:[#allocation5 + $0x1d90] sm:$0xff] }
 0x2ed   :  { %7191 = vmatpush2.bf16.msra.mxu1 %v8759_v3  ;;  %v931_v3 = vld [vmem:[#allocation5 + $0x19b0] sm:$0xff] }
 0x2ee   :  { %7192 = vmatprep.subr.bf16.mxu1 %v8752_v12  ;;  %v1059_v12 = vld [vmem:[#allocation5 + $0x1db0] sm:$0xff]  ;;  %v8832_v6 = vcombine.high %v927_v2, %v931_v3  ;;  %v8831_v54 = vcombine.low %v927_v2, %v931_v3 }
 0x2ef   :  { %7152 = vmatpush2.bf16.msra.mxu0 %v8623_v24  ;;  %v8960_v17 = vcombine.high %v1055_v11, %v1059_v12  ;;  %v919_v24 = vld [vmem:[#allocation5 + $0x1950] sm:$0xff] }
 0x2f0   :  { %7153 = vmatprep.subr.bf16.mxu0 %v8616_v42  ;;  %v1051_v0 = vld [vmem:[#allocation5 + $0x1d70] sm:$0xff] }
 0x2f1   :  { %7193 = vmatpush2.bf16.msra.mxu1 %v8751_v13  ;;  %v923_v13 = vld [vmem:[#allocation5 + $0x1970] sm:$0xff] }
 0x2f2   :  { %7194 = vmatprep.subr.bf16.mxu1 %v8744_v21  ;;  %v1047_v21 = vld [vmem:[#allocation5 + $0x1d50] sm:$0xff]  ;;  %v8823_v45 = vcombine.low %v919_v24, %v923_v13 }
 0x2f3   :  { %7154 = vmatpush2.bf16.msra.mxu0 %v8615_v30  ;;  %v8952_v35 = vcombine.high %v1047_v21, %v1051_v0  ;;  %v911_v37 = vld [vmem:[#allocation5 + $0x1910] sm:$0xff] }
 0x2f4   :  { %7155 = vmatprep.subr.bf16.mxu0 %v8608_v14  ;;  %v8824_v14 = vcombine.high %v919_v24, %v923_v13  ;;  %v1031_v56 = vld [vmem:[#allocation5 + $0x1cd0] sm:$0xff] }
 0x2f5   :  { %7195 = vmatpush2.bf16.msra.mxu1 %v8743_v5  ;;  %v8959_v5 = vcombine.low %v1055_v11, %v1059_v12  ;;  %v1035_v57 = vld [vmem:[#allocation5 + $0x1cf0] sm:$0xff] }
 0x2f6   :  { %7196 = vmatprep.subr.bf16.mxu1 %v8736_v31  ;;  %v1023_v2 = vld [vmem:[#allocation5 + $0x1c90] sm:$0xff]  ;;  %v8935_v12 = vcombine.low %v1031_v56, %v1035_v57 }
 0x2f7   :  { %7156 = vmatpush2.bf16.msra.mxu0 %v8607_v26  ;;  %v915_v26 = vld [vmem:[#allocation5 + $0x1930] sm:$0xff] }
 0x2f8   :  { %7157 = vmatprep.subr.bf16.mxu0 %v8600_v41  ;;  %v1043_v41 = vld [vmem:[#allocation5 + $0x1d30] sm:$0xff]  ;;  %v8816_v46 = vcombine.high %v911_v37, %v915_v26  ;;  %v8815_v60 = vcombine.low %v911_v37, %v915_v26 }
 0x2f9   :  { %7197 = vmatpush2.bf16.msra.mxu1 %v8735_v38  ;;  %v1039_v38 = vld [vmem:[#allocation5 + $0x1d10] sm:$0xff] }
 0x2fa   :  { %7198 = vmatprep.subr.bf16.mxu1 %v8728_v43  ;;  %v8943_v61 = vcombine.low %v1039_v38, %v1043_v41  ;;  %v1027_v3 = vld [vmem:[#allocation5 + $0x1cb0] sm:$0xff] }
 0x2fb   :  { %7158 = vmatpush2.bf16.msra.mxu0 %v8599_v22  ;;  %v1015_v24 = vld [vmem:[#allocation5 + $0x1c50] sm:$0xff] }
 0x2fc   :  { %7159 = vmatprep.subr.bf16.mxu0 %v8592_v52  ;;  %v903_v52 = vld [vmem:[#allocation5 + $0x18d0] sm:$0xff] }
 0x2fd   :  { %7199 = vmatpush2.bf16.msra.mxu1 %v8727_v50  ;;  %v8944_v50 = vcombine.high %v1039_v38, %v1043_v41  ;;  %v1019_v13 = vld [vmem:[#allocation5 + $0x1c70] sm:$0xff] }
 0x2fe   :  { %7200 = vmatprep.subr.bf16.mxu1 %v8720_v55  ;;  %v907_v55 = vld [vmem:[#allocation5 + $0x18f0] sm:$0xff] }
 0x2ff   :  { %7160 = vmatpush2.bf16.msra.mxu0 %v8591_v62  ;;  %v8808_v62 = vcombine.high %v903_v52, %v907_v55  ;;  %v8807_v11 = vcombine.low %v903_v52, %v907_v55  ;;  %v999_v37 = vld [vmem:[#allocation5 + $0x1bd0] sm:$0xff] }
 0x300   :  { %7211 = vmatprep.subr.bf16.mxu0 %v8840_v63  ;;  %v895_v63 = vld [vmem:[#allocation5 + $0x1890] sm:$0xff] }
 0x301   :  { %7201 = vmatpush2.bf16.msra.mxu1 %v8719_v7  ;;  %v8936_v7 = vcombine.high %v1031_v56, %v1035_v57  ;;  %v1003_v26 = vld [vmem:[#allocation5 + $0x1bf0] sm:$0xff] }
 0x302   :  { %7252 = vmatprep.subr.bf16.mxu1 %v8968_v10  ;;  %v6917_v42 = vpop.f32.mrf.mxu0  ;;  %7162 = vmatmul.mubr.bf16.vlgmr.msra.gmra.mxu0 %v9329_v4  ;;  %v899_v10 = vld [vmem:[#allocation5 + $0x18b0] sm:$0xff]  ;;  %v8903_v52 = vcombine.low %v999_v37, %v1003_v26 }
 0x303   :  { %v6918_v53 = vadd.f32 %v6917_v42, %v9418_v25  ;;  %7212 = vmatpush1.bf16.msra.mxu0 %v8839_v39  ;;  %7243 = vmatprep.mubr.bf16.mxu0 %v9341_v15  ;;  %v8800_v39 = vcombine.high %v895_v63, %v899_v10  ;;  %v8799_v42 = vcombine.low %v895_v63, %v899_v10  ;;  %v1131_v38 = vld [vmem:[#allocation5 + $0x1ff0] sm:$0xff] }
 0x304   :  { %v6958_v28 = vpop.f32.mrf.mxu1  ;;  %7203 = vmatmul.mubr.bf16.vlgmr.msra.gmra.mxu1 %v9335_v8  ;;  %v6919_v30 = vpop.f32.mrf.mxu0  ;;  %7213 = vmatprep.subr.bf16.mxu0 %v8832_v6  ;;  %v887_v6 = vld [vmem:[#allocation5 + $0x1850] sm:$0xff] }
 0x305   :  { %7253 = vmatpush1.bf16.msra.mxu1 %v8967_v1  ;;  %v9428_v31 = vadd.f32 %v6958_v28, %v6918_v53  ;;  %v6920_v32 = vadd.f32 %v6919_v30, %v9423_v33  ;;  %7284 = vmatprep.mubr.bf16.mxu1 %v9346_v18  ;;  %v8951_v33 = vcombine.low %v1047_v21, %v1051_v0  ;;  %v879_v28 = vld [vmem:[#allocation5 + $0x1810] sm:$0xff] }
 0x306   :  { %v6960_v34 = vpop.f32.mrf.mxu1  ;;  %7254 = vmatprep.subr.bf16.mxu1 %v8960_v17  ;;  %v6921_v25 = vpop.f32.mrf.mxu0  ;;  %v8928_v1 = vcombine.high %v1023_v2, %v1027_v3  ;;  %v891_v17 = vld [vmem:[#allocation5 + $0x1870] sm:$0xff]  ;;  %v8927_v21 = vcombine.low %v1023_v2, %v1027_v3  ;;  %v8920_v53 = vcombine.high %v1015_v24, %v1019_v13 }
 0x307   :  { %v9433_v43 = vadd.f32 %v6960_v34, %v6920_v32  ;;  %7214 = vmatpush1.bf16.msra.mxu0 %v8831_v54  ;;  %v8792_v0 = vcombine.high %v887_v6, %v891_v17  ;;  %v883_v54 = vld [vmem:[#allocation5 + $0x1830] sm:$0xff]  ;;  %v8919_v32 = vcombine.low %v1015_v24, %v1019_v13 }
 0x308   :  { %v6962_v44 = vpop.f32.mrf.mxu1  ;;  %v6922_v19 = vpop.f32.mrf.mxu0  ;;  %7215 = vmatprep.subr.bf16.mxu0 %v8824_v14  ;;  %v1007_v30 = vld [vmem:[#allocation5 + $0x1c10] sm:$0xff]  ;;  %v8791_v14 = vcombine.low %v887_v6, %v891_v17  ;;  %v8784_v34 = vcombine.high %v879_v28, %v883_v54  ;;  %v8783_v41 = vcombine.low %v879_v28, %v883_v54 }
 0x309   :  { %7255 = vmatpush1.bf16.msra.mxu1 %v8959_v5  ;;  %v1011_v5 = vld [vmem:[#allocation5 + $0x1c30] sm:$0xff] }
 0x30a   :  { %v6963_v22 = vpop.f32.mrf.mxu1  ;;  %7256 = vmatprep.subr.bf16.mxu1 %v8952_v35  ;;  %v8912_v35 = vcombine.high %v1007_v30, %v1011_v5  ;;  %v1127_v25 = vld [vmem:[#allocation5 + $0x1fd0] sm:$0xff]  ;;  %v8911_v44 = vcombine.low %v1007_v30, %v1011_v5 }
 0x30b   :  { %7216 = vmatpush1.bf16.msra.mxu0 %v8823_v45  ;;  %v8904_v45 = vcombine.high %v999_v37, %v1003_v26  ;;  %v9032_v19 = vcombine.high %v1127_v25, %v1131_v38  ;;  %v1119_v22 = vld [vmem:[#allocation5 + $0x1f90] sm:$0xff]  ;;  %v9031_v55 = vcombine.low %v1127_v25, %v1131_v38 }
 0x30c   :  { %7217 = vmatprep.subr.bf16.mxu0 %v8816_v46  ;;  %v995_v46 = vld [vmem:[#allocation5 + $0x1bb0] sm:$0xff] }
 0x30d   :  { %7257 = vmatpush1.bf16.msra.mxu1 %v8951_v33  ;;  %v991_v33 = vld [vmem:[#allocation5 + $0x1b90] sm:$0xff] }
 0x30e   :  { %7258 = vmatprep.subr.bf16.mxu1 %v8944_v50  ;;  %v1123_v50 = vld [vmem:[#allocation5 + $0x1fb0] sm:$0xff]  ;;  %v8896_v56 = vcombine.high %v991_v33, %v995_v46  ;;  %v8895_v63 = vcombine.low %v991_v33, %v995_v46 }
 0x30f   :  { %7218 = vmatpush1.bf16.msra.mxu0 %v8815_v60  ;;  %v9024_v57 = vcombine.high %v1119_v22, %v1123_v50  ;;  %v983_v60 = vld [vmem:[#allocation5 + $0x1b50] sm:$0xff]  ;;  %v9023_v10 = vcombine.low %v1119_v22, %v1123_v50 }
 0x310   :  { %7219 = vmatprep.subr.bf16.mxu0 %v8808_v62  ;;  %v1111_v62 = vld [vmem:[#allocation5 + $0x1f50] sm:$0xff] }
 0x311   :  { %7259 = vmatpush1.bf16.msra.mxu1 %v8943_v61  ;;  %v987_v61 = vld [vmem:[#allocation5 + $0x1b70] sm:$0xff] }
 0x312   :  { %7260 = vmatprep.subr.bf16.mxu1 %v8936_v7  ;;  %v1115_v7 = vld [vmem:[#allocation5 + $0x1f70] sm:$0xff]  ;;  %v8888_v2 = vcombine.high %v983_v60, %v987_v61  ;;  %v8887_v6 = vcombine.low %v983_v60, %v987_v61 }
 0x313   :  { %7220 = vmatpush1.bf16.msra.mxu0 %v8807_v11  ;;  %v9016_v3 = vcombine.high %v1111_v62, %v1115_v7  ;;  %v975_v11 = vld [vmem:[#allocation5 + $0x1b10] sm:$0xff]  ;;  %v9015_v17 = vcombine.low %v1111_v62, %v1115_v7 }
 0x314   :  { %7221 = vmatprep.subr.bf16.mxu0 %v8800_v39  ;;  %v1103_v39 = vld [vmem:[#allocation5 + $0x1f10] sm:$0xff] }
 0x315   :  { %7261 = vmatpush1.bf16.msra.mxu1 %v8935_v12  ;;  %v979_v12 = vld [vmem:[#allocation5 + $0x1b30] sm:$0xff] }
 0x316   :  { %7262 = vmatprep.subr.bf16.mxu1 %v8928_v1  ;;  %v1107_v1 = vld [vmem:[#allocation5 + $0x1f30] sm:$0xff]  ;;  %v8880_v24 = vcombine.high %v975_v11, %v979_v12  ;;  %v8879_v28 = vcombine.low %v975_v11, %v979_v12 }
 0x317   :  { %7222 = vmatpush1.bf16.msra.mxu0 %v8799_v42  ;;  %v9008_v13 = vcombine.high %v1103_v39, %v1107_v1  ;;  %v967_v42 = vld [vmem:[#allocation5 + $0x1ad0] sm:$0xff]  ;;  %v9007_v54 = vcombine.low %v1103_v39, %v1107_v1 }
 0x318   :  { %7223 = vmatprep.subr.bf16.mxu0 %v8792_v0  ;;  %v1095_v0 = vld [vmem:[#allocation5 + $0x1ed0] sm:$0xff] }
 0x319   :  { %7263 = vmatpush1.bf16.msra.mxu1 %v8927_v21  ;;  %v971_v21 = vld [vmem:[#allocation5 + $0x1af0] sm:$0xff] }
 0x31a   :  { %7264 = vmatprep.subr.bf16.mxu1 %v8920_v53  ;;  %v1099_v53 = vld [vmem:[#allocation5 + $0x1ef0] sm:$0xff]  ;;  %v8872_v30 = vcombine.high %v967_v42, %v971_v21  ;;  %v8871_v37 = vcombine.low %v967_v42, %v971_v21 }
 0x31b   :  { %7224 = vmatpush1.bf16.msra.mxu0 %v8791_v14  ;;  %v9000_v5 = vcombine.high %v1095_v0, %v1099_v53  ;;  %v959_v14 = vld [vmem:[#allocation5 + $0x1a90] sm:$0xff]  ;;  %v8999_v26 = vcombine.low %v1095_v0, %v1099_v53 }
 0x31c   :  { %7225 = vmatprep.subr.bf16.mxu0 %v8784_v34  ;;  %v1087_v34 = vld [vmem:[#allocation5 + $0x1e90] sm:$0xff] }
 0x31d   :  { %7265 = vmatpush1.bf16.msra.mxu1 %v8919_v32  ;;  %v963_v32 = vld [vmem:[#allocation5 + $0x1ab0] sm:$0xff] }
 0x31e   :  { %7266 = vmatprep.subr.bf16.mxu1 %v8912_v35  ;;  %v1091_v35 = vld [vmem:[#allocation5 + $0x1eb0] sm:$0xff]  ;;  %v8864_v25 = vcombine.high %v959_v14, %v963_v32  ;;  %v8863_v33 = vcombine.low %v959_v14, %v963_v32  ;;  %v284_v14 = vld [vmem:[#allocation5 + $0x578] sm:$0xff] }
 0x31f   :  { %7226 = vmatpush1.bf16.msra.mxu0 %v8783_v41  ;;  %v8992_v38 = vcombine.high %v1087_v34, %v1091_v35  ;;  %v951_v41 = vld [vmem:[#allocation5 + $0x1a50] sm:$0xff]  ;;  %v8991_v46 = vcombine.low %v1087_v34, %v1091_v35 }
 0x320   :  { %7227 = vmatprep.subr.bf16.mxu0 %v8904_v45  ;;  %v1079_v45 = vld [vmem:[#allocation5 + $0x1e50] sm:$0xff] }
 0x321   :  { %7267 = vmatpush1.bf16.msra.mxu1 %v8911_v44  ;;  %v955_v44 = vld [vmem:[#allocation5 + $0x1a70] sm:$0xff] }
 0x322   :  { %7268 = vmatprep.subr.bf16.mxu1 %v9032_v19  ;;  %v1083_v19 = vld [vmem:[#allocation5 + $0x1e70] sm:$0xff]  ;;  %v8856_v22 = vcombine.high %v951_v41, %v955_v44  ;;  %v8855_v60 = vcombine.low %v951_v41, %v955_v44  ;;  %v144_v44 = vld [vmem:[#allocation5 + $0x118] sm:$0xff] }
 0x323   :  { %7228 = vmatpush2.bf16.msra.mxu0 %v8903_v52  ;;  %v8984_v50 = vcombine.high %v1079_v45, %v1083_v19  ;;  %v943_v52 = vld [vmem:[#allocation5 + $0x1a10] sm:$0xff]  ;;  %v8983_v61 = vcombine.low %v1079_v45, %v1083_v19  ;;  %v148_v45 = vld [vmem:[#allocation5 + $0x138] sm:$0xff] }
 0x324   :  { %7229 = vmatprep.subr.bf16.mxu0 %v8896_v56  ;;  %v1071_v56 = vld [vmem:[#allocation5 + $0x1e10] sm:$0xff] }
 0x325   :  { %7269 = vmatpush2.bf16.msra.mxu1 %v9031_v55  ;;  %v947_v55 = vld [vmem:[#allocation5 + $0x1a30] sm:$0xff] }
 0x326   :  { %7270 = vmatprep.subr.bf16.mxu1 %v9024_v57  ;;  %v1075_v57 = vld [vmem:[#allocation5 + $0x1e30] sm:$0xff]  ;;  %v8848_v62 = vcombine.high %v943_v52, %v947_v55  ;;  %v8847_v11 = vcombine.low %v943_v52, %v947_v55 }
 0x327   :  { %7230 = vmatpush2.bf16.msra.mxu0 %v8895_v63  ;;  %v8976_v7 = vcombine.high %v1071_v56, %v1075_v57  ;;  %v168_v63 = vld [vmem:[#allocation5 + $0x1d8] sm:$0xff]  ;;  %v8975_v12 = vcombine.low %v1071_v56, %v1075_v57  ;;  %v8050_v57 = vcombine.high %v144_v44, %v148_v45 }
 0x328   :  { %7231 = vmatprep.subr.bf16.mxu0 %v8888_v2  ;;  %v296_v2 = vld [vmem:[#allocation5 + $0x5d8] sm:$0xff] }
 0x329   :  { %7271 = vmatpush2.bf16.msra.mxu1 %v9023_v10  ;;  %v172_v10 = vld [vmem:[#allocation5 + $0x1f8] sm:$0xff] }
 0x32a   :  { %7272 = vmatprep.subr.bf16.mxu1 %v9016_v3  ;;  %v300_v3 = vld [vmem:[#allocation5 + $0x5f8] sm:$0xff]  ;;  %v8074_v39 = vcombine.high %v168_v63, %v172_v10  ;;  %v8073_v42 = vcombine.low %v168_v63, %v172_v10  ;;  %v8049_v10 = vcombine.low %v144_v44, %v148_v45 }
 0x32b   :  { %7232 = vmatpush2.bf16.msra.mxu0 %v8887_v6  ;;  %v8202_v1 = vcombine.high %v296_v2, %v300_v3  ;;  %v160_v6 = vld [vmem:[#allocation5 + $0x198] sm:$0xff]  ;;  %v8201_v21 = vcombine.low %v296_v2, %v300_v3 }
 0x32c   :  { %7233 = vmatprep.subr.bf16.mxu0 %v8880_v24  ;;  %v288_v24 = vld [vmem:[#allocation5 + $0x598] sm:$0xff] }
 0x32d   :  { %7273 = vmatpush2.bf16.msra.mxu1 %v9015_v17  ;;  %v164_v17 = vld [vmem:[#allocation5 + $0x1b8] sm:$0xff] }
 0x32e   :  { %7274 = vmatprep.subr.bf16.mxu1 %v9008_v13  ;;  %v292_v13 = vld [vmem:[#allocation5 + $0x5b8] sm:$0xff]  ;;  %v8066_v0 = vcombine.high %v160_v6, %v164_v17  ;;  %v8065_v34 = vcombine.low %v160_v6, %v164_v17 }
 0x32f   :  { %7234 = vmatpush2.bf16.msra.mxu0 %v8879_v28  ;;  %v8194_v53 = vcombine.high %v288_v24, %v292_v13  ;;  %v152_v28 = vld [vmem:[#allocation5 + $0x158] sm:$0xff] }
 0x330   :  { %7235 = vmatprep.subr.bf16.mxu0 %v8872_v30  ;;  %v268_v63 = vld [vmem:[#allocation5 + $0x4f8] sm:$0xff] }
 0x331   :  { %7275 = vmatpush2.bf16.msra.mxu1 %v9007_v54  ;;  %v156_v54 = vld [vmem:[#allocation5 + $0x178] sm:$0xff] }
 0x332   :  { %7276 = vmatprep.subr.bf16.mxu1 %v9000_v5  ;;  %v280_v5 = vld [vmem:[#allocation5 + $0x558] sm:$0xff]  ;;  %v8057_v52 = vcombine.low %v152_v28, %v156_v54 }
 0x333   :  { %7236 = vmatpush2.bf16.msra.mxu0 %v8871_v37  ;;  %v8186_v41 = vcombine.high %v280_v5, %v284_v14  ;;  %v8185_v56 = vcombine.low %v280_v5, %v284_v14  ;;  %v112_v14 = vld [vmem:[#allocation5 + $0x18] sm:$0xff] }
 0x334   :  { %7237 = vmatprep.subr.bf16.mxu0 %v8864_v25  ;;  %v8058_v25 = vcombine.high %v152_v28, %v156_v54  ;;  %v232_v44 = vld [vmem:[#allocation5 + $0x3d8] sm:$0xff] }
 0x335   :  { %7277 = vmatpush2.bf16.msra.mxu1 %v8999_v26  ;;  %v8193_v26 = vcombine.low %v288_v24, %v292_v13  ;;  %v236_v45 = vld [vmem:[#allocation5 + $0x3f8] sm:$0xff] }
 0x336   :  { %7278 = vmatprep.subr.bf16.mxu1 %v8992_v38 }
 0x337   :  { %7238 = vmatpush2.bf16.msra.mxu0 %v8863_v33 }
 0x338   :  { %7239 = vmatprep.subr.bf16.mxu0 %v8856_v22  ;;  %v276_v22 = vld [vmem:[#allocation5 + $0x538] sm:$0xff] }
 0x339   :  { %7279 = vmatpush2.bf16.msra.mxu1 %v8991_v46  ;;  %v272_v46 = vld [vmem:[#allocation5 + $0x518] sm:$0xff] }
 0x33a   :  { %7280 = vmatprep.subr.bf16.mxu1 %v8984_v50 }
 0x33b   :  { %7240 = vmatpush2.bf16.msra.mxu0 %v8855_v60 }
 0x33c   :  { %7241 = vmatprep.subr.bf16.mxu0 %v8848_v62  ;;  %v136_v62 = vld [vmem:[#allocation5 + $0xd8] sm:$0xff] }
 0x33d   :  { %7281 = vmatpush2.bf16.msra.mxu1 %v8983_v61  ;;  %v8178_v61 = vcombine.high %v272_v46, %v276_v22 }
 0x33e   :  { %7282 = vmatprep.subr.bf16.mxu1 %v8976_v7  ;;  %v264_v7 = vld [vmem:[#allocation5 + $0x4d8] sm:$0xff] }
 0x33f   :  { %7242 = vmatpush2.bf16.msra.mxu0 %v8847_v11  ;;  %v8170_v3 = vcombine.high %v264_v7, %v268_v63  ;;  %v128_v11 = vld [vmem:[#allocation5 + $0x98] sm:$0xff]  ;;  %v8169_v17 = vcombine.low %v264_v7, %v268_v63 }
 0x340   :  { %7293 = vmatprep.subr.bf16.mxu0 %v8074_v39  ;;  %v256_v39 = vld [vmem:[#allocation5 + $0x498] sm:$0xff] }
 0x341   :  { %7283 = vmatpush2.bf16.msra.mxu1 %v8975_v12  ;;  %v132_v12 = vld [vmem:[#allocation5 + $0xb8] sm:$0xff] }
 0x342   :  { %7334 = vmatprep.subr.bf16.mxu1 %v8202_v1  ;;  %v6999_v30 = vpop.f32.mrf.mxu0  ;;  %7244 = vmatmul.mubr.bf16.vlgmr.msra.gmra.mxu0 %v9353_v48  ;;  %v260_v1 = vld [vmem:[#allocation5 + $0x4b8] sm:$0xff]  ;;  %v8034_v24 = vcombine.high %v128_v11, %v132_v12  ;;  %v8033_v28 = vcombine.low %v128_v11, %v132_v12 }
 0x343   :  { %7294 = vmatpush1.bf16.msra.mxu0 %v8073_v42  ;;  %7325 = vmatprep.mubr.bf16.mxu0 %v9271_v58  ;;  %v140_v58 = vld [vmem:[#allocation5 + $0xf8] sm:$0xff]  ;;  %v8162_v13 = vcombine.high %v256_v39, %v260_v1  ;;  %v8161_v54 = vcombine.low %v256_v39, %v260_v1 }
 0x344   :  { %v7040_v32 = vpop.f32.mrf.mxu1  ;;  %7285 = vmatmul.mubr.bf16.vlgmr.msra.gmra.mxu1 %v9357_v51  ;;  %v7001_v37 = vpop.f32.mrf.mxu0  ;;  %7295 = vmatprep.subr.bf16.mxu0 %v8066_v0  ;;  %v8042_v2 = vcombine.high %v136_v62, %v140_v58  ;;  %v8041_v6 = vcombine.low %v136_v62, %v140_v58  ;;  %v120_v42 = vld [vmem:[#allocation5 + $0x58] sm:$0xff]  ;;  %v8137_v62 = vcombine.low %v232_v44, %v236_v45 }
 0x345   :  { %v9437_v35 = vadd.f32 %v7040_v32, %v6999_v30  ;;  %7335 = vmatpush1.bf16.msra.mxu1 %v8201_v21  ;;  %7366 = vmatprep.mubr.bf16.mxu1 %v9275_v59  ;;  %v8177_v59 = vcombine.low %v272_v46, %v276_v22  ;;  %v124_v21 = vld [vmem:[#allocation5 + $0x78] sm:$0xff] }
 0x346   :  { %v7042_v38 = vpop.f32.mrf.mxu1  ;;  %7336 = vmatprep.subr.bf16.mxu1 %v8194_v53  ;;  %v7003_v33 = vpop.f32.mrf.mxu0  ;;  %v248_v0 = vld [vmem:[#allocation5 + $0x458] sm:$0xff]  ;;  %v8026_v30 = vcombine.high %v120_v42, %v124_v21 }
 0x347   :  { %v9440_v19 = vadd.f32 %v7042_v38, %v7001_v37  ;;  %7296 = vmatpush1.bf16.msra.mxu0 %v8065_v34  ;;  %v252_v53 = vld [vmem:[#allocation5 + $0x478] sm:$0xff] }
 0x348   :  { %v7044_v50 = vpop.f32.mrf.mxu1  ;;  %v7004_v55 = vpop.f32.mrf.mxu0  ;;  %7297 = vmatprep.subr.bf16.mxu0 %v8058_v25  ;;  %v8154_v5 = vcombine.high %v248_v0, %v252_v53  ;;  %v116_v32 = vld [vmem:[#allocation5 + $0x38] sm:$0xff]  ;;  %v8153_v25 = vcombine.low %v248_v0, %v252_v53 }
 0x349   :  { %7337 = vmatpush1.bf16.msra.mxu1 %v8193_v26  ;;  %v240_v34 = vld [vmem:[#allocation5 + $0x418] sm:$0xff]  ;;  %v8025_v26 = vcombine.low %v120_v42, %v124_v21  ;;  %v8018_v38 = vcombine.high %v112_v14, %v116_v32  ;;  %v8017_v22 = vcombine.low %v112_v14, %v116_v32 }
 0x34a   :  { %v7045_v60 = vpop.f32.mrf.mxu1  ;;  %7338 = vmatprep.subr.bf16.mxu1 %v8186_v41  ;;  %v244_v37 = vld [vmem:[#allocation5 + $0x438] sm:$0xff] }
 0x34b   :  { %7298 = vmatpush1.bf16.msra.mxu0 %v8057_v52  ;;  %v8146_v41 = vcombine.high %v240_v34, %v244_v37  ;;  %v360_v33 = vld [vmem:[#allocation5 + $0x7d8] sm:$0xff]  ;;  %v8145_v50 = vcombine.low %v240_v34, %v244_v37  ;;  %v8138_v52 = vcombine.high %v232_v44, %v236_v45 }
 0x34c   :  { %7299 = vmatprep.subr.bf16.mxu0 %v8050_v57  ;;  %v364_v46 = vld [vmem:[#allocation5 + $0x7f8] sm:$0xff] }
 0x34d   :  { %7339 = vmatpush1.bf16.msra.mxu1 %v8185_v56  ;;  %v8266_v55 = vcombine.high %v360_v33, %v364_v46  ;;  %v224_v56 = vld [vmem:[#allocation5 + $0x398] sm:$0xff]  ;;  %v8265_v58 = vcombine.low %v360_v33, %v364_v46 }
 0x34e   :  { %7340 = vmatprep.subr.bf16.mxu1 %v8178_v61  ;;  %v228_v57 = vld [vmem:[#allocation5 + $0x3b8] sm:$0xff] }
 0x34f   :  { %7300 = vmatpush1.bf16.msra.mxu0 %v8049_v10  ;;  %v352_v60 = vld [vmem:[#allocation5 + $0x798] sm:$0xff]  ;;  %v8130_v7 = vcombine.high %v224_v56, %v228_v57  ;;  %v8129_v11 = vcombine.low %v224_v56, %v228_v57 }
 0x350   :  { %7301 = vmatprep.subr.bf16.mxu0 %v8042_v2  ;;  %v356_v61 = vld [vmem:[#allocation5 + $0x7b8] sm:$0xff] }
 0x351   :  { %7341 = vmatpush1.bf16.msra.mxu1 %v8177_v59  ;;  %v8258_v63 = vcombine.high %v352_v60, %v356_v61  ;;  %v216_v10 = vld [vmem:[#allocation5 + $0x358] sm:$0xff]  ;;  %v8257_v12 = vcombine.low %v352_v60, %v356_v61 }
 0x352   :  { %7342 = vmatprep.subr.bf16.mxu1 %v8170_v3  ;;  %v220_v59 = vld [vmem:[#allocation5 + $0x378] sm:$0xff] }
 0x353   :  { %7302 = vmatpush1.bf16.msra.mxu0 %v8041_v6  ;;  %v344_v2 = vld [vmem:[#allocation5 + $0x758] sm:$0xff]  ;;  %v8122_v39 = vcombine.high %v216_v10, %v220_v59  ;;  %v8121_v42 = vcombine.low %v216_v10, %v220_v59 }
 0x354   :  { %7303 = vmatprep.subr.bf16.mxu0 %v8034_v24  ;;  %v348_v3 = vld [vmem:[#allocation5 + $0x778] sm:$0xff] }
 0x355   :  { %7343 = vmatpush1.bf16.msra.mxu1 %v8169_v17  ;;  %v8250_v1 = vcombine.high %v344_v2, %v348_v3  ;;  %v208_v6 = vld [vmem:[#allocation5 + $0x318] sm:$0xff]  ;;  %v8249_v21 = vcombine.low %v344_v2, %v348_v3 }
 0x356   :  { %7344 = vmatprep.subr.bf16.mxu1 %v8162_v13  ;;  %v212_v17 = vld [vmem:[#allocation5 + $0x338] sm:$0xff] }
 0x357   :  { %7304 = vmatpush1.bf16.msra.mxu0 %v8033_v28  ;;  %v336_v24 = vld [vmem:[#allocation5 + $0x718] sm:$0xff]  ;;  %v8114_v0 = vcombine.high %v208_v6, %v212_v17  ;;  %v8113_v14 = vcombine.low %v208_v6, %v212_v17 }
 0x358   :  { %7305 = vmatprep.subr.bf16.mxu0 %v8026_v30  ;;  %v340_v13 = vld [vmem:[#allocation5 + $0x738] sm:$0xff] }
 0x359   :  { %7345 = vmatpush1.bf16.msra.mxu1 %v8161_v54  ;;  %v8242_v53 = vcombine.high %v336_v24, %v340_v13  ;;  %v200_v28 = vld [vmem:[#allocation5 + $0x2d8] sm:$0xff]  ;;  %v8241_v32 = vcombine.low %v336_v24, %v340_v13 }
 0x35a   :  { %7346 = vmatprep.subr.bf16.mxu1 %v8154_v5  ;;  %v204_v54 = vld [vmem:[#allocation5 + $0x2f8] sm:$0xff] }
 0x35b   :  { %7306 = vmatpush1.bf16.msra.mxu0 %v8025_v26  ;;  %v328_v30 = vld [vmem:[#allocation5 + $0x6d8] sm:$0xff]  ;;  %v8106_v34 = vcombine.high %v200_v28, %v204_v54  ;;  %v8105_v44 = vcombine.low %v200_v28, %v204_v54 }
 0x35c   :  { %7307 = vmatprep.subr.bf16.mxu0 %v8018_v38  ;;  %v332_v5 = vld [vmem:[#allocation5 + $0x6f8] sm:$0xff] }
 0x35d   :  { %7347 = vmatpush1.bf16.msra.mxu1 %v8153_v25  ;;  %v8234_v37 = vcombine.high %v328_v30, %v332_v5  ;;  %v192_v26 = vld [vmem:[#allocation5 + $0x298] sm:$0xff]  ;;  %v8233_v45 = vcombine.low %v328_v30, %v332_v5 }
 0x35e   :  { %7348 = vmatprep.subr.bf16.mxu1 %v8146_v41  ;;  %v196_v25 = vld [vmem:[#allocation5 + $0x2b8] sm:$0xff] }
 0x35f   :  { %7308 = vmatpush1.bf16.msra.mxu0 %v8017_v22  ;;  %v320_v38 = vld [vmem:[#allocation5 + $0x698] sm:$0xff]  ;;  %v8098_v33 = vcombine.high %v192_v26, %v196_v25  ;;  %v8097_v56 = vcombine.low %v192_v26, %v196_v25 }
 0x360   :  { %7309 = vmatprep.subr.bf16.mxu0 %v8138_v52  ;;  %v324_v41 = vld [vmem:[#allocation5 + $0x6b8] sm:$0xff] }
 0x361   :  { %7349 = vmatpush1.bf16.msra.mxu1 %v8145_v50  ;;  %v8226_v46 = vcombine.high %v320_v38, %v324_v41  ;;  %v184_v22 = vld [vmem:[#allocation5 + $0x258] sm:$0xff]  ;;  %v8225_v57 = vcombine.low %v320_v38, %v324_v41 }
 0x362   :  { %7350 = vmatprep.subr.bf16.mxu1 %v8266_v55  ;;  %v188_v50 = vld [vmem:[#allocation5 + $0x278] sm:$0xff] }
 0x363   :  { %7310 = vmatpush2.bf16.msra.mxu0 %v8137_v62  ;;  %v312_v52 = vld [vmem:[#allocation5 + $0x658] sm:$0xff]  ;;  %v8090_v60 = vcombine.high %v184_v22, %v188_v50  ;;  %v8089_v10 = vcombine.low %v184_v22, %v188_v50 }
 0x364   :  { %7311 = vmatprep.subr.bf16.mxu0 %v8130_v7  ;;  %v316_v55 = vld [vmem:[#allocation5 + $0x678] sm:$0xff] }
 0x365   :  { %7351 = vmatpush2.bf16.msra.mxu1 %v8265_v58  ;;  %v8218_v61 = vcombine.high %v312_v52, %v316_v55  ;;  %v176_v62 = vld [vmem:[#allocation5 + $0x218] sm:$0xff]  ;;  %v8217_v59 = vcombine.low %v312_v52, %v316_v55 }
 0x366   :  { %7352 = vmatprep.subr.bf16.mxu1 %v8258_v63  ;;  %v180_v58 = vld [vmem:[#allocation5 + $0x238] sm:$0xff] }
 0x367   :  { %7312 = vmatpush2.bf16.msra.mxu0 %v8129_v11  ;;  %v304_v7 = vld [vmem:[#allocation5 + $0x618] sm:$0xff]  ;;  %v8082_v2 = vcombine.high %v176_v62, %v180_v58  ;;  %v8081_v6 = vcombine.low %v176_v62, %v180_v58 }
 0x368   :  { %7313 = vmatprep.subr.bf16.mxu0 %v8122_v39  ;;  %v308_v63 = vld [vmem:[#allocation5 + $0x638] sm:$0xff] }
 0x369   :  { %7353 = vmatpush2.bf16.msra.mxu1 %v8257_v12  ;;  %v8210_v3 = vcombine.high %v304_v7, %v308_v63  ;;  %v424_v11 = vld [vmem:[#allocation5 + $0x9d8] sm:$0xff]  ;;  %v8209_v17 = vcombine.low %v304_v7, %v308_v63 }
 0x36a   :  { %7354 = vmatprep.subr.bf16.mxu1 %v8250_v1  ;;  %v428_v12 = vld [vmem:[#allocation5 + $0x9f8] sm:$0xff] }
 0x36b   :  { %7314 = vmatpush2.bf16.msra.mxu0 %v8121_v42  ;;  %v552_v39 = vld [vmem:[#allocation5 + $0xdd8] sm:$0xff]  ;;  %v8330_v24 = vcombine.high %v424_v11, %v428_v12  ;;  %v8329_v28 = vcombine.low %v424_v11, %v428_v12 }
 0x36c   :  { %7315 = vmatprep.subr.bf16.mxu0 %v8114_v0  ;;  %v556_v1 = vld [vmem:[#allocation5 + $0xdf8] sm:$0xff] }
 0x36d   :  { %7355 = vmatpush2.bf16.msra.mxu1 %v8249_v21  ;;  %v8458_v13 = vcombine.high %v552_v39, %v556_v1  ;;  %v416_v42 = vld [vmem:[#allocation5 + $0x998] sm:$0xff]  ;;  %v8457_v54 = vcombine.low %v552_v39, %v556_v1 }
 0x36e   :  { %7356 = vmatprep.subr.bf16.mxu1 %v8242_v53  ;;  %v420_v21 = vld [vmem:[#allocation5 + $0x9b8] sm:$0xff] }
 0x36f   :  { %7316 = vmatpush2.bf16.msra.mxu0 %v8113_v14  ;;  %v544_v0 = vld [vmem:[#allocation5 + $0xd98] sm:$0xff]  ;;  %v8322_v30 = vcombine.high %v416_v42, %v420_v21  ;;  %v8321_v41 = vcombine.low %v416_v42, %v420_v21 }
 0x370   :  { %7317 = vmatprep.subr.bf16.mxu0 %v8106_v34  ;;  %v548_v53 = vld [vmem:[#allocation5 + $0xdb8] sm:$0xff] }
 0x371   :  { %7357 = vmatpush2.bf16.msra.mxu1 %v8241_v32  ;;  %v8450_v5 = vcombine.high %v544_v0, %v548_v53  ;;  %v408_v14 = vld [vmem:[#allocation5 + $0x958] sm:$0xff] }
 0x372   :  { %7358 = vmatprep.subr.bf16.mxu1 %v8234_v37  ;;  %v412_v32 = vld [vmem:[#allocation5 + $0x978] sm:$0xff] }
 0x373   :  { %7318 = vmatpush2.bf16.msra.mxu0 %v8105_v44  ;;  %v536_v37 = vld [vmem:[#allocation5 + $0xd58] sm:$0xff] }
 0x374   :  { %7319 = vmatprep.subr.bf16.mxu0 %v8098_v33  ;;  %v540_v26 = vld [vmem:[#allocation5 + $0xd78] sm:$0xff]  ;;  %v8314_v33 = vcombine.high %v408_v14, %v412_v32 }
 0x375   :  { %7359 = vmatpush2.bf16.msra.mxu1 %v8233_v45  ;;  %v8449_v45 = vcombine.low %v544_v0, %v548_v53  ;;  %v400_v52 = vld [vmem:[#allocation5 + $0x918] sm:$0xff] }
 0x376   :  { %7360 = vmatprep.subr.bf16.mxu1 %v8226_v46  ;;  %v404_v55 = vld [vmem:[#allocation5 + $0x938] sm:$0xff] }
 0x377   :  { %7320 = vmatpush2.bf16.msra.mxu0 %v8097_v56  ;;  %v532_v56 = vld [vmem:[#allocation5 + $0xd38] sm:$0xff]  ;;  %v8306_v58 = vcombine.high %v400_v52, %v404_v55 }
 0x378   :  { %7321 = vmatprep.subr.bf16.mxu0 %v8090_v60  ;;  %v384_v39 = vld [vmem:[#allocation5 + $0x898] sm:$0xff] }
 0x379   :  { %7361 = vmatpush2.bf16.msra.mxu1 %v8225_v57  ;;  %v388_v1 = vld [vmem:[#allocation5 + $0x8b8] sm:$0xff] }
 0x37a   :  { %7362 = vmatprep.subr.bf16.mxu1 %v8218_v61  ;;  %v8313_v61 = vcombine.low %v408_v14, %v412_v32  ;;  %v8290_v42 = vcombine.high %v384_v39, %v388_v1  ;;  %v376_v0 = vld [vmem:[#allocation5 + $0x858] sm:$0xff] }
 0x37b   :  { %7322 = vmatpush2.bf16.msra.mxu0 %v8089_v10  ;;  %v392_v10 = vld [vmem:[#allocation5 + $0x8d8] sm:$0xff] }
 0x37c   :  { %7323 = vmatprep.subr.bf16.mxu0 %v8082_v2  ;;  %v524_v2 = vld [vmem:[#allocation5 + $0xcf8] sm:$0xff] }
 0x37d   :  { %7363 = vmatpush2.bf16.msra.mxu1 %v8217_v59  ;;  %v520_v59 = vld [vmem:[#allocation5 + $0xcd8] sm:$0xff] }
 0x37e   :  { %7364 = vmatprep.subr.bf16.mxu1 %v8210_v3  ;;  %v8305_v3 = vcombine.low %v400_v52, %v404_v55  ;;  %v8426_v12 = vcombine.high %v520_v59, %v524_v2  ;;  %v380_v53 = vld [vmem:[#allocation5 + $0x878] sm:$0xff] }
 0x37f   :  { %7324 = vmatpush2.bf16.msra.mxu0 %v8081_v6  ;;  %v512_v6 = vld [vmem:[#allocation5 + $0xc98] sm:$0xff]  ;;  %v8282_v14 = vcombine.high %v376_v0, %v380_v53 }
 0x380   :  { %7375 = vmatprep.subr.bf16.mxu0 %v8330_v24 }
 0x381   :  { %7365 = vmatpush2.bf16.msra.mxu1 %v8209_v17  ;;  %v516_v17 = vld [vmem:[#allocation5 + $0xcb8] sm:$0xff] }
 0x382   :  { %7416 = vmatprep.subr.bf16.mxu1 %v8458_v13  ;;  %v7081_v34 = vpop.f32.mrf.mxu0  ;;  %7326 = vmatmul.mubr.bf16.vlgmr.msra.gmra.mxu0 %v9281_v16  ;;  %v8442_v16 = vcombine.high %v536_v37, %v540_v26  ;;  %v8425_v13 = vcombine.low %v520_v59, %v524_v2  ;;  %v8418_v21 = vcombine.high %v512_v6, %v516_v17  ;;  %v600_v59 = vld [vmem:[#allocation5 + $0xf58] sm:$0xff] }
 0x383   :  { %v7082_v25 = vadd.f32 %v7081_v34, %v9437_v35  ;;  %7376 = vmatpush1.bf16.msra.mxu0 %v8329_v28  ;;  %7407 = vmatprep.mubr.bf16.mxu0 %v9293_v27  ;;  %v396_v27 = vld [vmem:[#allocation5 + $0x8f8] sm:$0xff] }
 0x384   :  { %v7122_v38 = vpop.f32.mrf.mxu1  ;;  %7367 = vmatmul.mubr.bf16.vlgmr.msra.gmra.mxu1 %v9287_v20  ;;  %v7083_v44 = vpop.f32.mrf.mxu0  ;;  %7377 = vmatprep.subr.bf16.mxu0 %v8322_v30  ;;  %v528_v20 = vld [vmem:[#allocation5 + $0xd18] sm:$0xff]  ;;  %v8298_v11 = vcombine.high %v392_v10, %v396_v27  ;;  %v8297_v24 = vcombine.low %v392_v10, %v396_v27  ;;  %v8289_v30 = vcombine.low %v384_v39, %v388_v1 }
 0x385   :  { %7417 = vmatpush1.bf16.msra.mxu1 %v8457_v54  ;;  %v9446_v46 = vadd.f32 %v7122_v38, %v7082_v25  ;;  %v7084_v22 = vadd.f32 %v7083_v44, %v9440_v19  ;;  %7448 = vmatprep.mubr.bf16.mxu1 %v9298_v29  ;;  %v8441_v19 = vcombine.low %v536_v37, %v540_v26  ;;  %v504_v28 = vld [vmem:[#allocation5 + $0xc58] sm:$0xff] }
 0x386   :  { %v7124_v50 = vpop.f32.mrf.mxu1  ;;  %7418 = vmatprep.subr.bf16.mxu1 %v8450_v5  ;;  %v7085_v35 = vpop.f32.mrf.mxu0  ;;  %v8434_v63 = vcombine.high %v528_v20, %v532_v56  ;;  %v8433_v29 = vcombine.low %v528_v20, %v532_v56  ;;  %v508_v54 = vld [vmem:[#allocation5 + $0xc78] sm:$0xff]  ;;  %v8417_v5 = vcombine.low %v512_v6, %v516_v17  ;;  %v8281_v38 = vcombine.low %v376_v0, %v380_v53 }
 0x387   :  { %v9451_v57 = vadd.f32 %v7124_v50, %v7084_v22  ;;  %7378 = vmatpush1.bf16.msra.mxu0 %v8321_v41  ;;  %v8410_v32 = vcombine.high %v504_v28, %v508_v54  ;;  %v368_v34 = vld [vmem:[#allocation5 + $0x818] sm:$0xff]  ;;  %v8409_v41 = vcombine.low %v504_v28, %v508_v54 }
 0x388   :  { %v7126_v60 = vpop.f32.mrf.mxu1  ;;  %v7086_v62 = vpop.f32.mrf.mxu0  ;;  %7379 = vmatprep.subr.bf16.mxu0 %v8314_v33  ;;  %v372_v37 = vld [vmem:[#allocation5 + $0x838] sm:$0xff] }
 0x389   :  { %7419 = vmatpush1.bf16.msra.mxu1 %v8449_v45  ;;  %v496_v26 = vld [vmem:[#allocation5 + $0xc18] sm:$0xff]  ;;  %v8274_v44 = vcombine.high %v368_v34, %v372_v37  ;;  %v8273_v52 = vcombine.low %v368_v34, %v372_v37 }
 0x38a   :  { %v7127_v7 = vpop.f32.mrf.mxu1  ;;  %7420 = vmatprep.subr.bf16.mxu1 %v8442_v16  ;;  %v500_v25 = vld [vmem:[#allocation5 + $0xc38] sm:$0xff] }
 0x38b   :  { %7380 = vmatpush1.bf16.msra.mxu0 %v8313_v61  ;;  %v8402_v45 = vcombine.high %v496_v26, %v500_v25  ;;  %v488_v33 = vld [vmem:[#allocation5 + $0xbd8] sm:$0xff]  ;;  %v8401_v55 = vcombine.low %v496_v26, %v500_v25 }
 0x38c   :  { %7381 = vmatprep.subr.bf16.mxu0 %v8306_v58  ;;  %v492_v22 = vld [vmem:[#allocation5 + $0xbf8] sm:$0xff] }
 0x38d   :  { %7421 = vmatpush1.bf16.msra.mxu1 %v8441_v19  ;;  %v616_v50 = vld [vmem:[#allocation5 + $0xfd8] sm:$0xff]  ;;  %v8394_v35 = vcombine.high %v488_v33, %v492_v22  ;;  %v8393_v19 = vcombine.low %v488_v33, %v492_v22 }
 0x38e   :  { %7422 = vmatprep.subr.bf16.mxu1 %v8434_v63  ;;  %v620_v16 = vld [vmem:[#allocation5 + $0xff8] sm:$0xff] }
 0x38f   :  { %7382 = vmatpush1.bf16.msra.mxu0 %v8305_v3  ;;  %v8522_v20 = vcombine.high %v616_v50, %v620_v16  ;;  %v480_v56 = vld [vmem:[#allocation5 + $0xb98] sm:$0xff]  ;;  %v8521_v58 = vcombine.low %v616_v50, %v620_v16 }
 0x390   :  { %7383 = vmatprep.subr.bf16.mxu0 %v8298_v11  ;;  %v484_v60 = vld [vmem:[#allocation5 + $0xbb8] sm:$0xff] }
 0x391   :  { %7423 = vmatpush1.bf16.msra.mxu1 %v8433_v29  ;;  %v608_v61 = vld [vmem:[#allocation5 + $0xf98] sm:$0xff]  ;;  %v8386_v7 = vcombine.high %v480_v56, %v484_v60  ;;  %v8385_v3 = vcombine.low %v480_v56, %v484_v60 }
 0x392   :  { %7424 = vmatprep.subr.bf16.mxu1 %v8426_v12  ;;  %v612_v62 = vld [vmem:[#allocation5 + $0xfb8] sm:$0xff] }
 0x393   :  { %7384 = vmatpush1.bf16.msra.mxu0 %v8297_v24  ;;  %v8514_v63 = vcombine.high %v608_v61, %v612_v62  ;;  %v472_v10 = vld [vmem:[#allocation5 + $0xb58] sm:$0xff]  ;;  %v8513_v29 = vcombine.low %v608_v61, %v612_v62 }
 0x394   :  { %7385 = vmatprep.subr.bf16.mxu0 %v8290_v42  ;;  %v476_v27 = vld [vmem:[#allocation5 + $0xb78] sm:$0xff] }
 0x395   :  { %7425 = vmatpush1.bf16.msra.mxu1 %v8425_v13  ;;  %v604_v2 = vld [vmem:[#allocation5 + $0xf78] sm:$0xff]  ;;  %v8378_v11 = vcombine.high %v472_v10, %v476_v27  ;;  %v8377_v24 = vcombine.low %v472_v10, %v476_v27 }
 0x396   :  { %7426 = vmatprep.subr.bf16.mxu1 %v8418_v21  ;;  %v8506_v12 = vcombine.high %v600_v59, %v604_v2  ;;  %v464_v39 = vld [vmem:[#allocation5 + $0xb18] sm:$0xff]  ;;  %v8505_v13 = vcombine.low %v600_v59, %v604_v2 }
 0x397   :  { %7386 = vmatpush1.bf16.msra.mxu0 %v8289_v30  ;;  %v468_v1 = vld [vmem:[#allocation5 + $0xb38] sm:$0xff] }
 0x398   :  { %7387 = vmatprep.subr.bf16.mxu0 %v8282_v14  ;;  %v592_v6 = vld [vmem:[#allocation5 + $0xf18] sm:$0xff]  ;;  %v8370_v42 = vcombine.high %v464_v39, %v468_v1  ;;  %v8369_v30 = vcombine.low %v464_v39, %v468_v1 }
 0x399   :  { %7427 = vmatpush1.bf16.msra.mxu1 %v8417_v5  ;;  %v596_v17 = vld [vmem:[#allocation5 + $0xf38] sm:$0xff] }
 0x39a   :  { %7428 = vmatprep.subr.bf16.mxu1 %v8410_v32  ;;  %v8498_v21 = vcombine.high %v592_v6, %v596_v17  ;;  %v456_v0 = vld [vmem:[#allocation5 + $0xad8] sm:$0xff]  ;;  %v8497_v5 = vcombine.low %v592_v6, %v596_v17 }
 0x39b   :  { %7388 = vmatpush1.bf16.msra.mxu0 %v8281_v38  ;;  %v460_v53 = vld [vmem:[#allocation5 + $0xaf8] sm:$0xff] }
 0x39c   :  { %7389 = vmatprep.subr.bf16.mxu0 %v8274_v44  ;;  %v584_v28 = vld [vmem:[#allocation5 + $0xed8] sm:$0xff]  ;;  %v8362_v14 = vcombine.high %v456_v0, %v460_v53  ;;  %v8361_v38 = vcombine.low %v456_v0, %v460_v53 }
 0x39d   :  { %7429 = vmatpush1.bf16.msra.mxu1 %v8409_v41  ;;  %v588_v54 = vld [vmem:[#allocation5 + $0xef8] sm:$0xff] }
 0x39e   :  { %7430 = vmatprep.subr.bf16.mxu1 %v8402_v45  ;;  %v8490_v32 = vcombine.high %v584_v28, %v588_v54  ;;  %v448_v34 = vld [vmem:[#allocation5 + $0xa98] sm:$0xff]  ;;  %v8489_v41 = vcombine.low %v584_v28, %v588_v54 }
 0x39f   :  { %7390 = vmatpush1.bf16.msra.mxu0 %v8273_v52  ;;  %v452_v37 = vld [vmem:[#allocation5 + $0xab8] sm:$0xff] }
 0x3a0   :  { %7391 = vmatprep.subr.bf16.mxu0 %v8394_v35  ;;  %v576_v26 = vld [vmem:[#allocation5 + $0xe98] sm:$0xff]  ;;  %v8354_v44 = vcombine.high %v448_v34, %v452_v37  ;;  %v8353_v52 = vcombine.low %v448_v34, %v452_v37 }
 0x3a1   :  { %7431 = vmatpush1.bf16.msra.mxu1 %v8401_v55  ;;  %v580_v25 = vld [vmem:[#allocation5 + $0xeb8] sm:$0xff] }
 0x3a2   :  { %7432 = vmatprep.subr.bf16.mxu1 %v8522_v20  ;;  %v8482_v45 = vcombine.high %v576_v26, %v580_v25  ;;  %v440_v33 = vld [vmem:[#allocation5 + $0xa58] sm:$0xff]  ;;  %v8481_v55 = vcombine.low %v576_v26, %v580_v25 }
 0x3a3   :  { %7392 = vmatpush2.bf16.msra.mxu0 %v8393_v19  ;;  %v444_v22 = vld [vmem:[#allocation5 + $0xa78] sm:$0xff] }
 0x3a4   :  { %7393 = vmatprep.subr.bf16.mxu0 %v8386_v7  ;;  %v568_v50 = vld [vmem:[#allocation5 + $0xe58] sm:$0xff]  ;;  %v8346_v35 = vcombine.high %v440_v33, %v444_v22  ;;  %v8345_v19 = vcombine.low %v440_v33, %v444_v22 }
 0x3a5   :  { %7433 = vmatpush2.bf16.msra.mxu1 %v8521_v58  ;;  %v572_v16 = vld [vmem:[#allocation5 + $0xe78] sm:$0xff] }
 0x3a6   :  { %7434 = vmatprep.subr.bf16.mxu1 %v8514_v63  ;;  %v8474_v20 = vcombine.high %v568_v50, %v572_v16  ;;  %v432_v56 = vld [vmem:[#allocation5 + $0xa18] sm:$0xff]  ;;  %v8473_v58 = vcombine.low %v568_v50, %v572_v16 }
 0x3a7   :  { %7394 = vmatpush2.bf16.msra.mxu0 %v8385_v3  ;;  %v436_v60 = vld [vmem:[#allocation5 + $0xa38] sm:$0xff] }
 0x3a8   :  { %7395 = vmatprep.subr.bf16.mxu0 %v8378_v11  ;;  %v560_v61 = vld [vmem:[#allocation5 + $0xe18] sm:$0xff]  ;;  %v8338_v7 = vcombine.high %v432_v56, %v436_v60  ;;  %v8337_v3 = vcombine.low %v432_v56, %v436_v60 }
 0x3a9   :  { %7435 = vmatpush2.bf16.msra.mxu1 %v8513_v29  ;;  %v564_v62 = vld [vmem:[#allocation5 + $0xe38] sm:$0xff] }
 0x3aa   :  { %7436 = vmatprep.subr.bf16.mxu1 %v8506_v12  ;;  %v8466_v63 = vcombine.high %v560_v61, %v564_v62  ;;  %v680_v10 = vld [vmem:[#allocation5 + $0x11d8] sm:$0xff]  ;;  %v8465_v29 = vcombine.low %v560_v61, %v564_v62 }
 0x3ab   :  { %7396 = vmatpush2.bf16.msra.mxu0 %v8377_v24  ;;  %v684_v27 = vld [vmem:[#allocation5 + $0x11f8] sm:$0xff] }
 0x3ac   :  { %7397 = vmatprep.subr.bf16.mxu0 %v8370_v42  ;;  %v808_v59 = vld [vmem:[#allocation5 + $0x15d8] sm:$0xff]  ;;  %v8586_v11 = vcombine.high %v680_v10, %v684_v27  ;;  %v8585_v24 = vcombine.low %v680_v10, %v684_v27 }
 0x3ad   :  { %7437 = vmatpush2.bf16.msra.mxu1 %v8505_v13  ;;  %v812_v2 = vld [vmem:[#allocation5 + $0x15f8] sm:$0xff] }
 0x3ae   :  { %7438 = vmatprep.subr.bf16.mxu1 %v8498_v21  ;;  %v8714_v12 = vcombine.high %v808_v59, %v812_v2  ;;  %v672_v39 = vld [vmem:[#allocation5 + $0x1198] sm:$0xff]  ;;  %v8713_v13 = vcombine.low %v808_v59, %v812_v2 }
 0x3af   :  { %7398 = vmatpush2.bf16.msra.mxu0 %v8369_v30  ;;  %v676_v1 = vld [vmem:[#allocation5 + $0x11b8] sm:$0xff] }
 0x3b0   :  { %7399 = vmatprep.subr.bf16.mxu0 %v8362_v14  ;;  %v800_v6 = vld [vmem:[#allocation5 + $0x1598] sm:$0xff]  ;;  %v8578_v42 = vcombine.high %v672_v39, %v676_v1 }
 0x3b1   :  { %7439 = vmatpush2.bf16.msra.mxu1 %v8497_v5  ;;  %v804_v17 = vld [vmem:[#allocation5 + $0x15b8] sm:$0xff] }
 0x3b2   :  { %7440 = vmatprep.subr.bf16.mxu1 %v8490_v32  ;;  %v8706_v21 = vcombine.high %v800_v6, %v804_v17  ;;  %v664_v0 = vld [vmem:[#allocation5 + $0x1158] sm:$0xff]  ;;  %v8577_v32 = vcombine.low %v672_v39, %v676_v1  ;;  %v8705_v37 = vcombine.low %v800_v6, %v804_v17 }
 0x3b3   :  { %7400 = vmatpush2.bf16.msra.mxu0 %v8361_v38  ;;  %v668_v53 = vld [vmem:[#allocation5 + $0x1178] sm:$0xff] }
 0x3b4   :  { %7401 = vmatprep.subr.bf16.mxu0 %v8354_v44  ;;  %v792_v54 = vld [vmem:[#allocation5 + $0x1558] sm:$0xff]  ;;  %v8570_v26 = vcombine.high %v664_v0, %v668_v53  ;;  %v8569_v16 = vcombine.low %v664_v0, %v668_v53 }
 0x3b5   :  { %7441 = vmatpush2.bf16.msra.mxu1 %v8489_v41  ;;  %v796_v30 = vld [vmem:[#allocation5 + $0x1578] sm:$0xff] }
 0x3b6   :  { %7442 = vmatprep.subr.bf16.mxu1 %v8482_v45  ;;  %v656_v44 = vld [vmem:[#allocation5 + $0x1118] sm:$0xff] }
 0x3b7   :  { %7402 = vmatpush2.bf16.msra.mxu0 %v8353_v52  ;;  %v660_v45 = vld [vmem:[#allocation5 + $0x1138] sm:$0xff] }
 0x3b8   :  { %7403 = vmatprep.subr.bf16.mxu0 %v8346_v35  ;;  %v788_v33 = vld [vmem:[#allocation5 + $0x1538] sm:$0xff]  ;;  %v8561_v62 = vcombine.low %v656_v44, %v660_v45 }
 0x3b9   :  { %7443 = vmatpush2.bf16.msra.mxu1 %v8481_v55  ;;  %v8562_v55 = vcombine.high %v656_v44, %v660_v45  ;;  %v648_v56 = vld [vmem:[#allocation5 + $0x10d8] sm:$0xff] }
 0x3ba   :  { %7444 = vmatprep.subr.bf16.mxu1 %v8474_v20  ;;  %v776_v60 = vld [vmem:[#allocation5 + $0x14d8] sm:$0xff] }
 0x3bb   :  { %7404 = vmatpush2.bf16.msra.mxu0 %v8345_v19  ;;  %v780_v61 = vld [vmem:[#allocation5 + $0x14f8] sm:$0xff] }
 0x3bc   :  { %7405 = vmatprep.subr.bf16.mxu0 %v8338_v7  ;;  %v640_v7 = vld [vmem:[#allocation5 + $0x1098] sm:$0xff]  ;;  %v8681_v2 = vcombine.low %v776_v60, %v780_v61 }
 0x3bd   :  { %7445 = vmatpush2.bf16.msra.mxu1 %v8473_v58  ;;  %v8682_v58 = vcombine.high %v776_v60, %v780_v61  ;;  %v768_v10 = vld [vmem:[#allocation5 + $0x1498] sm:$0xff] }
 0x3be   :  { %7446 = vmatprep.subr.bf16.mxu1 %v8466_v63  ;;  %v644_v63 = vld [vmem:[#allocation5 + $0x10b8] sm:$0xff] }
 0x3bf   :  { %7406 = vmatpush2.bf16.msra.mxu0 %v8337_v3  ;;  %v772_v27 = vld [vmem:[#allocation5 + $0x14b8] sm:$0xff]  ;;  %v8546_v3 = vcombine.high %v640_v7, %v644_v63  ;;  %v8545_v6 = vcombine.low %v640_v7, %v644_v63 }
 0x3c0   :  { %7457 = vmatprep.subr.bf16.mxu0 %v8586_v11  ;;  %v632_v11 = vld [vmem:[#allocation5 + $0x1058] sm:$0xff]  ;;  %v8673_v17 = vcombine.low %v768_v10, %v772_v27 }
 0x3c1   :  { %7447 = vmatpush2.bf16.msra.mxu1 %v8465_v29  ;;  %v8674_v29 = vcombine.high %v768_v10, %v772_v27  ;;  %v760_v39 = vld [vmem:[#allocation5 + $0x1458] sm:$0xff] }
 0x3c2   :  { %7498 = vmatprep.subr.bf16.mxu1 %v8714_v12  ;;  %v7163_v28 = vpop.f32.mrf.mxu0  ;;  %7408 = vmatmul.mubr.bf16.vlgmr.msra.gmra.mxu0 %v9305_v36  ;;  %v8698_v36 = vcombine.high %v792_v54, %v796_v30  ;;  %v636_v12 = vld [vmem:[#allocation5 + $0x1078] sm:$0xff] }
 0x3c3   :  { %v7164_v5 = vadd.f32 %v7163_v28, %v9446_v46  ;;  %7458 = vmatpush1.bf16.msra.mxu0 %v8585_v24  ;;  %7489 = vmatprep.mubr.bf16.mxu0 %v9317_v47  ;;  %v652_v47 = vld [vmem:[#allocation5 + $0x10f8] sm:$0xff]  ;;  %v8538_v24 = vcombine.high %v632_v11, %v636_v12  ;;  %v8537_v28 = vcombine.low %v632_v11, %v636_v12 }
 0x3c4   :  { %v7204_v14 = vpop.f32.mrf.mxu1  ;;  %7449 = vmatmul.mubr.bf16.vlgmr.msra.gmra.mxu1 %v9311_v40  ;;  %v7165_v34 = vpop.f32.mrf.mxu0  ;;  %7459 = vmatprep.subr.bf16.mxu0 %v8578_v42  ;;  %v784_v40 = vld [vmem:[#allocation5 + $0x1518] sm:$0xff]  ;;  %v8554_v19 = vcombine.high %v648_v56, %v652_v47  ;;  %v8553_v59 = vcombine.low %v648_v56, %v652_v47 }
 0x3c5   :  { %7499 = vmatpush1.bf16.msra.mxu1 %v8713_v13  ;;  %v9456_v25 = vadd.f32 %v7204_v14, %v7164_v5  ;;  %v7166_v38 = vadd.f32 %v7165_v34, %v9451_v57  ;;  %7530 = vmatprep.mubr.bf16.mxu1 %v9322_v49  ;;  %v8697_v57 = vcombine.low %v792_v54, %v796_v30  ;;  %v764_v1 = vld [vmem:[#allocation5 + $0x1478] sm:$0xff] }
 0x3c6   :  { %v7206_v41 = vpop.f32.mrf.mxu1  ;;  %7500 = vmatprep.subr.bf16.mxu1 %v8706_v21  ;;  %v7167_v46 = vpop.f32.mrf.mxu0  ;;  %v8690_v20 = vcombine.high %v784_v40, %v788_v33  ;;  %v8689_v49 = vcombine.low %v784_v40, %v788_v33  ;;  %v8666_v13 = vcombine.high %v760_v39, %v764_v1  ;;  %v624_v42 = vld [vmem:[#allocation5 + $0x1018] sm:$0xff]  ;;  %v8665_v54 = vcombine.low %v760_v39, %v764_v1 }
 0x3c7   :  { %v9461_v22 = vadd.f32 %v7206_v41, %v7166_v38  ;;  %7460 = vmatpush1.bf16.msra.mxu0 %v8577_v32  ;;  %v628_v21 = vld [vmem:[#allocation5 + $0x1038] sm:$0xff] }
 0x3c8   :  { %v7208_v50 = vpop.f32.mrf.mxu1  ;;  %v7168_v52 = vpop.f32.mrf.mxu0  ;;  %7461 = vmatprep.subr.bf16.mxu0 %v8570_v26  ;;  %v752_v0 = vld [vmem:[#allocation5 + $0x1418] sm:$0xff]  ;;  %v8530_v30 = vcombine.high %v624_v42, %v628_v21  ;;  %v8529_v26 = vcombine.low %v624_v42, %v628_v21 }
 0x3c9   :  { %7501 = vmatpush1.bf16.msra.mxu1 %v8705_v37  ;;  %v756_v53 = vld [vmem:[#allocation5 + $0x1438] sm:$0xff] }
 0x3ca   :  { %v7209_v35 = vpop.f32.mrf.mxu1  ;;  %7502 = vmatprep.subr.bf16.mxu1 %v8698_v36  ;;  %v8658_v5 = vcombine.high %v752_v0, %v756_v53  ;;  %v744_v14 = vld [vmem:[#allocation5 + $0x13d8] sm:$0xff]  ;;  %v8657_v38 = vcombine.low %v752_v0, %v756_v53 }
 0x3cb   :  { %7462 = vmatpush1.bf16.msra.mxu0 %v8569_v16  ;;  %v748_v32 = vld [vmem:[#allocation5 + $0x13f8] sm:$0xff] }
 0x3cc   :  { %7463 = vmatprep.subr.bf16.mxu0 %v8562_v55  ;;  %v872_v34 = vld [vmem:[#allocation5 + $0x17d8] sm:$0xff]  ;;  %v8650_v41 = vcombine.high %v744_v14, %v748_v32  ;;  %v8649_v33 = vcombine.low %v744_v14, %v748_v32 }
 0x3cd   :  { %7503 = vmatpush1.bf16.msra.mxu1 %v8697_v57  ;;  %v876_v37 = vld [vmem:[#allocation5 + $0x17f8] sm:$0xff] }
 0x3ce   :  { %7504 = vmatprep.subr.bf16.mxu1 %v8690_v20  ;;  %v8778_v36 = vcombine.high %v872_v34, %v876_v37  ;;  %v736_v44 = vld [vmem:[#allocation5 + $0x1398] sm:$0xff]  ;;  %v8777_v50 = vcombine.low %v872_v34, %v876_v37 }
 0x3cf   :  { %7464 = vmatpush1.bf16.msra.mxu0 %v8561_v62  ;;  %v740_v45 = vld [vmem:[#allocation5 + $0x13b8] sm:$0xff] }
 0x3d0   :  { %7465 = vmatprep.subr.bf16.mxu0 %v8554_v19  ;;  %v864_v46 = vld [vmem:[#allocation5 + $0x1798] sm:$0xff]  ;;  %v8642_v16 = vcombine.high %v736_v44, %v740_v45  ;;  %v8641_v56 = vcombine.low %v736_v44, %v740_v45 }
 0x3d1   :  { %7505 = vmatpush1.bf16.msra.mxu1 %v8689_v49  ;;  %v868_v40 = vld [vmem:[#allocation5 + $0x17b8] sm:$0xff] }
 0x3d2   :  { %7506 = vmatprep.subr.bf16.mxu1 %v8682_v58  ;;  %v8770_v52 = vcombine.high %v864_v46, %v868_v40  ;;  %v728_v57 = vld [vmem:[#allocation5 + $0x1358] sm:$0xff]  ;;  %v8769_v47 = vcombine.low %v864_v46, %v868_v40 }
 0x3d3   :  { %7466 = vmatpush1.bf16.msra.mxu0 %v8553_v59  ;;  %v732_v55 = vld [vmem:[#allocation5 + $0x1378] sm:$0xff] }
 0x3d4   :  { %7467 = vmatprep.subr.bf16.mxu0 %v8546_v3  ;;  %v856_v35 = vld [vmem:[#allocation5 + $0x1758] sm:$0xff]  ;;  %v8634_v60 = vcombine.high %v728_v57, %v732_v55  ;;  %v8633_v7 = vcombine.low %v728_v57, %v732_v55 }
 0x3d5   :  { %7507 = vmatpush1.bf16.msra.mxu1 %v8681_v2  ;;  %v860_v20 = vld [vmem:[#allocation5 + $0x1778] sm:$0xff] }
 0x3d6   :  { %7508 = vmatprep.subr.bf16.mxu1 %v8674_v29  ;;  %v8762_v61 = vcombine.high %v856_v35, %v860_v20  ;;  %v720_v62 = vld [vmem:[#allocation5 + $0x1318] sm:$0xff]  ;;  %v8761_v63 = vcombine.low %v856_v35, %v860_v20 }
 0x3d7   :  { %7468 = vmatpush1.bf16.msra.mxu0 %v8545_v6  ;;  %v724_v49 = vld [vmem:[#allocation5 + $0x1338] sm:$0xff] }
 0x3d8   :  { %7469 = vmatprep.subr.bf16.mxu0 %v8538_v24  ;;  %v848_v19 = vld [vmem:[#allocation5 + $0x1718] sm:$0xff]  ;;  %v8626_v10 = vcombine.high %v720_v62, %v724_v49  ;;  %v8625_v11 = vcombine.low %v720_v62, %v724_v49 }
 0x3d9   :  { %7509 = vmatpush1.bf16.msra.mxu1 %v8673_v17  ;;  %v852_v58 = vld [vmem:[#allocation5 + $0x1738] sm:$0xff] }
 0x3da   :  { %7510 = vmatprep.subr.bf16.mxu1 %v8666_v13  ;;  %v8754_v27 = vcombine.high %v848_v19, %v852_v58  ;;  %v712_v59 = vld [vmem:[#allocation5 + $0x12d8] sm:$0xff]  ;;  %v8753_v12 = vcombine.low %v848_v19, %v852_v58 }
 0x3db   :  { %7470 = vmatpush1.bf16.msra.mxu0 %v8537_v28  ;;  %v716_v2 = vld [vmem:[#allocation5 + $0x12f8] sm:$0xff] }
 0x3dc   :  { %7471 = vmatprep.subr.bf16.mxu0 %v8530_v30  ;;  %v840_v3 = vld [vmem:[#allocation5 + $0x16d8] sm:$0xff]  ;;  %v8618_v39 = vcombine.high %v712_v59, %v716_v2  ;;  %v8617_v42 = vcombine.low %v712_v59, %v716_v2 }
 0x3dd   :  { %7511 = vmatpush1.bf16.msra.mxu1 %v8665_v54  ;;  %v844_v29 = vld [vmem:[#allocation5 + $0x16f8] sm:$0xff] }
 0x3de   :  { %7512 = vmatprep.subr.bf16.mxu1 %v8658_v5  ;;  %v8746_v1 = vcombine.high %v840_v3, %v844_v29  ;;  %v704_v6 = vld [vmem:[#allocation5 + $0x1298] sm:$0xff]  ;;  %v8745_v21 = vcombine.low %v840_v3, %v844_v29 }
 0x3df   :  { %7472 = vmatpush1.bf16.msra.mxu0 %v8529_v26  ;;  %v708_v17 = vld [vmem:[#allocation5 + $0x12b8] sm:$0xff] }
 0x3e0   :  { %7473 = vmatprep.subr.bf16.mxu0 %v8650_v41  ;;  %v832_v24 = vld [vmem:[#allocation5 + $0x1698] sm:$0xff]  ;;  %v8610_v0 = vcombine.high %v704_v6, %v708_v17  ;;  %v8609_v14 = vcombine.low %v704_v6, %v708_v17 }
 0x3e1   :  { %7513 = vmatpush1.bf16.msra.mxu1 %v8657_v38  ;;  %v836_v13 = vld [vmem:[#allocation5 + $0x16b8] sm:$0xff] }
 0x3e2   :  { %7514 = vmatprep.subr.bf16.mxu1 %v8778_v36  ;;  %v8738_v53 = vcombine.high %v832_v24, %v836_v13  ;;  %v696_v28 = vld [vmem:[#allocation5 + $0x1258] sm:$0xff]  ;;  %v8737_v32 = vcombine.low %v832_v24, %v836_v13 }
 0x3e3   :  { %7474 = vmatpush2.bf16.msra.mxu0 %v8649_v33  ;;  %v700_v54 = vld [vmem:[#allocation5 + $0x1278] sm:$0xff] }
 0x3e4   :  { %7475 = vmatprep.subr.bf16.mxu0 %v8642_v16  ;;  %v824_v30 = vld [vmem:[#allocation5 + $0x1658] sm:$0xff]  ;;  %v8602_v34 = vcombine.high %v696_v28, %v700_v54  ;;  %v8601_v44 = vcombine.low %v696_v28, %v700_v54 }
 0x3e5   :  { %7515 = vmatpush2.bf16.msra.mxu1 %v8777_v50  ;;  %v828_v5 = vld [vmem:[#allocation5 + $0x1678] sm:$0xff] }
 0x3e6   :  { %7516 = vmatprep.subr.bf16.mxu1 %v8770_v52  ;;  %v8730_v37 = vcombine.high %v824_v30, %v828_v5  ;;  %v688_v26 = vld [vmem:[#allocation5 + $0x1218] sm:$0xff]  ;;  %v8729_v45 = vcombine.low %v824_v30, %v828_v5 }
 0x3e7   :  { %7476 = vmatpush2.bf16.msra.mxu0 %v8641_v56  ;;  %v692_v38 = vld [vmem:[#allocation5 + $0x1238] sm:$0xff] }
 0x3e8   :  { %7477 = vmatprep.subr.bf16.mxu0 %v8634_v60  ;;  %v816_v41 = vld [vmem:[#allocation5 + $0x1618] sm:$0xff]  ;;  %v8594_v46 = vcombine.high %v688_v26, %v692_v38  ;;  %v8593_v57 = vcombine.low %v688_v26, %v692_v38 }
 0x3e9   :  { %7517 = vmatpush2.bf16.msra.mxu1 %v8769_v47  ;;  %v820_v36 = vld [vmem:[#allocation5 + $0x1638] sm:$0xff] }
 0x3ea   :  { %7518 = vmatprep.subr.bf16.mxu1 %v8762_v61  ;;  %v8722_v40 = vcombine.high %v816_v41, %v820_v36  ;;  %v936_v33 = vld [vmem:[#allocation5 + $0x19d8] sm:$0xff]  ;;  %v8721_v55 = vcombine.low %v816_v41, %v820_v36 }
 0x3eb   :  { %7478 = vmatpush2.bf16.msra.mxu0 %v8633_v7  ;;  %v940_v50 = vld [vmem:[#allocation5 + $0x19f8] sm:$0xff] }
 0x3ec   :  { %7479 = vmatprep.subr.bf16.mxu0 %v8626_v10  ;;  %v1064_v16 = vld [vmem:[#allocation5 + $0x1dd8] sm:$0xff]  ;;  %v8842_v35 = vcombine.high %v936_v33, %v940_v50  ;;  %v8841_v62 = vcombine.low %v936_v33, %v940_v50 }
 0x3ed   :  { %7519 = vmatpush2.bf16.msra.mxu1 %v8761_v63  ;;  %v1068_v52 = vld [vmem:[#allocation5 + $0x1df8] sm:$0xff] }
 0x3ee   :  { %7520 = vmatprep.subr.bf16.mxu1 %v8754_v27  ;;  %v8970_v20 = vcombine.high %v1064_v16, %v1068_v52  ;;  %v928_v56 = vld [vmem:[#allocation5 + $0x1998] sm:$0xff]  ;;  %v8969_v49 = vcombine.low %v1064_v16, %v1068_v52  ;;  %v9479_v52 = vld [vmem:[#allocation7] sm:$0xff] }
 0x3ef   :  { %7480 = vmatpush2.bf16.msra.mxu0 %v8625_v11  ;;  %v932_v47 = vld [vmem:[#allocation5 + $0x19b8] sm:$0xff] }
 0x3f0   :  { %7481 = vmatprep.subr.bf16.mxu0 %v8618_v39  ;;  %v1056_v60 = vld [vmem:[#allocation5 + $0x1d98] sm:$0xff]  ;;  %v8834_v19 = vcombine.high %v928_v56, %v932_v47  ;;  %v8833_v3 = vcombine.low %v928_v56, %v932_v47 }
 0x3f1   :  { %7521 = vmatpush2.bf16.msra.mxu1 %v8753_v12  ;;  %v1060_v61 = vld [vmem:[#allocation5 + $0x1db8] sm:$0xff] }
 0x3f2   :  { %7522 = vmatprep.subr.bf16.mxu1 %v8746_v1  ;;  %v8962_v58 = vcombine.high %v1056_v60, %v1060_v61  ;;  %v920_v7 = vld [vmem:[#allocation5 + $0x1958] sm:$0xff]  ;;  %v8961_v11 = vcombine.low %v1056_v60, %v1060_v61 }
 0x3f3   :  { %7482 = vmatpush2.bf16.msra.mxu0 %v8617_v42  ;;  %v924_v63 = vld [vmem:[#allocation5 + $0x1978] sm:$0xff] }
 0x3f4   :  { %7483 = vmatprep.subr.bf16.mxu0 %v8610_v0  ;;  %v1048_v27 = vld [vmem:[#allocation5 + $0x1d58] sm:$0xff]  ;;  %v8826_v12 = vcombine.high %v920_v7, %v924_v63  ;;  %v8825_v42 = vcombine.low %v920_v7, %v924_v63 }
 0x3f5   :  { %7523 = vmatpush2.bf16.msra.mxu1 %v8745_v21  ;;  %v1052_v59 = vld [vmem:[#allocation5 + $0x1d78] sm:$0xff]  ;;  %v7650_v21 = vlaneseq }
 0x3f6   :  { %7524 = vmatprep.subr.bf16.mxu1 %v8738_v53  ;;  %v8954_v1 = vcombine.high %v1048_v27, %v1052_v59  ;;  %v912_v6 = vld [vmem:[#allocation5 + $0x1918] sm:$0xff]  ;;  %v8953_v53 = vcombine.low %v1048_v27, %v1052_v59 }
 0x3f7   :  { %7484 = vmatpush2.bf16.msra.mxu0 %v8609_v14  ;;  %v1040_v24 = vld [vmem:[#allocation5 + $0x1d18] sm:$0xff] }
 0x3f8   :  { %7485 = vmatprep.subr.bf16.mxu0 %v8602_v34  ;;  %v1044_v13 = vld [vmem:[#allocation5 + $0x1d38] sm:$0xff] }
 0x3f9   :  { %7525 = vmatpush2.bf16.msra.mxu1 %v8737_v32  ;;  %v8946_v30 = vcombine.high %v1040_v24, %v1044_v13  ;;  %v904_v5 = vld [vmem:[#allocation5 + $0x18d8] sm:$0xff] }
 0x3fa   :  { %7526 = vmatprep.subr.bf16.mxu1 %v8730_v37  ;;  %v908_v14 = vld [vmem:[#allocation5 + $0x18f8] sm:$0xff]  ;;  %v9475_v37 = vshrl.u32 %v7650_v21, 7 }
 0x3fb   :  { %7486 = vmatpush2.bf16.msra.mxu0 %v8601_v44  ;;  %v1036_v32 = vld [vmem:[#allocation5 + $0x1cf8] sm:$0xff]  ;;  %v8810_v26 = vcombine.high %v904_v5, %v908_v14  ;;  %v8809_v33 = vcombine.low %v904_v5, %v908_v14 }
 0x3fc   :  { %7487 = vmatprep.subr.bf16.mxu0 %v8594_v46  ;;  %v896_v41 = vld [vmem:[#allocation5 + $0x1898] sm:$0xff]  ;;  %v7656_v44 = vsub.s32 1, %v9475_v37  ;;  %v7652_v60 = vsub.s32 0, %v9475_v37 }
 0x3fd   :  { %7527 = vmatpush2.bf16.msra.mxu1 %v8729_v45  ;;  %v900_v36 = vld [vmem:[#allocation5 + $0x18b8] sm:$0xff] }
 0x3fe   :  { %7528 = vmatprep.subr.bf16.mxu1 %v8722_v40  ;;  %v1024_v45 = vld [vmem:[#allocation5 + $0x1c98] sm:$0xff]  ;;  %v7664_v40 = vsub.s32 3, %v9475_v37  ;;  %v8802_v16 = vcombine.high %v896_v41, %v900_v36 }
 0x3ff   :  { %7488 = vmatpush2.bf16.msra.mxu0 %v8593_v57  ;;  %v1028_v46 = vld [vmem:[#allocation5 + $0x1cb8] sm:$0xff] }
 0x400   :  { %7539 = vmatprep.subr.bf16.mxu0 %v8842_v35  ;;  %v8930_v57 = vcombine.high %v1024_v45, %v1028_v46  ;;  %v892_v35 = vld [vmem:[#allocation5 + $0x1878] sm:$0xff]  ;;  %v7665_v61 = vrot.slane %v9479_v52, %v7664_v40 }
 0x401   :  { %7529 = vmatpush2.bf16.msra.mxu1 %v8721_v55  ;;  %v888_v55 = vld [vmem:[#allocation5 + $0x1858] sm:$0xff] }
 0x402   :  { %7580 = vmatprep.subr.bf16.mxu1 %v8970_v20  ;;  %v9463_v10 = vpop.f32.mrf.mxu0  ;;  %7490 = vmatmul.mubr.bf16.vlgmr.msra.gmra.mxu0 %v9329_v4  ;;  %v916_v4 = vld [vmem:[#allocation5 + $0x1938] sm:$0xff]  ;;  %v7657_v20 = vrot.slane %v9479_v52, %v7656_v44 }
 0x403   :  { %7540 = vmatpush1.bf16.msra.mxu0 %v8841_v62  ;;  %7571 = vmatprep.mubr.bf16.mxu0 %v9341_v15  ;;  %v8818_v28 = vcombine.high %v912_v6, %v916_v4  ;;  %v1032_v15 = vld [vmem:[#allocation5 + $0x1cd8] sm:$0xff]  ;;  %v8817_v34 = vcombine.low %v912_v6, %v916_v4  ;;  %v8801_v62 = vcombine.low %v896_v41, %v900_v36 }
 0x404   :  { %v9466_v2 = vpop.f32.mrf.mxu1  ;;  %7531 = vmatmul.mubr.bf16.vlgmr.msra.gmra.mxu1 %v9335_v8  ;;  %v9469_v29 = vpop.f32.mrf.mxu0  ;;  %7541 = vmatprep.subr.bf16.mxu0 %v8834_v19  ;;  %v8938_v38 = vcombine.high %v1032_v15, %v1036_v32  ;;  %v8937_v50 = vcombine.low %v1032_v15, %v1036_v32  ;;  %v1016_v56 = vld [vmem:[#allocation5 + $0x1c58] sm:$0xff]  ;;  %v8794_v19 = vcombine.high %v888_v55, %v892_v35 }
 0x405   :  { %7581 = vmatpush1.bf16.msra.mxu1 %v8969_v49  ;;  %7612 = vmatprep.mubr.bf16.mxu1 %v9346_v18  ;;  %v8945_v18 = vcombine.low %v1040_v24, %v1044_v13  ;;  %v1020_v47 = vld [vmem:[#allocation5 + $0x1c78] sm:$0xff]  ;;  %v8929_v49 = vcombine.low %v1024_v45, %v1028_v46  ;;  %v7691_v59 = vadd.f32 %v7657_v20, %v9395_v23 }
 0x406   :  { %v9471_v39 = vpop.f32.mrf.mxu1  ;;  %7582 = vmatprep.subr.bf16.mxu1 %v8962_v58  ;;  %v7249_v17 = vpop.f32.mrf.mxu0  ;;  %v7660_v58 = vsub.s32 2, %v9475_v37  ;;  %v8922_v7 = vcombine.high %v1016_v56, %v1020_v47  ;;  %v880_v63 = vld [vmem:[#allocation5 + $0x1818] sm:$0xff]  ;;  %v7653_v6 = vrot.slane %v9479_v52, %v7652_v60  ;;  %v7693_v4 = vadd.f32 %v7665_v61, %v9433_v43 }
 0x407   :  { %7542 = vmatpush1.bf16.msra.mxu0 %v8833_v3  ;;  %v884_v27 = vld [vmem:[#allocation5 + $0x1838] sm:$0xff]  ;;  %v7248_v3 = vadd.f32 %v9469_v29, %v9461_v22  ;;  %v8793_v17 = vcombine.low %v888_v55, %v892_v35  ;;  %v8921_v24 = vcombine.low %v1016_v56, %v1020_v47  ;;  %v9036_v29 = vmul.f32 -1.442695, %v7691_v59 }
 0x408   :  { %v7290_v8 = vpop.f32.mrf.mxu1  ;;  %v7250_v0 = vpop.f32.mrf.mxu0  ;;  %7543 = vmatprep.subr.bf16.mxu0 %v8826_v12  ;;  %v1008_v12 = vld [vmem:[#allocation5 + $0x1c18] sm:$0xff]  ;;  %v8786_v13 = vcombine.high %v880_v63, %v884_v27  ;;  %v7690_v43 = vadd.f32 %v7653_v6, %v9390_v9  ;;  %v8785_v5 = vcombine.low %v880_v63, %v884_v27  ;;  %v7246_v14 = vadd.f32 %v9463_v10, %v9456_v25 }
 0x409   :  { %7583 = vmatpush1.bf16.msra.mxu1 %v8961_v11  ;;  %v7672_v11 = vsub.s32 5, %v9475_v37  ;;  %v7661_v8 = vrot.slane %v9479_v52, %v7660_v58  ;;  %v1004_v22 = vld [vmem:[#allocation5 + $0x1bf8] sm:$0xff]  ;;  %v7289_v21 = vadd.f32 %v9471_v39, %v7248_v3  ;;  %9070 = vpow2.f32 %v9036_v29 }
 0x40a   :  { %v7291_v54 = vpop.f32.mrf.mxu1  ;;  %7584 = vmatprep.subr.bf16.mxu1 %v8954_v1  ;;  %v1012_v1 = vld [vmem:[#allocation5 + $0x1c38] sm:$0xff]  ;;  %v9035_v25 = vmul.f32 -1.442695, %v7690_v43  ;;  %v7287_v10 = vadd.f32 %v9466_v2, %v7246_v14  ;;  %v7754_v43 = vld [vmem:[#allocation8] sm:$0xff] }
 0x40b   :  { %7544 = vmatpush1.bf16.msra.mxu0 %v8825_v42  ;;  %v8914_v23 = vcombine.high %v1008_v12, %v1012_v1  ;;  %v1000_v42 = vld [vmem:[#allocation5 + $0x1bd8] sm:$0xff]  ;;  %v7673_v0 = vrot.slane %v9479_v52, %v7672_v11  ;;  %v9038_v54 = vmul.f32 -1.442695, %v7693_v4  ;;  %v8913_v15 = vcombine.low %v1008_v12, %v1012_v1 }
 0x40c   :  { %7545 = vmatprep.subr.bf16.mxu0 %v8818_v28  ;;  %v1132_v28 = vld [vmem:[#allocation5 + $0x1ff8] sm:$0xff]  ;;  %v8906_v32 = vcombine.high %v1000_v42, %v1004_v22  ;;  %v7692_v39 = vadd.f32 %v7661_v8, %v9428_v31  ;;  %v8905_v44 = vcombine.low %v1000_v42, %v1004_v22 }
 0x40d   :  { %7585 = vmatpush1.bf16.msra.mxu1 %v8953_v53  ;;  %v1128_v53 = vld [vmem:[#allocation5 + $0x1fd8] sm:$0xff]  ;;  %v7695_v9 = vadd.f32 %v7673_v0, %v7289_v21  ;;  %9072 = vpow2.f32 %v9038_v54 }
 0x40e   :  { %7586 = vmatprep.subr.bf16.mxu1 %v8946_v30  ;;  %v7668_v30 = vsub.s32 4, %v9475_v37  ;;  %v1124_v41 = vld [vmem:[#allocation5 + $0x1fb8] sm:$0xff]  ;;  %v9033_v45 = vcombine.low %v1128_v53, %v1132_v28  ;;  %v9037_v46 = vmul.f32 -1.442695, %v7692_v39  ;;  %9074 = vpow2.f32 %v9035_v25 }
 0x40f   :  { %7546 = vmatpush1.bf16.msra.mxu0 %v8817_v34  ;;  %v9034_v34 = vcombine.high %v1128_v53, %v1132_v28  ;;  %v1116_v55 = vld [vmem:[#allocation5 + $0x1f78] sm:$0xff] }
 0x410   :  { %7547 = vmatprep.subr.bf16.mxu0 %v8810_v26  ;;  %v996_v26 = vld [vmem:[#allocation5 + $0x1bb8] sm:$0xff]  ;;  %v7669_v36 = vrot.slane %v9479_v52, %v7668_v30  ;;  %9076 = vpow2.f32 %v9037_v46 }
 0x411   :  { %7587 = vmatpush1.bf16.msra.mxu1 %v8945_v18  ;;  %v992_v18 = vld [vmem:[#allocation5 + $0x1b98] sm:$0xff] }
 0x412   :  { %7588 = vmatprep.subr.bf16.mxu1 %v8938_v38  ;;  %v1120_v38 = vld [vmem:[#allocation5 + $0x1f98] sm:$0xff]  ;;  %v8898_v31 = vcombine.high %v992_v18, %v996_v26  ;;  %v8897_v35 = vcombine.low %v992_v18, %v996_v26  ;;  %v7694_v20 = vadd.f32 %v7669_v36, %v7287_v10 }
 0x413   :  { %7548 = vmatpush1.bf16.msra.mxu0 %v8809_v33  ;;  %v9026_v40 = vcombine.high %v1120_v38, %v1124_v41  ;;  %v984_v33 = vld [vmem:[#allocation5 + $0x1b58] sm:$0xff]  ;;  %v9025_v56 = vcombine.low %v1120_v38, %v1124_v41 }
 0x414   :  { %7549 = vmatprep.subr.bf16.mxu0 %v8802_v16  ;;  %v9040_v16 = vmul.f32 -1.442695, %v7695_v9  ;;  %v976_v60 = vld [vmem:[#allocation5 + $0x1b18] sm:$0xff]  ;;  %v9039_v63 = vmul.f32 -1.442695, %v7694_v20 }
 0x415   :  { %7589 = vmatpush1.bf16.msra.mxu1 %v8937_v50  ;;  %v988_v50 = vld [vmem:[#allocation5 + $0x1b78] sm:$0xff] }
 0x416   :  { %7590 = vmatprep.subr.bf16.mxu1 %v8930_v57  ;;  %v1112_v57 = vld [vmem:[#allocation5 + $0x1f58] sm:$0xff]  ;;  %v8890_v2 = vcombine.high %v984_v33, %v988_v50  ;;  %9078 = vpow2.f32 %v9040_v16 }
 0x417   :  { %7550 = vmatpush1.bf16.msra.mxu0 %v8801_v62  ;;  %v9018_v47 = vcombine.high %v1112_v57, %v1116_v55  ;;  %v980_v61 = vld [vmem:[#allocation5 + $0x1b38] sm:$0xff]  ;;  %v9219_v62 = vmov 1966171168   ;;  %v9017_v27 = vcombine.low %v1112_v57, %v1116_v55  ;;  %9080 = vpow2.f32 %v9039_v63 }
 0x418   :  { %7551 = vmatprep.subr.bf16.mxu0 %v8794_v19  ;;  %v1104_v19 = vld [vmem:[#allocation5 + $0x1f18] sm:$0xff]  ;;  %v8882_v59 = vcombine.high %v976_v60, %v980_v61 }
 0x419   :  { %7591 = vmatpush1.bf16.msra.mxu1 %v8929_v49  ;;  %v7765_v49 = vunpack.c.l.s4 %v9219_v62  ;;  %v1108_v58 = vld [vmem:[#allocation5 + $0x1f38] sm:$0xff] }
 0x41a   :  { %7592 = vmatprep.subr.bf16.mxu1 %v8922_v7  ;;  %v8889_v7 = vcombine.low %v984_v33, %v988_v50  ;;  %v9010_v3 = vcombine.high %v1104_v19, %v1108_v58  ;;  %v968_v11 = vld [vmem:[#allocation5 + $0x1ad8] sm:$0xff]  ;;  %v9009_v8 = vcombine.low %v1104_v19, %v1108_v58  ;;  %v7763_v50 = vcombine.high %v7754_v43, %v7754_v43 }
 0x41b   :  { %7552 = vmatpush1.bf16.msra.mxu0 %v8793_v17  ;;  %v972_v12 = vld [vmem:[#allocation5 + $0x1af8] sm:$0xff]  ;;  %v7766_v1 = vunpack.c.0.s8 %v7765_v49  ;;  %v9071_v17 = vpop.eup %9070 }
 0x41c   :  { %7553 = vmatprep.subr.bf16.mxu0 %v8786_v13  ;;  %v1096_v6 = vld [vmem:[#allocation5 + $0x1ed8] sm:$0xff]  ;;  %v9073_v13 = vpop.eup %9072  ;;  %v7723_v0 = vadd.f32 1.0, %v9071_v17  ;;  %v8873_v30 = vcombine.low %v968_v11, %v972_v12 }
 0x41d   :  { %7593 = vmatpush1.bf16.msra.mxu1 %v8921_v24  ;;  %v1100_v4 = vld [vmem:[#allocation5 + $0x1ef8] sm:$0xff]  ;;  %v8881_v24 = vcombine.low %v976_v60, %v980_v61  ;;  %v9502_v21 = vsub.s32 %v7766_v1, %v9475_v37  ;;  %v7725_v54 = vadd.f32 1.0, %v9073_v13 }
 0x41e   :  { %7594 = vmatprep.subr.bf16.mxu1 %v8914_v23  ;;  %v8874_v23 = vcombine.high %v968_v11, %v972_v12  ;;  %v9002_v42 = vcombine.high %v1096_v6, %v1100_v4  ;;  %v960_v22 = vld [vmem:[#allocation5 + $0x1a98] sm:$0xff]  ;;  %9082 = vrcp.f32 %v7723_v0 }
 0x41f   :  { %7554 = vmatpush1.bf16.msra.mxu0 %v8785_v5  ;;  %v964_v29 = vld [vmem:[#allocation5 + $0x1ab8] sm:$0xff]  ;;  %v9001_v5 = vcombine.low %v1096_v6, %v1100_v4  ;;  %v7770_v18 = vrot.slane %v7754_v43, %v9502_v21  ;;  %9084 = vrcp.f32 %v7725_v54  ;;  %v7777_v61 = vrot.slane %v7763_v50, %v9502_v21 }
 0x420   :  { %7555 = vmatprep.subr.bf16.mxu0 %v8906_v32  ;;  %v1088_v53 = vld [vmem:[#allocation5 + $0x1e98] sm:$0xff]  ;;  %v8866_v14 = vcombine.high %v960_v22, %v964_v29  ;;  %v8865_v36 = vcombine.low %v960_v22, %v964_v29 }
 0x421   :  { %7595 = vmatpush1.bf16.msra.mxu1 %v8913_v15  ;;  %v1092_v28 = vld [vmem:[#allocation5 + $0x1eb8] sm:$0xff]  ;;  %v9075_v15 = vpop.eup %9074  ;;  %v7778_v33 = vcombine.high %v7770_v18, %v7770_v18  ;;  %v7786_v58 = vrot.slane %v7770_v18, %v9502_v21  ;;  %v7779_v63 = vcombine.high %v7777_v61, %v7777_v61 }
 0x422   :  { %7596 = vmatprep.subr.bf16.mxu1 %v9034_v34  ;;  %v8994_v32 = vcombine.high %v1088_v53, %v1092_v28  ;;  %v952_v39 = vld [vmem:[#allocation5 + $0x1a58] sm:$0xff]  ;;  %v9077_v26 = vpop.eup %9076  ;;  %v8993_v25 = vcombine.low %v1088_v53, %v1092_v28 }
 0x423   :  { %7556 = vmatpush2.bf16.msra.mxu0 %v8905_v44  ;;  %v956_v34 = vld [vmem:[#allocation5 + $0x1a78] sm:$0xff]  ;;  %v9079_v41 = vpop.eup %9078  ;;  %v7722_v44 = vadd.f32 1.0, %v9075_v15  ;;  %v7800_v60 = vrot.slane %v7778_v33, %v9502_v21  ;;  %v7807_v11 = vrot.slane %v7779_v63, %v9502_v21 }
 0x424   :  { %7557 = vmatprep.subr.bf16.mxu0 %v8898_v31  ;;  %v1080_v9 = vld [vmem:[#allocation5 + $0x1e58] sm:$0xff]  ;;  %v8858_v10 = vcombine.high %v952_v39, %v956_v34  ;;  %v7727_v16 = vadd.f32 1.0, %v9079_v41 }
 0x425   :  { %7597 = vmatpush2.bf16.msra.mxu1 %v9033_v45  ;;  %v1084_v38 = vld [vmem:[#allocation5 + $0x1e78] sm:$0xff]  ;;  %v7724_v45 = vadd.f32 1.0, %v9077_v26  ;;  %9086 = vrcp.f32 %v7722_v44  ;;  %v7811_v44 = vcombine.high %v7807_v11, %v7807_v11 }
 0x426   :  { %7598 = vmatprep.subr.bf16.mxu1 %v9026_v40  ;;  %v8986_v31 = vcombine.high %v1080_v9, %v1084_v38  ;;  %v944_v46 = vld [vmem:[#allocation5 + $0x1a18] sm:$0xff]  ;;  %v8985_v20 = vcombine.low %v1080_v9, %v1084_v38 }
 0x427   :  { %7558 = vmatpush2.bf16.msra.mxu0 %v8897_v35  ;;  %v948_v40 = vld [vmem:[#allocation5 + $0x1a38] sm:$0xff]  ;;  %v8857_v35 = vcombine.low %v952_v39, %v956_v34  ;;  %9088 = vrcp.f32 %v7724_v45 }
 0x428   :  { %7559 = vmatprep.subr.bf16.mxu0 %v8890_v2  ;;  %v1072_v57 = vld [vmem:[#allocation5 + $0x1e18] sm:$0xff]  ;;  %v9081_v2 = vpop.eup %9080  ;;  %9090 = vrcp.f32 %v7727_v16  ;;  %v8849_v62 = vcombine.low %v944_v46, %v948_v40 }
 0x429   :  { %7599 = vmatpush2.bf16.msra.mxu1 %v9025_v56  ;;  %v1076_v55 = vld [vmem:[#allocation5 + $0x1e38] sm:$0xff]  ;;  %v8850_v56 = vcombine.high %v944_v46, %v948_v40  ;;  %v7726_v49 = vadd.f32 1.0, %v9081_v2 }
 0x42a   :  { %7600 = vmatprep.subr.bf16.mxu1 %v9018_v47  ;;  %v8978_v47 = vcombine.high %v1072_v57, %v1076_v55  ;;  %v8977_v19 = vcombine.low %v1072_v57, %v1076_v55 }
 0x42b   :  { %7560 = vmatpush2.bf16.msra.mxu0 %v8889_v7  ;;  %v7810_v7 = vcombine.high %v7800_v60, %v7800_v60  ;;  %9092 = vrcp.f32 %v7726_v49 }
 0x42c   :  { %7561 = vmatprep.subr.bf16.mxu0 %v8882_v59 }
 0x42d   :  { %7601 = vmatpush2.bf16.msra.mxu1 %v9017_v27  ;;  %v9083_v27 = vpop.eup %9082 }
 0x42e   :  { %7602 = vmatprep.subr.bf16.mxu1 %v9010_v3  ;;  %v9085_v59 = vpop.eup %9084  ;;  %v7808_v3 = vcombine.high %v7786_v58, %v7786_v58  ;;  %v7747_v1 = vpack.c.bf16 %v9083_v27, %v9083_v27 }
 0x42f   :  { %7562 = vmatpush2.bf16.msra.mxu0 %v8881_v24  ;;  %v7749_v4 = vpack.c.bf16 %v9085_v59, %v9085_v59 }
 0x430   :  { %7563 = vmatprep.subr.bf16.mxu0 %v8874_v23 }
 0x431   :  { %7603 = vmatpush2.bf16.msra.mxu1 %v9009_v8 }
 0x432   :  { %7604 = vmatprep.subr.bf16.mxu1 %v9002_v42  ;;  %v9087_v13 = vpop.eup %9086 }
 0x433   :  { %7564 = vmatpush2.bf16.msra.mxu0 %v8873_v30  ;;  %v7746_v28 = vpack.c.bf16 %v9087_v13, %v9087_v13 }
 0x434   :  { %7565 = vmatprep.subr.bf16.mxu0 %v8866_v14  ;;  %v9089_v23 = vpop.eup %9088 }
 0x435   :  { %7605 = vmatpush2.bf16.msra.mxu1 %v9001_v5  ;;  %v9091_v29 = vpop.eup %9090  ;;  %v7748_v43 = vpack.c.bf16 %v9089_v23, %v9089_v23 }
 0x436   :  { %7606 = vmatprep.subr.bf16.mxu1 %v8994_v32  ;;  %v7751_v54 = vpack.c.bf16 %v9091_v29, %v9091_v29 }
 0x437   :  { %7566 = vmatpush2.bf16.msra.mxu0 %v8865_v36 }
 0x438   :  { %7567 = vmatprep.subr.bf16.mxu0 %v8858_v10  ;;  %v9093_v30 = vpop.eup %9092 }
 0x439   :  { %7607 = vmatpush2.bf16.msra.mxu1 %v8993_v25  ;;  %v7750_v5 = vpack.c.bf16 %v9093_v30, %v9093_v30 }
 0x43a   :  { %7608 = vmatprep.subr.bf16.mxu1 %v8986_v31 }
 0x43b   :  { %7568 = vmatpush2.bf16.msra.mxu0 %v8857_v35 }
 0x43c   :  { %7569 = vmatprep.subr.bf16.mxu0 %v8850_v56  ;;  %v7680_v56 = vsub.s32 7, %v9475_v37 }
 0x43d   :  { %7609 = vmatpush2.bf16.msra.mxu1 %v8985_v20  ;;  %v7676_v20 = vsub.s32 6, %v9475_v37 }
 0x43e   :  { %7610 = vmatprep.subr.bf16.mxu1 %v8978_v47  ;;  %v7681_v63 = vrot.slane %v9479_v52, %v7680_v56 }
 0x43f   :  { %7570 = vmatpush2.bf16.msra.mxu0 %v8849_v62  ;;  %v7677_v62 = vrot.slane %v9479_v52, %v7676_v20 }
 0x440   :  { %7834 = vmatprep.subr.bf16.mxu0 %v7800_v60 }
 0x441   :  { %7611 = vmatpush2.bf16.msra.mxu1 %v8977_v19 }
 0x442   :  { %7874 = vmatprep.subr.bf16.mxu1 %v7810_v7  ;;  %v7327_v12 = vpop.f32.mrf.mxu0  ;;  %7572 = vmatmul.mubr.bf16.vlgmr.msra.gmra.mxu0 %v9353_v48  ;;  %v7793_v48 = vrot.slane %v7777_v61, %v9502_v21 }
 0x443   :  { %7835 = vmatpush1.bf16.xpose.msra.mxu0 %v7786_v58  ;;  %7852 = vmatprep.mubr.bf16.mxu0 %v7747_v1  ;;  %v9043_v1 = vld [vmem:[#allocation10] ss:$0 sm:$0xff] }
 0x444   :  { %v7368_v6 = vpop.f32.mrf.mxu1  ;;  %7613 = vmatmul.mubr.bf16.vlgmr.msra.gmra.mxu1 %v9357_v51  ;;  %v7329_v24 = vpop.f32.mrf.mxu0  ;;  %7914 = vmatprep.subr.bf16.mxu0 %v7807_v11  ;;  %v7809_v25 = vcombine.high %v7793_v48, %v7793_v48 }
 0x445   :  { %v7369_v17 = vadd.f32 %v7368_v6, %v7327_v12  ;;  %7875 = vmatpush1.bf16.xpose.msra.mxu1 %v7808_v3  ;;  %7892 = vmatprep.mubr.bf16.mxu1 %v7749_v4 }
 0x446   :  { %v7370_v8 = vpop.f32.mrf.mxu1  ;;  %v7331_v22 = vpop.f32.mrf.mxu0  ;;  %7954 = vmatprep.subr.bf16.mxu1 %v7811_v44 }
 0x447   :  { %v7371_v42 = vadd.f32 %v7370_v8, %v7329_v24 }
 0x448   :  { %v7372_v0 = vpop.f32.mrf.mxu1  ;;  %v7332_v53 = vpop.f32.mrf.mxu0 }
 0x44a   :  { %v7373_v51 = vpop.f32.mrf.mxu1  ;;  %7853 = vmatmul.mubr.bf16.vlgmr.msra.gmra.mxu0 %v7746_v28 }
 0x44b   :  { %7915 = vmatpush1.bf16.xpose.msra.mxu0 %v7793_v48  ;;  %7932 = vmatprep.mubr.bf16.mxu0 %v7751_v54 }
 0x44c   :  { %7893 = vmatmul.mubr.bf16.vlgmr.msra.gmra.mxu1 %v7748_v43 }
 0x44d   :  { %7955 = vmatpush1.bf16.xpose.msra.mxu1 %v7809_v25 }
 0x452   :  { %7933 = vmatmul.mubr.bf16.vlgmr.msra.gmra.mxu0 %v7750_v5 }
 0x482   :  { %v7409_v14 = vpop.f32.mrf.mxu0 }
 0x483   :  { %v7410_v15 = vadd.f32 %v7409_v14, %v7369_v17 }
 0x484   :  { %v7450_v32 = vpop.f32.mrf.mxu1  ;;  %v7411_v39 = vpop.f32.mrf.mxu0 }
 0x485   :  { %v7451_v34 = vadd.f32 %v7450_v32, %v7410_v15  ;;  %v7412_v18 = vadd.f32 %v7411_v39, %v7371_v42 }
 0x486   :  { %v7452_v26 = vpop.f32.mrf.mxu1  ;;  %v7413_v21 = vpop.f32.mrf.mxu0 }
 0x487   :  { %v7453_v9 = vadd.f32 %v7452_v26, %v7412_v18 }
 0x488   :  { %v7454_v38 = vpop.f32.mrf.mxu1  ;;  %v7414_v41 = vpop.f32.mrf.mxu0 }
 0x48a   :  { %v7455_v36 = vpop.f32.mrf.mxu1 }
 0x4c2   :  { %v7491_v10 = vpop.f32.mrf.mxu0 }
 0x4c3   :  { %v7492_v45 = vadd.f32 %v7491_v10, %v7451_v34 }
 0x4c4   :  { %v7532_v31 = vpop.f32.mrf.mxu1  ;;  %v7493_v46 = vpop.f32.mrf.mxu0 }
 0x4c5   :  { %v7533_v40 = vadd.f32 %v7532_v31, %v7492_v45  ;;  %v7494_v35 = vadd.f32 %v7493_v46, %v7453_v9 }
 0x4c6   :  { %v7534_v33 = vpop.f32.mrf.mxu1  ;;  %v7495_v50 = vpop.f32.mrf.mxu0 }
 0x4c7   :  { %v7535_v47 = vadd.f32 %v7534_v33, %v7494_v35 }
 0x4c8   :  { %v7536_v16 = vpop.f32.mrf.mxu1  ;;  %v7496_v57 = vpop.f32.mrf.mxu0 }
 0x4ca   :  { %v7537_v55 = vpop.f32.mrf.mxu1 }
 0x502   :  { %v7573_v2 = vpop.f32.mrf.mxu0 }
 0x503   :  { %v7574_v60 = vadd.f32 %v7573_v2, %v7533_v40 }
 0x504   :  { %v7614_v61 = vpop.f32.mrf.mxu1  ;;  %v7575_v49 = vpop.f32.mrf.mxu0 }
 0x505   :  { %v7615_v19 = vadd.f32 %v7614_v61, %v7574_v60  ;;  %v7576_v58 = vadd.f32 %v7575_v49, %v7535_v47 }
 0x506   :  { %v7616_v7 = vpop.f32.mrf.mxu1  ;;  %v7577_v27 = vpop.f32.mrf.mxu0 }
 0x507   :  { %v7696_v59 = vadd.f32 %v7677_v62, %v7615_v19  ;;  %v7617_v3 = vadd.f32 %v7616_v7, %v7576_v58 }
 0x508   :  { %v7618_v11 = vpop.f32.mrf.mxu1  ;;  %v7578_v12 = vpop.f32.mrf.mxu0 }
 0x509   :  { %v9041_v6 = vmul.f32 -1.442695, %v7696_v59  ;;  %v7697_v37 = vadd.f32 %v7681_v63, %v7617_v3 }
 0x50a   :  { %v7619_v4 = vpop.f32.mrf.mxu1  ;;  %v7854_v17 = vpop.f32.mrf.mxu0 }
 0x50b   :  { %9094 = vpow2.f32 %v9041_v6  ;;  %v9042_v24 = vmul.f32 -1.442695, %v7697_v37  ;;  %v7855_v13 = vadd.f32 %v9043_v1, %v7854_v17 }
 0x50c   :  { %v7894_v8 = vpop.f32.mrf.mxu1  ;;  %v7856_v23 = vpop.f32.mrf.mxu0 }
 0x50d   :  { %9096 = vpow2.f32 %v9042_v24  ;;  %v7895_v42 = vadd.f32 %v7894_v8, %v7855_v13 }
 0x50e   :  { %v7896_v22 = vpop.f32.mrf.mxu1  ;;  %v7857_v29 = vpop.f32.mrf.mxu0 }
 0x510   :  { %v7897_v52 = vpop.f32.mrf.mxu1  ;;  %v7858_v0 = vpop.f32.mrf.mxu0 }
 0x512   :  { %v7898_v48 = vpop.f32.mrf.mxu1  ;;  %v7934_v53 = vpop.f32.mrf.mxu0 }
 0x513   :  { %v7935_v28 = vadd.f32 %v7934_v53, %v7895_v42 }
 0x514   :  { %v7936_v51 = vpop.f32.mrf.mxu0 }
 0x516   :  { %v7937_v43 = vpop.f32.mrf.mxu0 }
 0x518   :  { %v9095_v54 = vpop.eup %9094  ;;  %v7938_v30 = vpop.f32.mrf.mxu0 }
 0x519   :  { %v7728_v5 = vadd.f32 1.0, %v9095_v54 }
 0x51a   :  { %v9097_v14 = vpop.eup %9096 }
 0x51b   :  { %v7729_v15 = vadd.f32 1.0, %v9097_v14  ;;  %9098 = vrcp.f32 %v7728_v5 }
 0x51d   :  { %9100 = vrcp.f32 %v7729_v15 }
 0x528   :  { %v9099_v32 = vpop.eup %9098 }
 0x529   :  { %v7752_v18 = vpack.c.bf16 %v9099_v32, %v9099_v32 }
 0x52a   :  { %v9101_v39 = vpop.eup %9100 }
 0x52b   :  { %v7753_v34 = vpack.c.bf16 %v9101_v39, %v9101_v39 }
 0x52d   :  { %7972 = vmatprep.mubr.bf16.mxu1 %v7753_v34 }
 0x52e   :  { %7973 = vmatmul.mubr.bf16.vlgmr.msra.gmra.mxu1 %v7752_v18 }
 0x5ee   :  { %v7974_v26 = vpop.f32.mrf.mxu1 }
 0x5ef   :  { %v7975_v21 = vadd.f32 %v7974_v26, %v7935_v28 }
 0x5f0   :  { %v7976_v9 = vpop.f32.mrf.mxu1 }
 0x5f1   :  { %v9044_v38 = vmul.f32 -1.442695, %v7975_v21 }
 0x5f2   :  { %v7977_v41 = vpop.f32.mrf.mxu1 }
 0x5f3   :  { %9102 = vpow2.f32 %v9044_v38 }
 0x5f4   :  { %v7978_v36 = vpop.f32.mrf.mxu1 }
 0x600   :  { %v9103_v44 = vpop.eup %9102 }
 0x601   :  { %v7983_v25 = vadd.f32 1.0, %v9103_v44 }
 0x603   :  { %9104 = vrcp.f32 %v7983_v25 }
 0x610   :  { %v9105_v10 = vpop.eup %9104 }
 0x611   :  { %7987 = vst.msk [vmem:[%s9524_s5] sm:$0xff] %vm7986_vm0, %v9105_v10 }
 0x612   :  { %7992 = vsyncpa [#allocation4], 1 }
 0x613   :  { %7993 = vsyncpa [#allocation6], 1 }
 0x614   :  { %7994 = vsyncpa [#allocation9], 1 }

</bundles_post_ra>
